<compile_context>
chip_gen: v7x
topology: tpu7x:2x2x1
jax: 0.10.0
libtpu: 0.0.40
codegen_flags: <defaults>
</compile_context>

<pallas_src>
import jax
import jax.numpy as jnp
from jax.experimental import pallas as pl
from jax.experimental.pallas import tpu as pltpu


# -----------------------------------------------------------------------------
# Fused Pallas kernel: all LSTM layers + timesteps + FC head in one invocation.
# -----------------------------------------------------------------------------
def _lstm_classifier_kernel(x_ref, w_ih0_ref, w_ih_rest_ref, w_hh_ref, b_ref,
                            fc_w_ref, fc_b_ref, out_ref, seq_scr):
    TB, _F = x_ref.shape               # TB = T * B_pad (time-major, 2D, bf16)
    L, H, H4 = w_hh_ref.shape          # H4 == 4 * H
    B = out_ref.shape[0]               # padded batch (multiple of 8 sublanes)
    T = TB // B

    # Hoisted lane masks: computed ONCE (JAX does not CSE broadcast_in_dim).
    # Gate order matches PyTorch: (i, f, g, o); only 'g' lanes use tanh.
    lane = jax.lax.broadcasted_iota(jnp.int32, (B, H4), 1)
    tanh_lane = (lane >= 2 * H) & (lane < 3 * H)
    scale = jnp.where(tanh_lane, 1.0, 0.5).astype(jnp.float32)
    offset = jnp.where(tanh_lane, 0.0, 0.5).astype(jnp.float32)

    def run_layer(xp, w_hh_bf16, is_last):
        """xp: (T*B, 4H) f32 hoisted input projection (bias already folded)."""
        h = jnp.zeros((B, H), jnp.float32)
        c = jnp.zeros((B, H), jnp.float32)
        # T is tiny (8) and static: a Python loop keeps every slice static.
        # TODO(synk): for large H/T, stage xp in VMEM scratch + lax.fori_loop
        #             to bound vreg live ranges; and hold w_hh in the MXU with
        #             pltpu.matmul_push_rhs / matmul_acc_lhs / matmul_pop.
        for t in range(T):
            gates = xp[t * B:(t + 1) * B, :] + jnp.dot(
                h.astype(jnp.bfloat16), w_hh_bf16,
                preferred_element_type=jnp.float32)
            # Single EUP tanh per slab: sigmoid(x) == 0.5 * (tanh(x/2) + 1).
            t_act = jnp.tanh(gates * scale)
            act = t_act * scale + offset
            i_g = act[:, 0 * H:1 * H]
            f_g = act[:, 1 * H:2 * H]
            g_g = act[:, 2 * H:3 * H]
            o_g = act[:, 3 * H:4 * H]
            c = f_g * c + i_g * g_g
            h = o_g * jnp.tanh(c)
            if not is_last:
                # Next layer's input stays in VMEM (static, sublane-aligned).
                seq_scr[t * B:(t + 1) * B, :] = h
        return h

    # Layer 0: project the raw input sequence in one MXU call, off the serial path.
    xp0 = (jnp.dot(x_ref[...], w_ih0_ref[...],
                   preferred_element_type=jnp.float32) + b_ref[0])
    h_last = run_layer(xp0, w_hh_ref[0], is_last=(L == 1))

    # Layers 1..L-1: consume the 2D hidden sequence left in VMEM scratch
    # directly (no in-kernel reshape -> no relayout copy).
    for layer in range(1, L):
        xp = (jnp.dot(seq_scr[...].astype(jnp.bfloat16),
                      w_ih_rest_ref[layer - 1],
                      preferred_element_type=jnp.float32) + b_ref[layer])
        h_last = run_layer(xp, w_hh_ref[layer], is_last=(layer == L - 1))

    # FC head epilogue: logits = h_T @ W_fc^T + b_fc  (only HBM write, lane-dense).
    out_ref[...] = (jnp.dot(h_last.astype(jnp.bfloat16), fc_w_ref[...],
                            preferred_element_type=jnp.float32)
                    + fc_b_ref[...])


def _full_spec(shape):
    """Whole-array-resident BlockSpec (kernel has no grid)."""
    return pl.BlockSpec(shape, lambda: (0,) * len(shape))


# -----------------------------------------------------------------------------
# Wrapper
# -----------------------------------------------------------------------------
@jax.jit
def lstm_classifier_forward(x, params):
    """x: (B, T, input_size) batch-first, like the PyTorch module."""
    x = x.astype(jnp.float32)
    B, T, F = x.shape
    L, H, H4 = params["w_hh_t"].shape
    C = params["fc_w_t"].shape[1]
    B_pad = max(8, -(-B // 8) * 8)          # full sublanes
    C_pad = max(128, -(-C // 128) * 128)    # lane-dense FC head / output store

    # One relayout in XLA: batch-first -> time-major, pad batch, flatten to 2D.
    x_tm = jnp.transpose(x, (1, 0, 2))
    if B_pad != B:
        x_tm = jnp.pad(x_tm, ((0, 0), (0, B_pad - B), (0, 0)))
    x2d = x_tm.reshape(T * B_pad, F).astype(jnp.bfloat16)

    # MXU operands pre-cast to bf16 once; gate/state math stays f32 in-kernel.
    w_ih0 = params["w_ih0_t"].astype(jnp.bfloat16)
    w_ih_rest = params["w_ih_rest_t"].astype(jnp.bfloat16)
    w_hh = params["w_hh_t"].astype(jnp.bfloat16)
    fc_w = jnp.pad(params["fc_w_t"], ((0, 0), (0, C_pad - C))).astype(jnp.bfloat16)
    fc_b = jnp.pad(params["fc_b"], ((0, 0), (0, C_pad - C)))

    out_pad = pl.pallas_call(
        _lstm_classifier_kernel,
        out_shape=jax.ShapeDtypeStruct((B_pad, C_pad), jnp.float32),
        in_specs=[
            _full_spec((T * B_pad, F)),        # x (time-major, 2D, bf16)
            _full_spec(w_ih0.shape),           # (F, 4H)
            _full_spec(w_ih_rest.shape),       # (L-1, H, 4H)
            _full_spec(w_hh.shape),            # (L, H, 4H)
            _full_spec(params["b"].shape),     # (L, 1, 4H)  f32
            _full_spec(fc_w.shape),            # (H, C_pad)
            _full_spec(fc_b.shape),            # (1, C_pad)  f32
        ],
        out_specs=_full_spec((B_pad, C_pad)),
        scratch_shapes=[pltpu.VMEM((T * B_pad, H), jnp.float32)],  # hidden seq
        compiler_params=pltpu.CompilerParams(
            # Resident weights + scratch are < 0.25 MiB here, comfortably
            # under every generation's scoped limit (v7x: 64 MiB physical).
            vmem_limit_bytes=32 * 1024 * 1024,
        ),
    )(x2d, w_ih0, w_ih_rest, w_hh, params["b"], fc_w, fc_b)
    # TODO(synk): on v7x with larger batch, add a 'parallel' batch grid axis so
    #             the second TensorCore is used.
    return out_pad[:B, :C]


# -----------------------------------------------------------------------------
# Parameters (PyTorch-style uniform init), stored pre-transposed / stacked.
# -----------------------------------------------------------------------------
def init_params(key, input_size, hidden_size, num_layers, num_classes):
    H, L = hidden_size, num_layers
    bound = 1.0 / (H ** 0.5)

    w_ih_list, w_hh_list, b_list = [], [], []
    for layer in range(L):
        in_dim = input_size if layer == 0 else H
        key, k1, k2, k3, k4 = jax.random.split(key, 5)
        w_ih_list.append(jax.random.uniform(k1, (in_dim, 4 * H),
                                            jnp.float32, -bound, bound))
        w_hh_list.append(jax.random.uniform(k2, (H, 4 * H),
                                            jnp.float32, -bound, bound))
        b_ih = jax.random.uniform(k3, (4 * H,), jnp.float32, -bound, bound)
        b_hh = jax.random.uniform(k4, (4 * H,), jnp.float32, -bound, bound)
        b_list.append((b_ih + b_hh).reshape(1, 4 * H))

    key, k5, k6 = jax.random.split(key, 3)
    return {
        "w_ih0_t": w_ih_list[0],
        "w_ih_rest_t": (jnp.stack(w_ih_list[1:]) if L > 1
                        else jnp.zeros((1, H, 4 * H), jnp.float32)),
        "w_hh_t": jnp.stack(w_hh_list),
        "b": jnp.stack(b_list),
        "fc_w_t": jax.random.uniform(k5, (H, num_classes),
                                     jnp.float32, -bound, bound),
        "fc_b": jax.random.uniform(k6, (1, num_classes),
                                   jnp.float32, -bound, bound),
    }


# -----------------------------------------------------------------------------
# Pure-JAX f32 reference (PyTorch LSTM semantics) for correctness check.
# -----------------------------------------------------------------------------
def reference_forward(x, params):
    x = x.astype(jnp.float32)
    B, T, _F = x.shape
    L, H, _ = params["w_hh_t"].shape
    seq = jnp.transpose(x, (1, 0, 2))          # (T, B, F)
    for layer in range(L):
        w_ih = params["w_ih0_t"] if layer == 0 else params["w_ih_rest_t"][layer - 1]
        w_hh = params["w_hh_t"][layer]
        b = params["b"][layer]
        h = jnp.zeros((B, H), jnp.float32)
        c = jnp.zeros((B, H), jnp.float32)
        outs = []
        for t in range(T):
            gates = seq[t] @ w_ih + h @ w_hh + b
            i = jax.nn.sigmoid(gates[:, 0 * H:1 * H])
            f = jax.nn.sigmoid(gates[:, 1 * H:2 * H])
            g = jnp.tanh(gates[:, 2 * H:3 * H])
            o = jax.nn.sigmoid(gates[:, 3 * H:4 * H])
            c = f * c + i * g
            h = o * jnp.tanh(c)
            outs.append(h)
        seq = jnp.stack(outs)
    return seq[-1] @ params["fc_w_t"] + params["fc_b"]


if __name__ == "__main__":
    # Small shapes consistent with the module's forward pass.
    batch = 2
    seq_len = 8
    input_size = 16      # num_features
    hidden_size = 32
    num_layers = 5
    num_classes = 5

    key = jax.random.PRNGKey(0)
    key, kx = jax.random.split(key)
    x = jax.random.normal(kx, (batch, seq_len, input_size), jnp.float32)
    params = init_params(key, input_size, hidden_size, num_layers, num_classes)

    out = jax.block_until_ready(lstm_classifier_forward(x, params))
    assert out.shape == (batch, num_classes)

    ref = jax.block_until_ready(reference_forward(x, params))
    # bf16 MXU operands (f32 accumulation) loosen the tolerance vs. the pure
    # f32 reference; gate/state math remains f32.
    assert jnp.allclose(out, ref, rtol=2e-2, atol=2e-2), (
        f"max abs err {jnp.max(jnp.abs(out - ref))}")

    print("KERNEL_OK")
</pallas_src>

<mosaic_0001>
module attributes {stable_mosaic.version = 11 : i64} {
  func.func @_lstm_classifier_kernel(%arg0: memref<64x16xbf16, #tpu.memory_space<vmem>>, %arg1: memref<16x128xbf16, #tpu.memory_space<vmem>>, %arg2: memref<4x32x128xbf16, #tpu.memory_space<vmem>>, %arg3: memref<5x32x128xbf16, #tpu.memory_space<vmem>>, %arg4: memref<5x1x128xf32, #tpu.memory_space<vmem>>, %arg5: memref<32x128xbf16, #tpu.memory_space<vmem>>, %arg6: memref<1x128xf32, #tpu.memory_space<vmem>>, %arg7: memref<8x128xf32, #tpu.memory_space<vmem>>, %arg8: memref<64x32xf32, #tpu.memory_space<vmem>>) attributes {dimension_semantics = [], scalar_prefetch = 0 : i64, scratch_operands = 1 : i64, tpu.core_type = #tpu.core_type<tc>} {
    %0 = tpu.iota {dimensions = array<i32: 1>} : vector<8x128xi32>
    %c64_i32 = arith.constant 64 : i32
    %1 = vector.broadcast %c64_i32 : i32 to vector<8x128xi32>
    %2 = arith.cmpi sge, %0, %1 : vector<8x128xi32>
    %c96_i32 = arith.constant 96 : i32
    %3 = vector.broadcast %c96_i32 : i32 to vector<8x128xi32>
    %4 = arith.cmpi slt, %0, %3 : vector<8x128xi32>
    %5 = arith.andi %2, %4 : vector<8x128xi1>
    %cst = arith.constant 1.000000e+00 : f32
    %cst_0 = arith.constant 5.000000e-01 : f32
    %6 = vector.broadcast %cst : f32 to vector<8x128xf32>
    %7 = vector.broadcast %cst_0 : f32 to vector<8x128xf32>
    %8 = arith.select %5, %6, %7 : vector<8x128xi1>, vector<8x128xf32>
    %cst_1 = arith.constant 0.000000e+00 : f32
    %cst_2 = arith.constant 5.000000e-01 : f32
    %9 = vector.broadcast %cst_1 : f32 to vector<8x128xf32>
    %10 = vector.broadcast %cst_2 : f32 to vector<8x128xf32>
    %11 = arith.select %5, %9, %10 : vector<8x128xi1>, vector<8x128xf32>
    %c0 = arith.constant 0 : index
    %c0_3 = arith.constant 0 : index
    %12 = vector.load %arg0[%c0, %c0_3] : memref<64x16xbf16, #tpu.memory_space<vmem>>, vector<64x16xbf16>
    %c0_4 = arith.constant 0 : index
    %c0_5 = arith.constant 0 : index
    %13 = vector.load %arg1[%c0_4, %c0_5] : memref<16x128xbf16, #tpu.memory_space<vmem>>, vector<16x128xbf16>
    %cst_6 = arith.constant dense<0.000000e+00> : vector<64x128xf32>
    %14 = tpu.matmul %12, %13, %cst_6 {dimension_numbers = #tpu.dot_dimension_numbers<[1], [0], [0], [1], [0, 0, 1, 1], [], []>} : vector<64x16xbf16>, vector<16x128xbf16>, vector<64x128xf32> -> vector<64x128xf32>
    %c0_7 = arith.constant 0 : index
    %c0_8 = arith.constant 0 : index
    %c0_9 = arith.constant 0 : index
    %15 = vector.load %arg4[%c0_7, %c0_8, %c0_9] : memref<5x1x128xf32, #tpu.memory_space<vmem>>, vector<1x1x128xf32>
    %16 = vector.shape_cast %15 : vector<1x1x128xf32> to vector<1x128xf32>
    %17 = vector.broadcast %16 : vector<1x128xf32> to vector<64x128xf32>
    %18 = arith.addf %14, %17 : vector<64x128xf32>
    %c0_10 = arith.constant 0 : index
    %c0_11 = arith.constant 0 : index
    %c0_12 = arith.constant 0 : index
    %19 = vector.load %arg3[%c0_10, %c0_11, %c0_12] : memref<5x32x128xbf16, #tpu.memory_space<vmem>>, vector<1x32x128xbf16>
    %20 = vector.shape_cast %19 : vector<1x32x128xbf16> to vector<32x128xbf16>
    %cst_13 = arith.constant 0.000000e+00 : f32
    %21 = vector.broadcast %cst_13 : f32 to vector<8x32xf32>
    %cst_14 = arith.constant 0.000000e+00 : f32
    %22 = vector.broadcast %cst_14 : f32 to vector<8x32xf32>
    %23 = vector.extract_strided_slice %18 {offsets = [0, 0], sizes = [8, 128], strides = [1, 1]} : vector<64x128xf32> to vector<8x128xf32>
    %24 = arith.truncf %21 : vector<8x32xf32> to vector<8x32xbf16>
    %cst_15 = arith.constant dense<0.000000e+00> : vector<8x128xf32>
    %25 = tpu.matmul %24, %20, %cst_15 {dimension_numbers = #tpu.dot_dimension_numbers<[1], [0], [0], [1], [0, 0, 1, 1], [], []>} : vector<8x32xbf16>, vector<32x128xbf16>, vector<8x128xf32> -> vector<8x128xf32>
    %26 = arith.addf %23, %25 : vector<8x128xf32>
    %27 = arith.mulf %26, %8 : vector<8x128xf32>
    %28 = math.tanh %27 : vector<8x128xf32>
    %29 = arith.mulf %28, %8 : vector<8x128xf32>
    %30 = arith.addf %29, %11 : vector<8x128xf32>
    %31 = vector.extract_strided_slice %30 {offsets = [0, 0], sizes = [8, 32], strides = [1, 1]} : vector<8x128xf32> to vector<8x32xf32>
    %32 = vector.extract_strided_slice %30 {offsets = [0, 32], sizes = [8, 32], strides = [1, 1]} : vector<8x128xf32> to vector<8x32xf32>
    %33 = vector.extract_strided_slice %30 {offsets = [0, 64], sizes = [8, 32], strides = [1, 1]} : vector<8x128xf32> to vector<8x32xf32>
    %34 = vector.extract_strided_slice %30 {offsets = [0, 96], sizes = [8, 32], strides = [1, 1]} : vector<8x128xf32> to vector<8x32xf32>
    %35 = arith.mulf %32, %22 : vector<8x32xf32>
    %36 = arith.mulf %31, %33 : vector<8x32xf32>
    %37 = arith.addf %35, %36 : vector<8x32xf32>
    %38 = math.tanh %37 : vector<8x32xf32>
    %39 = arith.mulf %34, %38 : vector<8x32xf32>
    %c0_16 = arith.constant 0 : index
    %c0_17 = arith.constant 0 : index
    %40 = vector.load %arg8[%c0_16, %c0_17] : memref<64x32xf32, #tpu.memory_space<vmem>>, vector<8x32xf32>
    tpu.vector_store %arg8[%c0_16, %c0_17], %39 {strides = array<i32>} : memref<64x32xf32, #tpu.memory_space<vmem>>, vector<8x32xf32>,
    %41 = vector.extract_strided_slice %18 {offsets = [8, 0], sizes = [8, 128], strides = [1, 1]} : vector<64x128xf32> to vector<8x128xf32>
    %42 = arith.truncf %39 : vector<8x32xf32> to vector<8x32xbf16>
    %cst_18 = arith.constant dense<0.000000e+00> : vector<8x128xf32>
    %43 = tpu.matmul %42, %20, %cst_18 {dimension_numbers = #tpu.dot_dimension_numbers<[1], [0], [0], [1], [0, 0, 1, 1], [], []>} : vector<8x32xbf16>, vector<32x128xbf16>, vector<8x128xf32> -> vector<8x128xf32>
    %44 = arith.addf %41, %43 : vector<8x128xf32>
    %45 = arith.mulf %44, %8 : vector<8x128xf32>
    %46 = math.tanh %45 : vector<8x128xf32>
    %47 = arith.mulf %46, %8 : vector<8x128xf32>
    %48 = arith.addf %47, %11 : vector<8x128xf32>
    %49 = vector.extract_strided_slice %48 {offsets = [0, 0], sizes = [8, 32], strides = [1, 1]} : vector<8x128xf32> to vector<8x32xf32>
    %50 = vector.extract_strided_slice %48 {offsets = [0, 32], sizes = [8, 32], strides = [1, 1]} : vector<8x128xf32> to vector<8x32xf32>
    %51 = vector.extract_strided_slice %48 {offsets = [0, 64], sizes = [8, 32], strides = [1, 1]} : vector<8x128xf32> to vector<8x32xf32>
    %52 = vector.extract_strided_slice %48 {offsets = [0, 96], sizes = [8, 32], strides = [1, 1]} : vector<8x128xf32> to vector<8x32xf32>
    %53 = arith.mulf %50, %37 : vector<8x32xf32>
    %54 = arith.mulf %49, %51 : vector<8x32xf32>
    %55 = arith.addf %53, %54 : vector<8x32xf32>
    %56 = math.tanh %55 : vector<8x32xf32>
    %57 = arith.mulf %52, %56 : vector<8x32xf32>
    %c8 = arith.constant 8 : index
    %c0_19 = arith.constant 0 : index
    %58 = vector.load %arg8[%c8, %c0_19] : memref<64x32xf32, #tpu.memory_space<vmem>>, vector<8x32xf32>
    tpu.vector_store %arg8[%c8, %c0_19], %57 {strides = array<i32>} : memref<64x32xf32, #tpu.memory_space<vmem>>, vector<8x32xf32>,
    %59 = vector.extract_strided_slice %18 {offsets = [16, 0], sizes = [8, 128], strides = [1, 1]} : vector<64x128xf32> to vector<8x128xf32>
    %60 = arith.truncf %57 : vector<8x32xf32> to vector<8x32xbf16>
    %cst_20 = arith.constant dense<0.000000e+00> : vector<8x128xf32>
    %61 = tpu.matmul %60, %20, %cst_20 {dimension_numbers = #tpu.dot_dimension_numbers<[1], [0], [0], [1], [0, 0, 1, 1], [], []>} : vector<8x32xbf16>, vector<32x128xbf16>, vector<8x128xf32> -> vector<8x128xf32>
    %62 = arith.addf %59, %61 : vector<8x128xf32>
    %63 = arith.mulf %62, %8 : vector<8x128xf32>
    %64 = math.tanh %63 : vector<8x128xf32>
    %65 = arith.mulf %64, %8 : vector<8x128xf32>
    %66 = arith.addf %65, %11 : vector<8x128xf32>
    %67 = vector.extract_strided_slice %66 {offsets = [0, 0], sizes = [8, 32], strides = [1, 1]} : vector<8x128xf32> to vector<8x32xf32>
    %68 = vector.extract_strided_slice %66 {offsets = [0, 32], sizes = [8, 32], strides = [1, 1]} : vector<8x128xf32> to vector<8x32xf32>
    %69 = vector.extract_strided_slice %66 {offsets = [0, 64], sizes = [8, 32], strides = [1, 1]} : vector<8x128xf32> to vector<8x32xf32>
    %70 = vector.extract_strided_slice %66 {offsets = [0, 96], sizes = [8, 32], strides = [1, 1]} : vector<8x128xf32> to vector<8x32xf32>
    %71 = arith.mulf %68, %55 : vector<8x32xf32>
    %72 = arith.mulf %67, %69 : vector<8x32xf32>
    %73 = arith.addf %71, %72 : vector<8x32xf32>
    %74 = math.tanh %73 : vector<8x32xf32>
    %75 = arith.mulf %70, %74 : vector<8x32xf32>
    %c16 = arith.constant 16 : index
    %c0_21 = arith.constant 0 : index
    %76 = vector.load %arg8[%c16, %c0_21] : memref<64x32xf32, #tpu.memory_space<vmem>>, vector<8x32xf32>
    tpu.vector_store %arg8[%c16, %c0_21], %75 {strides = array<i32>} : memref<64x32xf32, #tpu.memory_space<vmem>>, vector<8x32xf32>,
    %77 = vector.extract_strided_slice %18 {offsets = [24, 0], sizes = [8, 128], strides = [1, 1]} : vector<64x128xf32> to vector<8x128xf32>
    %78 = arith.truncf %75 : vector<8x32xf32> to vector<8x32xbf16>
    %cst_22 = arith.constant dense<0.000000e+00> : vector<8x128xf32>
    %79 = tpu.matmul %78, %20, %cst_22 {dimension_numbers = #tpu.dot_dimension_numbers<[1], [0], [0], [1], [0, 0, 1, 1], [], []>} : vector<8x32xbf16>, vector<32x128xbf16>, vector<8x128xf32> -> vector<8x128xf32>
    %80 = arith.addf %77, %79 : vector<8x128xf32>
    %81 = arith.mulf %80, %8 : vector<8x128xf32>
    %82 = math.tanh %81 : vector<8x128xf32>
    %83 = arith.mulf %82, %8 : vector<8x128xf32>
    %84 = arith.addf %83, %11 : vector<8x128xf32>
    %85 = vector.extract_strided_slice %84 {offsets = [0, 0], sizes = [8, 32], strides = [1, 1]} : vector<8x128xf32> to vector<8x32xf32>
    %86 = vector.extract_strided_slice %84 {offsets = [0, 32], sizes = [8, 32], strides = [1, 1]} : vector<8x128xf32> to vector<8x32xf32>
    %87 = vector.extract_strided_slice %84 {offsets = [0, 64], sizes = [8, 32], strides = [1, 1]} : vector<8x128xf32> to vector<8x32xf32>
    %88 = vector.extract_strided_slice %84 {offsets = [0, 96], sizes = [8, 32], strides = [1, 1]} : vector<8x128xf32> to vector<8x32xf32>
    %89 = arith.mulf %86, %73 : vector<8x32xf32>
    %90 = arith.mulf %85, %87 : vector<8x32xf32>
    %91 = arith.addf %89, %90 : vector<8x32xf32>
    %92 = math.tanh %91 : vector<8x32xf32>
    %93 = arith.mulf %88, %92 : vector<8x32xf32>
    %c24 = arith.constant 24 : index
    %c0_23 = arith.constant 0 : index
    %94 = vector.load %arg8[%c24, %c0_23] : memref<64x32xf32, #tpu.memory_space<vmem>>, vector<8x32xf32>
    tpu.vector_store %arg8[%c24, %c0_23], %93 {strides = array<i32>} : memref<64x32xf32, #tpu.memory_space<vmem>>, vector<8x32xf32>,
    %95 = vector.extract_strided_slice %18 {offsets = [32, 0], sizes = [8, 128], strides = [1, 1]} : vector<64x128xf32> to vector<8x128xf32>
    %96 = arith.truncf %93 : vector<8x32xf32> to vector<8x32xbf16>
    %cst_24 = arith.constant dense<0.000000e+00> : vector<8x128xf32>
    %97 = tpu.matmul %96, %20, %cst_24 {dimension_numbers = #tpu.dot_dimension_numbers<[1], [0], [0], [1], [0, 0, 1, 1], [], []>} : vector<8x32xbf16>, vector<32x128xbf16>, vector<8x128xf32> -> vector<8x128xf32>
    %98 = arith.addf %95, %97 : vector<8x128xf32>
    %99 = arith.mulf %98, %8 : vector<8x128xf32>
    %100 = math.tanh %99 : vector<8x128xf32>
    %101 = arith.mulf %100, %8 : vector<8x128xf32>
    %102 = arith.addf %101, %11 : vector<8x128xf32>
    %103 = vector.extract_strided_slice %102 {offsets = [0, 0], sizes = [8, 32], strides = [1, 1]} : vector<8x128xf32> to vector<8x32xf32>
    %104 = vector.extract_strided_slice %102 {offsets = [0, 32], sizes = [8, 32], strides = [1, 1]} : vector<8x128xf32> to vector<8x32xf32>
    %105 = vector.extract_strided_slice %102 {offsets = [0, 64], sizes = [8, 32], strides = [1, 1]} : vector<8x128xf32> to vector<8x32xf32>
    %106 = vector.extract_strided_slice %102 {offsets = [0, 96], sizes = [8, 32], strides = [1, 1]} : vector<8x128xf32> to vector<8x32xf32>
    %107 = arith.mulf %104, %91 : vector<8x32xf32>
    %108 = arith.mulf %103, %105 : vector<8x32xf32>
    %109 = arith.addf %107, %108 : vector<8x32xf32>
    %110 = math.tanh %109 : vector<8x32xf32>
    %111 = arith.mulf %106, %110 : vector<8x32xf32>
    %c32 = arith.constant 32 : index
    %c0_25 = arith.constant 0 : index
    %112 = vector.load %arg8[%c32, %c0_25] : memref<64x32xf32, #tpu.memory_space<vmem>>, vector<8x32xf32>
    tpu.vector_store %arg8[%c32, %c0_25], %111 {strides = array<i32>} : memref<64x32xf32, #tpu.memory_space<vmem>>, vector<8x32xf32>,
    %113 = vector.extract_strided_slice %18 {offsets = [40, 0], sizes = [8, 128], strides = [1, 1]} : vector<64x128xf32> to vector<8x128xf32>
    %114 = arith.truncf %111 : vector<8x32xf32> to vector<8x32xbf16>
    %cst_26 = arith.constant dense<0.000000e+00> : vector<8x128xf32>
    %115 = tpu.matmul %114, %20, %cst_26 {dimension_numbers = #tpu.dot_dimension_numbers<[1], [0], [0], [1], [0, 0, 1, 1], [], []>} : vector<8x32xbf16>, vector<32x128xbf16>, vector<8x128xf32> -> vector<8x128xf32>
    %116 = arith.addf %113, %115 : vector<8x128xf32>
    %117 = arith.mulf %116, %8 : vector<8x128xf32>
    %118 = math.tanh %117 : vector<8x128xf32>
    %119 = arith.mulf %118, %8 : vector<8x128xf32>
    %120 = arith.addf %119, %11 : vector<8x128xf32>
    %121 = vector.extract_strided_slice %120 {offsets = [0, 0], sizes = [8, 32], strides = [1, 1]} : vector<8x128xf32> to vector<8x32xf32>
    %122 = vector.extract_strided_slice %120 {offsets = [0, 32], sizes = [8, 32], strides = [1, 1]} : vector<8x128xf32> to vector<8x32xf32>
    %123 = vector.extract_strided_slice %120 {offsets = [0, 64], sizes = [8, 32], strides = [1, 1]} : vector<8x128xf32> to vector<8x32xf32>
    %124 = vector.extract_strided_slice %120 {offsets = [0, 96], sizes = [8, 32], strides = [1, 1]} : vector<8x128xf32> to vector<8x32xf32>
    %125 = arith.mulf %122, %109 : vector<8x32xf32>
    %126 = arith.mulf %121, %123 : vector<8x32xf32>
    %127 = arith.addf %125, %126 : vector<8x32xf32>
    %128 = math.tanh %127 : vector<8x32xf32>
    %129 = arith.mulf %124, %128 : vector<8x32xf32>
    %c40 = arith.constant 40 : index
    %c0_27 = arith.constant 0 : index
    %130 = vector.load %arg8[%c40, %c0_27] : memref<64x32xf32, #tpu.memory_space<vmem>>, vector<8x32xf32>
    tpu.vector_store %arg8[%c40, %c0_27], %129 {strides = array<i32>} : memref<64x32xf32, #tpu.memory_space<vmem>>, vector<8x32xf32>,
    %131 = vector.extract_strided_slice %18 {offsets = [48, 0], sizes = [8, 128], strides = [1, 1]} : vector<64x128xf32> to vector<8x128xf32>
    %132 = arith.truncf %129 : vector<8x32xf32> to vector<8x32xbf16>
    %cst_28 = arith.constant dense<0.000000e+00> : vector<8x128xf32>
    %133 = tpu.matmul %132, %20, %cst_28 {dimension_numbers = #tpu.dot_dimension_numbers<[1], [0], [0], [1], [0, 0, 1, 1], [], []>} : vector<8x32xbf16>, vector<32x128xbf16>, vector<8x128xf32> -> vector<8x128xf32>
    %134 = arith.addf %131, %133 : vector<8x128xf32>
    %135 = arith.mulf %134, %8 : vector<8x128xf32>
    %136 = math.tanh %135 : vector<8x128xf32>
    %137 = arith.mulf %136, %8 : vector<8x128xf32>
    %138 = arith.addf %137, %11 : vector<8x128xf32>
    %139 = vector.extract_strided_slice %138 {offsets = [0, 0], sizes = [8, 32], strides = [1, 1]} : vector<8x128xf32> to vector<8x32xf32>
    %140 = vector.extract_strided_slice %138 {offsets = [0, 32], sizes = [8, 32], strides = [1, 1]} : vector<8x128xf32> to vector<8x32xf32>
    %141 = vector.extract_strided_slice %138 {offsets = [0, 64], sizes = [8, 32], strides = [1, 1]} : vector<8x128xf32> to vector<8x32xf32>
    %142 = vector.extract_strided_slice %138 {offsets = [0, 96], sizes = [8, 32], strides = [1, 1]} : vector<8x128xf32> to vector<8x32xf32>
    %143 = arith.mulf %140, %127 : vector<8x32xf32>
    %144 = arith.mulf %139, %141 : vector<8x32xf32>
    %145 = arith.addf %143, %144 : vector<8x32xf32>
    %146 = math.tanh %145 : vector<8x32xf32>
    %147 = arith.mulf %142, %146 : vector<8x32xf32>
    %c48 = arith.constant 48 : index
    %c0_29 = arith.constant 0 : index
    %148 = vector.load %arg8[%c48, %c0_29] : memref<64x32xf32, #tpu.memory_space<vmem>>, vector<8x32xf32>
    tpu.vector_store %arg8[%c48, %c0_29], %147 {strides = array<i32>} : memref<64x32xf32, #tpu.memory_space<vmem>>, vector<8x32xf32>,
    %149 = vector.extract_strided_slice %18 {offsets = [56, 0], sizes = [8, 128], strides = [1, 1]} : vector<64x128xf32> to vector<8x128xf32>
    %150 = arith.truncf %147 : vector<8x32xf32> to vector<8x32xbf16>
    %cst_30 = arith.constant dense<0.000000e+00> : vector<8x128xf32>
    %151 = tpu.matmul %150, %20, %cst_30 {dimension_numbers = #tpu.dot_dimension_numbers<[1], [0], [0], [1], [0, 0, 1, 1], [], []>} : vector<8x32xbf16>, vector<32x128xbf16>, vector<8x128xf32> -> vector<8x128xf32>
    %152 = arith.addf %149, %151 : vector<8x128xf32>
    %153 = arith.mulf %152, %8 : vector<8x128xf32>
    %154 = math.tanh %153 : vector<8x128xf32>
    %155 = arith.mulf %154, %8 : vector<8x128xf32>
    %156 = arith.addf %155, %11 : vector<8x128xf32>
    %157 = vector.extract_strided_slice %156 {offsets = [0, 0], sizes = [8, 32], strides = [1, 1]} : vector<8x128xf32> to vector<8x32xf32>
    %158 = vector.extract_strided_slice %156 {offsets = [0, 32], sizes = [8, 32], strides = [1, 1]} : vector<8x128xf32> to vector<8x32xf32>
    %159 = vector.extract_strided_slice %156 {offsets = [0, 64], sizes = [8, 32], strides = [1, 1]} : vector<8x128xf32> to vector<8x32xf32>
    %160 = vector.extract_strided_slice %156 {offsets = [0, 96], sizes = [8, 32], strides = [1, 1]} : vector<8x128xf32> to vector<8x32xf32>
    %161 = arith.mulf %158, %145 : vector<8x32xf32>
    %162 = arith.mulf %157, %159 : vector<8x32xf32>
    %163 = arith.addf %161, %162 : vector<8x32xf32>
    %164 = math.tanh %163 : vector<8x32xf32>
    %165 = arith.mulf %160, %164 : vector<8x32xf32>
    %c56 = arith.constant 56 : index
    %c0_31 = arith.constant 0 : index
    %166 = vector.load %arg8[%c56, %c0_31] : memref<64x32xf32, #tpu.memory_space<vmem>>, vector<8x32xf32>
    tpu.vector_store %arg8[%c56, %c0_31], %165 {strides = array<i32>} : memref<64x32xf32, #tpu.memory_space<vmem>>, vector<8x32xf32>,
    %c0_32 = arith.constant 0 : index
    %c0_33 = arith.constant 0 : index
    %167 = vector.load %arg8[%c0_32, %c0_33] : memref<64x32xf32, #tpu.memory_space<vmem>>, vector<64x32xf32>
    %168 = arith.truncf %167 : vector<64x32xf32> to vector<64x32xbf16>
    %c0_34 = arith.constant 0 : index
    %c0_35 = arith.constant 0 : index
    %c0_36 = arith.constant 0 : index
    %169 = vector.load %arg2[%c0_34, %c0_35, %c0_36] : memref<4x32x128xbf16, #tpu.memory_space<vmem>>, vector<1x32x128xbf16>
    %170 = vector.shape_cast %169 : vector<1x32x128xbf16> to vector<32x128xbf16>
    %cst_37 = arith.constant dense<0.000000e+00> : vector<64x128xf32>
    %171 = tpu.matmul %168, %170, %cst_37 {dimension_numbers = #tpu.dot_dimension_numbers<[1], [0], [0], [1], [0, 0, 1, 1], [], []>} : vector<64x32xbf16>, vector<32x128xbf16>, vector<64x128xf32> -> vector<64x128xf32>
    %c1 = arith.constant 1 : index
    %c0_38 = arith.constant 0 : index
    %c0_39 = arith.constant 0 : index
    %172 = vector.load %arg4[%c1, %c0_38, %c0_39] : memref<5x1x128xf32, #tpu.memory_space<vmem>>, vector<1x1x128xf32>
    %173 = vector.shape_cast %172 : vector<1x1x128xf32> to vector<1x128xf32>
    %174 = vector.broadcast %173 : vector<1x128xf32> to vector<64x128xf32>
    %175 = arith.addf %171, %174 : vector<64x128xf32>
    %c1_40 = arith.constant 1 : index
    %c0_41 = arith.constant 0 : index
    %c0_42 = arith.constant 0 : index
    %176 = vector.load %arg3[%c1_40, %c0_41, %c0_42] : memref<5x32x128xbf16, #tpu.memory_space<vmem>>, vector<1x32x128xbf16>
    %177 = vector.shape_cast %176 : vector<1x32x128xbf16> to vector<32x128xbf16>
    %cst_43 = arith.constant 0.000000e+00 : f32
    %178 = vector.broadcast %cst_43 : f32 to vector<8x32xf32>
    %cst_44 = arith.constant 0.000000e+00 : f32
    %179 = vector.broadcast %cst_44 : f32 to vector<8x32xf32>
    %180 = vector.extract_strided_slice %175 {offsets = [0, 0], sizes = [8, 128], strides = [1, 1]} : vector<64x128xf32> to vector<8x128xf32>
    %181 = arith.truncf %178 : vector<8x32xf32> to vector<8x32xbf16>
    %cst_45 = arith.constant dense<0.000000e+00> : vector<8x128xf32>
    %182 = tpu.matmul %181, %177, %cst_45 {dimension_numbers = #tpu.dot_dimension_numbers<[1], [0], [0], [1], [0, 0, 1, 1], [], []>} : vector<8x32xbf16>, vector<32x128xbf16>, vector<8x128xf32> -> vector<8x128xf32>
    %183 = arith.addf %180, %182 : vector<8x128xf32>
    %184 = arith.mulf %183, %8 : vector<8x128xf32>
    %185 = math.tanh %184 : vector<8x128xf32>
    %186 = arith.mulf %185, %8 : vector<8x128xf32>
    %187 = arith.addf %186, %11 : vector<8x128xf32>
    %188 = vector.extract_strided_slice %187 {offsets = [0, 0], sizes = [8, 32], strides = [1, 1]} : vector<8x128xf32> to vector<8x32xf32>
    %189 = vector.extract_strided_slice %187 {offsets = [0, 32], sizes = [8, 32], strides = [1, 1]} : vector<8x128xf32> to vector<8x32xf32>
    %190 = vector.extract_strided_slice %187 {offsets = [0, 64], sizes = [8, 32], strides = [1, 1]} : vector<8x128xf32> to vector<8x32xf32>
    %191 = vector.extract_strided_slice %187 {offsets = [0, 96], sizes = [8, 32], strides = [1, 1]} : vector<8x128xf32> to vector<8x32xf32>
    %192 = arith.mulf %189, %179 : vector<8x32xf32>
    %193 = arith.mulf %188, %190 : vector<8x32xf32>
    %194 = arith.addf %192, %193 : vector<8x32xf32>
    %195 = math.tanh %194 : vector<8x32xf32>
    %196 = arith.mulf %191, %195 : vector<8x32xf32>
    %c0_46 = arith.constant 0 : index
    %c0_47 = arith.constant 0 : index
    %197 = vector.load %arg8[%c0_46, %c0_47] : memref<64x32xf32, #tpu.memory_space<vmem>>, vector<8x32xf32>
    tpu.vector_store %arg8[%c0_46, %c0_47], %196 {strides = array<i32>} : memref<64x32xf32, #tpu.memory_space<vmem>>, vector<8x32xf32>,
    %198 = vector.extract_strided_slice %175 {offsets = [8, 0], sizes = [8, 128], strides = [1, 1]} : vector<64x128xf32> to vector<8x128xf32>
    %199 = arith.truncf %196 : vector<8x32xf32> to vector<8x32xbf16>
    %cst_48 = arith.constant dense<0.000000e+00> : vector<8x128xf32>
    %200 = tpu.matmul %199, %177, %cst_48 {dimension_numbers = #tpu.dot_dimension_numbers<[1], [0], [0], [1], [0, 0, 1, 1], [], []>} : vector<8x32xbf16>, vector<32x128xbf16>, vector<8x128xf32> -> vector<8x128xf32>
    %201 = arith.addf %198, %200 : vector<8x128xf32>
    %202 = arith.mulf %201, %8 : vector<8x128xf32>
    %203 = math.tanh %202 : vector<8x128xf32>
    %204 = arith.mulf %203, %8 : vector<8x128xf32>
    %205 = arith.addf %204, %11 : vector<8x128xf32>
    %206 = vector.extract_strided_slice %205 {offsets = [0, 0], sizes = [8, 32], strides = [1, 1]} : vector<8x128xf32> to vector<8x32xf32>
    %207 = vector.extract_strided_slice %205 {offsets = [0, 32], sizes = [8, 32], strides = [1, 1]} : vector<8x128xf32> to vector<8x32xf32>
    %208 = vector.extract_strided_slice %205 {offsets = [0, 64], sizes = [8, 32], strides = [1, 1]} : vector<8x128xf32> to vector<8x32xf32>
    %209 = vector.extract_strided_slice %205 {offsets = [0, 96], sizes = [8, 32], strides = [1, 1]} : vector<8x128xf32> to vector<8x32xf32>
    %210 = arith.mulf %207, %194 : vector<8x32xf32>
    %211 = arith.mulf %206, %208 : vector<8x32xf32>
    %212 = arith.addf %210, %211 : vector<8x32xf32>
    %213 = math.tanh %212 : vector<8x32xf32>
    %214 = arith.mulf %209, %213 : vector<8x32xf32>
    %c8_49 = arith.constant 8 : index
    %c0_50 = arith.constant 0 : index
    %215 = vector.load %arg8[%c8_49, %c0_50] : memref<64x32xf32, #tpu.memory_space<vmem>>, vector<8x32xf32>
    tpu.vector_store %arg8[%c8_49, %c0_50], %214 {strides = array<i32>} : memref<64x32xf32, #tpu.memory_space<vmem>>, vector<8x32xf32>,
    %216 = vector.extract_strided_slice %175 {offsets = [16, 0], sizes = [8, 128], strides = [1, 1]} : vector<64x128xf32> to vector<8x128xf32>
    %217 = arith.truncf %214 : vector<8x32xf32> to vector<8x32xbf16>
    %cst_51 = arith.constant dense<0.000000e+00> : vector<8x128xf32>
    %218 = tpu.matmul %217, %177, %cst_51 {dimension_numbers = #tpu.dot_dimension_numbers<[1], [0], [0], [1], [0, 0, 1, 1], [], []>} : vector<8x32xbf16>, vector<32x128xbf16>, vector<8x128xf32> -> vector<8x128xf32>
    %219 = arith.addf %216, %218 : vector<8x128xf32>
    %220 = arith.mulf %219, %8 : vector<8x128xf32>
    %221 = math.tanh %220 : vector<8x128xf32>
    %222 = arith.mulf %221, %8 : vector<8x128xf32>
    %223 = arith.addf %222, %11 : vector<8x128xf32>
    %224 = vector.extract_strided_slice %223 {offsets = [0, 0], sizes = [8, 32], strides = [1, 1]} : vector<8x128xf32> to vector<8x32xf32>
    %225 = vector.extract_strided_slice %223 {offsets = [0, 32], sizes = [8, 32], strides = [1, 1]} : vector<8x128xf32> to vector<8x32xf32>
    %226 = vector.extract_strided_slice %223 {offsets = [0, 64], sizes = [8, 32], strides = [1, 1]} : vector<8x128xf32> to vector<8x32xf32>
    %227 = vector.extract_strided_slice %223 {offsets = [0, 96], sizes = [8, 32], strides = [1, 1]} : vector<8x128xf32> to vector<8x32xf32>
    %228 = arith.mulf %225, %212 : vector<8x32xf32>
    %229 = arith.mulf %224, %226 : vector<8x32xf32>
    %230 = arith.addf %228, %229 : vector<8x32xf32>
    %231 = math.tanh %230 : vector<8x32xf32>
    %232 = arith.mulf %227, %231 : vector<8x32xf32>
    %c16_52 = arith.constant 16 : index
    %c0_53 = arith.constant 0 : index
    %233 = vector.load %arg8[%c16_52, %c0_53] : memref<64x32xf32, #tpu.memory_space<vmem>>, vector<8x32xf32>
    tpu.vector_store %arg8[%c16_52, %c0_53], %232 {strides = array<i32>} : memref<64x32xf32, #tpu.memory_space<vmem>>, vector<8x32xf32>,
    %234 = vector.extract_strided_slice %175 {offsets = [24, 0], sizes = [8, 128], strides = [1, 1]} : vector<64x128xf32> to vector<8x128xf32>
    %235 = arith.truncf %232 : vector<8x32xf32> to vector<8x32xbf16>
    %cst_54 = arith.constant dense<0.000000e+00> : vector<8x128xf32>
    %236 = tpu.matmul %235, %177, %cst_54 {dimension_numbers = #tpu.dot_dimension_numbers<[1], [0], [0], [1], [0, 0, 1, 1], [], []>} : vector<8x32xbf16>, vector<32x128xbf16>, vector<8x128xf32> -> vector<8x128xf32>
    %237 = arith.addf %234, %236 : vector<8x128xf32>
    %238 = arith.mulf %237, %8 : vector<8x128xf32>
    %239 = math.tanh %238 : vector<8x128xf32>
    %240 = arith.mulf %239, %8 : vector<8x128xf32>
    %241 = arith.addf %240, %11 : vector<8x128xf32>
    %242 = vector.extract_strided_slice %241 {offsets = [0, 0], sizes = [8, 32], strides = [1, 1]} : vector<8x128xf32> to vector<8x32xf32>
    %243 = vector.extract_strided_slice %241 {offsets = [0, 32], sizes = [8, 32], strides = [1, 1]} : vector<8x128xf32> to vector<8x32xf32>
    %244 = vector.extract_strided_slice %241 {offsets = [0, 64], sizes = [8, 32], strides = [1, 1]} : vector<8x128xf32> to vector<8x32xf32>
    %245 = vector.extract_strided_slice %241 {offsets = [0, 96], sizes = [8, 32], strides = [1, 1]} : vector<8x128xf32> to vector<8x32xf32>
    %246 = arith.mulf %243, %230 : vector<8x32xf32>
    %247 = arith.mulf %242, %244 : vector<8x32xf32>
    %248 = arith.addf %246, %247 : vector<8x32xf32>
    %249 = math.tanh %248 : vector<8x32xf32>
    %250 = arith.mulf %245, %249 : vector<8x32xf32>
    %c24_55 = arith.constant 24 : index
    %c0_56 = arith.constant 0 : index
    %251 = vector.load %arg8[%c24_55, %c0_56] : memref<64x32xf32, #tpu.memory_space<vmem>>, vector<8x32xf32>
    tpu.vector_store %arg8[%c24_55, %c0_56], %250 {strides = array<i32>} : memref<64x32xf32, #tpu.memory_space<vmem>>, vector<8x32xf32>,
    %252 = vector.extract_strided_slice %175 {offsets = [32, 0], sizes = [8, 128], strides = [1, 1]} : vector<64x128xf32> to vector<8x128xf32>
    %253 = arith.truncf %250 : vector<8x32xf32> to vector<8x32xbf16>
    %cst_57 = arith.constant dense<0.000000e+00> : vector<8x128xf32>
    %254 = tpu.matmul %253, %177, %cst_57 {dimension_numbers = #tpu.dot_dimension_numbers<[1], [0], [0], [1], [0, 0, 1, 1], [], []>} : vector<8x32xbf16>, vector<32x128xbf16>, vector<8x128xf32> -> vector<8x128xf32>
    %255 = arith.addf %252, %254 : vector<8x128xf32>
    %256 = arith.mulf %255, %8 : vector<8x128xf32>
    %257 = math.tanh %256 : vector<8x128xf32>
    %258 = arith.mulf %257, %8 : vector<8x128xf32>
    %259 = arith.addf %258, %11 : vector<8x128xf32>
    %260 = vector.extract_strided_slice %259 {offsets = [0, 0], sizes = [8, 32], strides = [1, 1]} : vector<8x128xf32> to vector<8x32xf32>
    %261 = vector.extract_strided_slice %259 {offsets = [0, 32], sizes = [8, 32], strides = [1, 1]} : vector<8x128xf32> to vector<8x32xf32>
    %262 = vector.extract_strided_slice %259 {offsets = [0, 64], sizes = [8, 32], strides = [1, 1]} : vector<8x128xf32> to vector<8x32xf32>
    %263 = vector.extract_strided_slice %259 {offsets = [0, 96], sizes = [8, 32], strides = [1, 1]} : vector<8x128xf32> to vector<8x32xf32>
    %264 = arith.mulf %261, %248 : vector<8x32xf32>
    %265 = arith.mulf %260, %262 : vector<8x32xf32>
    %266 = arith.addf %264, %265 : vector<8x32xf32>
    %267 = math.tanh %266 : vector<8x32xf32>
    %268 = arith.mulf %263, %267 : vector<8x32xf32>
    %c32_58 = arith.constant 32 : index
    %c0_59 = arith.constant 0 : index
    %269 = vector.load %arg8[%c32_58, %c0_59] : memref<64x32xf32, #tpu.memory_space<vmem>>, vector<8x32xf32>
    tpu.vector_store %arg8[%c32_58, %c0_59], %268 {strides = array<i32>} : memref<64x32xf32, #tpu.memory_space<vmem>>, vector<8x32xf32>,
    %270 = vector.extract_strided_slice %175 {offsets = [40, 0], sizes = [8, 128], strides = [1, 1]} : vector<64x128xf32> to vector<8x128xf32>
    %271 = arith.truncf %268 : vector<8x32xf32> to vector<8x32xbf16>
    %cst_60 = arith.constant dense<0.000000e+00> : vector<8x128xf32>
    %272 = tpu.matmul %271, %177, %cst_60 {dimension_numbers = #tpu.dot_dimension_numbers<[1], [0], [0], [1], [0, 0, 1, 1], [], []>} : vector<8x32xbf16>, vector<32x128xbf16>, vector<8x128xf32> -> vector<8x128xf32>
    %273 = arith.addf %270, %272 : vector<8x128xf32>
    %274 = arith.mulf %273, %8 : vector<8x128xf32>
    %275 = math.tanh %274 : vector<8x128xf32>
    %276 = arith.mulf %275, %8 : vector<8x128xf32>
    %277 = arith.addf %276, %11 : vector<8x128xf32>
    %278 = vector.extract_strided_slice %277 {offsets = [0, 0], sizes = [8, 32], strides = [1, 1]} : vector<8x128xf32> to vector<8x32xf32>
    %279 = vector.extract_strided_slice %277 {offsets = [0, 32], sizes = [8, 32], strides = [1, 1]} : vector<8x128xf32> to vector<8x32xf32>
    %280 = vector.extract_strided_slice %277 {offsets = [0, 64], sizes = [8, 32], strides = [1, 1]} : vector<8x128xf32> to vector<8x32xf32>
    %281 = vector.extract_strided_slice %277 {offsets = [0, 96], sizes = [8, 32], strides = [1, 1]} : vector<8x128xf32> to vector<8x32xf32>
    %282 = arith.mulf %279, %266 : vector<8x32xf32>
    %283 = arith.mulf %278, %280 : vector<8x32xf32>
    %284 = arith.addf %282, %283 : vector<8x32xf32>
    %285 = math.tanh %284 : vector<8x32xf32>
    %286 = arith.mulf %281, %285 : vector<8x32xf32>
    %c40_61 = arith.constant 40 : index
    %c0_62 = arith.constant 0 : index
    %287 = vector.load %arg8[%c40_61, %c0_62] : memref<64x32xf32, #tpu.memory_space<vmem>>, vector<8x32xf32>
    tpu.vector_store %arg8[%c40_61, %c0_62], %286 {strides = array<i32>} : memref<64x32xf32, #tpu.memory_space<vmem>>, vector<8x32xf32>,
    %288 = vector.extract_strided_slice %175 {offsets = [48, 0], sizes = [8, 128], strides = [1, 1]} : vector<64x128xf32> to vector<8x128xf32>
    %289 = arith.truncf %286 : vector<8x32xf32> to vector<8x32xbf16>
    %cst_63 = arith.constant dense<0.000000e+00> : vector<8x128xf32>
    %290 = tpu.matmul %289, %177, %cst_63 {dimension_numbers = #tpu.dot_dimension_numbers<[1], [0], [0], [1], [0, 0, 1, 1], [], []>} : vector<8x32xbf16>, vector<32x128xbf16>, vector<8x128xf32> -> vector<8x128xf32>
    %291 = arith.addf %288, %290 : vector<8x128xf32>
    %292 = arith.mulf %291, %8 : vector<8x128xf32>
    %293 = math.tanh %292 : vector<8x128xf32>
    %294 = arith.mulf %293, %8 : vector<8x128xf32>
    %295 = arith.addf %294, %11 : vector<8x128xf32>
    %296 = vector.extract_strided_slice %295 {offsets = [0, 0], sizes = [8, 32], strides = [1, 1]} : vector<8x128xf32> to vector<8x32xf32>
    %297 = vector.extract_strided_slice %295 {offsets = [0, 32], sizes = [8, 32], strides = [1, 1]} : vector<8x128xf32> to vector<8x32xf32>
    %298 = vector.extract_strided_slice %295 {offsets = [0, 64], sizes = [8, 32], strides = [1, 1]} : vector<8x128xf32> to vector<8x32xf32>
    %299 = vector.extract_strided_slice %295 {offsets = [0, 96], sizes = [8, 32], strides = [1, 1]} : vector<8x128xf32> to vector<8x32xf32>
    %300 = arith.mulf %297, %284 : vector<8x32xf32>
    %301 = arith.mulf %296, %298 : vector<8x32xf32>
    %302 = arith.addf %300, %301 : vector<8x32xf32>
    %303 = math.tanh %302 : vector<8x32xf32>
    %304 = arith.mulf %299, %303 : vector<8x32xf32>
    %c48_64 = arith.constant 48 : index
    %c0_65 = arith.constant 0 : index
    %305 = vector.load %arg8[%c48_64, %c0_65] : memref<64x32xf32, #tpu.memory_space<vmem>>, vector<8x32xf32>
    tpu.vector_store %arg8[%c48_64, %c0_65], %304 {strides = array<i32>} : memref<64x32xf32, #tpu.memory_space<vmem>>, vector<8x32xf32>,
    %306 = vector.extract_strided_slice %175 {offsets = [56, 0], sizes = [8, 128], strides = [1, 1]} : vector<64x128xf32> to vector<8x128xf32>
    %307 = arith.truncf %304 : vector<8x32xf32> to vector<8x32xbf16>
    %cst_66 = arith.constant dense<0.000000e+00> : vector<8x128xf32>
    %308 = tpu.matmul %307, %177, %cst_66 {dimension_numbers = #tpu.dot_dimension_numbers<[1], [0], [0], [1], [0, 0, 1, 1], [], []>} : vector<8x32xbf16>, vector<32x128xbf16>, vector<8x128xf32> -> vector<8x128xf32>
    %309 = arith.addf %306, %308 : vector<8x128xf32>
    %310 = arith.mulf %309, %8 : vector<8x128xf32>
    %311 = math.tanh %310 : vector<8x128xf32>
    %312 = arith.mulf %311, %8 : vector<8x128xf32>
    %313 = arith.addf %312, %11 : vector<8x128xf32>
    %314 = vector.extract_strided_slice %313 {offsets = [0, 0], sizes = [8, 32], strides = [1, 1]} : vector<8x128xf32> to vector<8x32xf32>
    %315 = vector.extract_strided_slice %313 {offsets = [0, 32], sizes = [8, 32], strides = [1, 1]} : vector<8x128xf32> to vector<8x32xf32>
    %316 = vector.extract_strided_slice %313 {offsets = [0, 64], sizes = [8, 32], strides = [1, 1]} : vector<8x128xf32> to vector<8x32xf32>
    %317 = vector.extract_strided_slice %313 {offsets = [0, 96], sizes = [8, 32], strides = [1, 1]} : vector<8x128xf32> to vector<8x32xf32>
    %318 = arith.mulf %315, %302 : vector<8x32xf32>
    %319 = arith.mulf %314, %316 : vector<8x32xf32>
    %320 = arith.addf %318, %319 : vector<8x32xf32>
    %321 = math.tanh %320 : vector<8x32xf32>
    %322 = arith.mulf %317, %321 : vector<8x32xf32>
    %c56_67 = arith.constant 56 : index
    %c0_68 = arith.constant 0 : index
    %323 = vector.load %arg8[%c56_67, %c0_68] : memref<64x32xf32, #tpu.memory_space<vmem>>, vector<8x32xf32>
    tpu.vector_store %arg8[%c56_67, %c0_68], %322 {strides = array<i32>} : memref<64x32xf32, #tpu.memory_space<vmem>>, vector<8x32xf32>,
    %c0_69 = arith.constant 0 : index
    %c0_70 = arith.constant 0 : index
    %324 = vector.load %arg8[%c0_69, %c0_70] : memref<64x32xf32, #tpu.memory_space<vmem>>, vector<64x32xf32>
    %325 = arith.truncf %324 : vector<64x32xf32> to vector<64x32xbf16>
    %c1_71 = arith.constant 1 : index
    %c0_72 = arith.constant 0 : index
    %c0_73 = arith.constant 0 : index
    %326 = vector.load %arg2[%c1_71, %c0_72, %c0_73] : memref<4x32x128xbf16, #tpu.memory_space<vmem>>, vector<1x32x128xbf16>
    %327 = vector.shape_cast %326 : vector<1x32x128xbf16> to vector<32x128xbf16>
    %cst_74 = arith.constant dense<0.000000e+00> : vector<64x128xf32>
    %328 = tpu.matmul %325, %327, %cst_74 {dimension_numbers = #tpu.dot_dimension_numbers<[1], [0], [0], [1], [0, 0, 1, 1], [], []>} : vector<64x32xbf16>, vector<32x128xbf16>, vector<64x128xf32> -> vector<64x128xf32>
    %c2 = arith.constant 2 : index
    %c0_75 = arith.constant 0 : index
    %c0_76 = arith.constant 0 : index
    %329 = vector.load %arg4[%c2, %c0_75, %c0_76] : memref<5x1x128xf32, #tpu.memory_space<vmem>>, vector<1x1x128xf32>
    %330 = vector.shape_cast %329 : vector<1x1x128xf32> to vector<1x128xf32>
    %331 = vector.broadcast %330 : vector<1x128xf32> to vector<64x128xf32>
    %332 = arith.addf %328, %331 : vector<64x128xf32>
    %c2_77 = arith.constant 2 : index
    %c0_78 = arith.constant 0 : index
    %c0_79 = arith.constant 0 : index
    %333 = vector.load %arg3[%c2_77, %c0_78, %c0_79] : memref<5x32x128xbf16, #tpu.memory_space<vmem>>, vector<1x32x128xbf16>
    %334 = vector.shape_cast %333 : vector<1x32x128xbf16> to vector<32x128xbf16>
    %cst_80 = arith.constant 0.000000e+00 : f32
    %335 = vector.broadcast %cst_80 : f32 to vector<8x32xf32>
    %cst_81 = arith.constant 0.000000e+00 : f32
    %336 = vector.broadcast %cst_81 : f32 to vector<8x32xf32>
    %337 = vector.extract_strided_slice %332 {offsets = [0, 0], sizes = [8, 128], strides = [1, 1]} : vector<64x128xf32> to vector<8x128xf32>
    %338 = arith.truncf %335 : vector<8x32xf32> to vector<8x32xbf16>
    %cst_82 = arith.constant dense<0.000000e+00> : vector<8x128xf32>
    %339 = tpu.matmul %338, %334, %cst_82 {dimension_numbers = #tpu.dot_dimension_numbers<[1], [0], [0], [1], [0, 0, 1, 1], [], []>} : vector<8x32xbf16>, vector<32x128xbf16>, vector<8x128xf32> -> vector<8x128xf32>
    %340 = arith.addf %337, %339 : vector<8x128xf32>
    %341 = arith.mulf %340, %8 : vector<8x128xf32>
    %342 = math.tanh %341 : vector<8x128xf32>
    %343 = arith.mulf %342, %8 : vector<8x128xf32>
    %344 = arith.addf %343, %11 : vector<8x128xf32>
    %345 = vector.extract_strided_slice %344 {offsets = [0, 0], sizes = [8, 32], strides = [1, 1]} : vector<8x128xf32> to vector<8x32xf32>
    %346 = vector.extract_strided_slice %344 {offsets = [0, 32], sizes = [8, 32], strides = [1, 1]} : vector<8x128xf32> to vector<8x32xf32>
    %347 = vector.extract_strided_slice %344 {offsets = [0, 64], sizes = [8, 32], strides = [1, 1]} : vector<8x128xf32> to vector<8x32xf32>
    %348 = vector.extract_strided_slice %344 {offsets = [0, 96], sizes = [8, 32], strides = [1, 1]} : vector<8x128xf32> to vector<8x32xf32>
    %349 = arith.mulf %346, %336 : vector<8x32xf32>
    %350 = arith.mulf %345, %347 : vector<8x32xf32>
    %351 = arith.addf %349, %350 : vector<8x32xf32>
    %352 = math.tanh %351 : vector<8x32xf32>
    %353 = arith.mulf %348, %352 : vector<8x32xf32>
    %c0_83 = arith.constant 0 : index
    %c0_84 = arith.constant 0 : index
    %354 = vector.load %arg8[%c0_83, %c0_84] : memref<64x32xf32, #tpu.memory_space<vmem>>, vector<8x32xf32>
    tpu.vector_store %arg8[%c0_83, %c0_84], %353 {strides = array<i32>} : memref<64x32xf32, #tpu.memory_space<vmem>>, vector<8x32xf32>,
    %355 = vector.extract_strided_slice %332 {offsets = [8, 0], sizes = [8, 128], strides = [1, 1]} : vector<64x128xf32> to vector<8x128xf32>
    %356 = arith.truncf %353 : vector<8x32xf32> to vector<8x32xbf16>
    %cst_85 = arith.constant dense<0.000000e+00> : vector<8x128xf32>
    %357 = tpu.matmul %356, %334, %cst_85 {dimension_numbers = #tpu.dot_dimension_numbers<[1], [0], [0], [1], [0, 0, 1, 1], [], []>} : vector<8x32xbf16>, vector<32x128xbf16>, vector<8x128xf32> -> vector<8x128xf32>
    %358 = arith.addf %355, %357 : vector<8x128xf32>
    %359 = arith.mulf %358, %8 : vector<8x128xf32>
    %360 = math.tanh %359 : vector<8x128xf32>
    %361 = arith.mulf %360, %8 : vector<8x128xf32>
    %362 = arith.addf %361, %11 : vector<8x128xf32>
    %363 = vector.extract_strided_slice %362 {offsets = [0, 0], sizes = [8, 32], strides = [1, 1]} : vector<8x128xf32> to vector<8x32xf32>
    %364 = vector.extract_strided_slice %362 {offsets = [0, 32], sizes = [8, 32], strides = [1, 1]} : vector<8x128xf32> to vector<8x32xf32>
    %365 = vector.extract_strided_slice %362 {offsets = [0, 64], sizes = [8, 32], strides = [1, 1]} : vector<8x128xf32> to vector<8x32xf32>
    %366 = vector.extract_strided_slice %362 {offsets = [0, 96], sizes = [8, 32], strides = [1, 1]} : vector<8x128xf32> to vector<8x32xf32>
    %367 = arith.mulf %364, %351 : vector<8x32xf32>
    %368 = arith.mulf %363, %365 : vector<8x32xf32>
    %369 = arith.addf %367, %368 : vector<8x32xf32>
    %370 = math.tanh %369 : vector<8x32xf32>
    %371 = arith.mulf %366, %370 : vector<8x32xf32>
    %c8_86 = arith.constant 8 : index
    %c0_87 = arith.constant 0 : index
    %372 = vector.load %arg8[%c8_86, %c0_87] : memref<64x32xf32, #tpu.memory_space<vmem>>, vector<8x32xf32>
    tpu.vector_store %arg8[%c8_86, %c0_87], %371 {strides = array<i32>} : memref<64x32xf32, #tpu.memory_space<vmem>>, vector<8x32xf32>,
    %373 = vector.extract_strided_slice %332 {offsets = [16, 0], sizes = [8, 128], strides = [1, 1]} : vector<64x128xf32> to vector<8x128xf32>
    %374 = arith.truncf %371 : vector<8x32xf32> to vector<8x32xbf16>
    %cst_88 = arith.constant dense<0.000000e+00> : vector<8x128xf32>
    %375 = tpu.matmul %374, %334, %cst_88 {dimension_numbers = #tpu.dot_dimension_numbers<[1], [0], [0], [1], [0, 0, 1, 1], [], []>} : vector<8x32xbf16>, vector<32x128xbf16>, vector<8x128xf32> -> vector<8x128xf32>
    %376 = arith.addf %373, %375 : vector<8x128xf32>
    %377 = arith.mulf %376, %8 : vector<8x128xf32>
    %378 = math.tanh %377 : vector<8x128xf32>
    %379 = arith.mulf %378, %8 : vector<8x128xf32>
    %380 = arith.addf %379, %11 : vector<8x128xf32>
    %381 = vector.extract_strided_slice %380 {offsets = [0, 0], sizes = [8, 32], strides = [1, 1]} : vector<8x128xf32> to vector<8x32xf32>
    %382 = vector.extract_strided_slice %380 {offsets = [0, 32], sizes = [8, 32], strides = [1, 1]} : vector<8x128xf32> to vector<8x32xf32>
    %383 = vector.extract_strided_slice %380 {offsets = [0, 64], sizes = [8, 32], strides = [1, 1]} : vector<8x128xf32> to vector<8x32xf32>
    %384 = vector.extract_strided_slice %380 {offsets = [0, 96], sizes = [8, 32], strides = [1, 1]} : vector<8x128xf32> to vector<8x32xf32>
    %385 = arith.mulf %382, %369 : vector<8x32xf32>
    %386 = arith.mulf %381, %383 : vector<8x32xf32>
    %387 = arith.addf %385, %386 : vector<8x32xf32>
    %388 = math.tanh %387 : vector<8x32xf32>
    %389 = arith.mulf %384, %388 : vector<8x32xf32>
    %c16_89 = arith.constant 16 : index
    %c0_90 = arith.constant 0 : index
    %390 = vector.load %arg8[%c16_89, %c0_90] : memref<64x32xf32, #tpu.memory_space<vmem>>, vector<8x32xf32>
    tpu.vector_store %arg8[%c16_89, %c0_90], %389 {strides = array<i32>} : memref<64x32xf32, #tpu.memory_space<vmem>>, vector<8x32xf32>,
    %391 = vector.extract_strided_slice %332 {offsets = [24, 0], sizes = [8, 128], strides = [1, 1]} : vector<64x128xf32> to vector<8x128xf32>
    %392 = arith.truncf %389 : vector<8x32xf32> to vector<8x32xbf16>
    %cst_91 = arith.constant dense<0.000000e+00> : vector<8x128xf32>
    %393 = tpu.matmul %392, %334, %cst_91 {dimension_numbers = #tpu.dot_dimension_numbers<[1], [0], [0], [1], [0, 0, 1, 1], [], []>} : vector<8x32xbf16>, vector<32x128xbf16>, vector<8x128xf32> -> vector<8x128xf32>
    %394 = arith.addf %391, %393 : vector<8x128xf32>
    %395 = arith.mulf %394, %8 : vector<8x128xf32>
    %396 = math.tanh %395 : vector<8x128xf32>
    %397 = arith.mulf %396, %8 : vector<8x128xf32>
    %398 = arith.addf %397, %11 : vector<8x128xf32>
    %399 = vector.extract_strided_slice %398 {offsets = [0, 0], sizes = [8, 32], strides = [1, 1]} : vector<8x128xf32> to vector<8x32xf32>
    %400 = vector.extract_strided_slice %398 {offsets = [0, 32], sizes = [8, 32], strides = [1, 1]} : vector<8x128xf32> to vector<8x32xf32>
    %401 = vector.extract_strided_slice %398 {offsets = [0, 64], sizes = [8, 32], strides = [1, 1]} : vector<8x128xf32> to vector<8x32xf32>
    %402 = vector.extract_strided_slice %398 {offsets = [0, 96], sizes = [8, 32], strides = [1, 1]} : vector<8x128xf32> to vector<8x32xf32>
    %403 = arith.mulf %400, %387 : vector<8x32xf32>
    %404 = arith.mulf %399, %401 : vector<8x32xf32>
    %405 = arith.addf %403, %404 : vector<8x32xf32>
    %406 = math.tanh %405 : vector<8x32xf32>
    %407 = arith.mulf %402, %406 : vector<8x32xf32>
    %c24_92 = arith.constant 24 : index
    %c0_93 = arith.constant 0 : index
    %408 = vector.load %arg8[%c24_92, %c0_93] : memref<64x32xf32, #tpu.memory_space<vmem>>, vector<8x32xf32>
    tpu.vector_store %arg8[%c24_92, %c0_93], %407 {strides = array<i32>} : memref<64x32xf32, #tpu.memory_space<vmem>>, vector<8x32xf32>,
    %409 = vector.extract_strided_slice %332 {offsets = [32, 0], sizes = [8, 128], strides = [1, 1]} : vector<64x128xf32> to vector<8x128xf32>
    %410 = arith.truncf %407 : vector<8x32xf32> to vector<8x32xbf16>
    %cst_94 = arith.constant dense<0.000000e+00> : vector<8x128xf32>
    %411 = tpu.matmul %410, %334, %cst_94 {dimension_numbers = #tpu.dot_dimension_numbers<[1], [0], [0], [1], [0, 0, 1, 1], [], []>} : vector<8x32xbf16>, vector<32x128xbf16>, vector<8x128xf32> -> vector<8x128xf32>
    %412 = arith.addf %409, %411 : vector<8x128xf32>
    %413 = arith.mulf %412, %8 : vector<8x128xf32>
    %414 = math.tanh %413 : vector<8x128xf32>
    %415 = arith.mulf %414, %8 : vector<8x128xf32>
    %416 = arith.addf %415, %11 : vector<8x128xf32>
    %417 = vector.extract_strided_slice %416 {offsets = [0, 0], sizes = [8, 32], strides = [1, 1]} : vector<8x128xf32> to vector<8x32xf32>
    %418 = vector.extract_strided_slice %416 {offsets = [0, 32], sizes = [8, 32], strides = [1, 1]} : vector<8x128xf32> to vector<8x32xf32>
    %419 = vector.extract_strided_slice %416 {offsets = [0, 64], sizes = [8, 32], strides = [1, 1]} : vector<8x128xf32> to vector<8x32xf32>
    %420 = vector.extract_strided_slice %416 {offsets = [0, 96], sizes = [8, 32], strides = [1, 1]} : vector<8x128xf32> to vector<8x32xf32>
    %421 = arith.mulf %418, %405 : vector<8x32xf32>
    %422 = arith.mulf %417, %419 : vector<8x32xf32>
    %423 = arith.addf %421, %422 : vector<8x32xf32>
    %424 = math.tanh %423 : vector<8x32xf32>
    %425 = arith.mulf %420, %424 : vector<8x32xf32>
    %c32_95 = arith.constant 32 : index
    %c0_96 = arith.constant 0 : index
    %426 = vector.load %arg8[%c32_95, %c0_96] : memref<64x32xf32, #tpu.memory_space<vmem>>, vector<8x32xf32>
    tpu.vector_store %arg8[%c32_95, %c0_96], %425 {strides = array<i32>} : memref<64x32xf32, #tpu.memory_space<vmem>>, vector<8x32xf32>,
    %427 = vector.extract_strided_slice %332 {offsets = [40, 0], sizes = [8, 128], strides = [1, 1]} : vector<64x128xf32> to vector<8x128xf32>
    %428 = arith.truncf %425 : vector<8x32xf32> to vector<8x32xbf16>
    %cst_97 = arith.constant dense<0.000000e+00> : vector<8x128xf32>
    %429 = tpu.matmul %428, %334, %cst_97 {dimension_numbers = #tpu.dot_dimension_numbers<[1], [0], [0], [1], [0, 0, 1, 1], [], []>} : vector<8x32xbf16>, vector<32x128xbf16>, vector<8x128xf32> -> vector<8x128xf32>
    %430 = arith.addf %427, %429 : vector<8x128xf32>
    %431 = arith.mulf %430, %8 : vector<8x128xf32>
    %432 = math.tanh %431 : vector<8x128xf32>
    %433 = arith.mulf %432, %8 : vector<8x128xf32>
    %434 = arith.addf %433, %11 : vector<8x128xf32>
    %435 = vector.extract_strided_slice %434 {offsets = [0, 0], sizes = [8, 32], strides = [1, 1]} : vector<8x128xf32> to vector<8x32xf32>
    %436 = vector.extract_strided_slice %434 {offsets = [0, 32], sizes = [8, 32], strides = [1, 1]} : vector<8x128xf32> to vector<8x32xf32>
    %437 = vector.extract_strided_slice %434 {offsets = [0, 64], sizes = [8, 32], strides = [1, 1]} : vector<8x128xf32> to vector<8x32xf32>
    %438 = vector.extract_strided_slice %434 {offsets = [0, 96], sizes = [8, 32], strides = [1, 1]} : vector<8x128xf32> to vector<8x32xf32>
    %439 = arith.mulf %436, %423 : vector<8x32xf32>
    %440 = arith.mulf %435, %437 : vector<8x32xf32>
    %441 = arith.addf %439, %440 : vector<8x32xf32>
    %442 = math.tanh %441 : vector<8x32xf32>
    %443 = arith.mulf %438, %442 : vector<8x32xf32>
    %c40_98 = arith.constant 40 : index
    %c0_99 = arith.constant 0 : index
    %444 = vector.load %arg8[%c40_98, %c0_99] : memref<64x32xf32, #tpu.memory_space<vmem>>, vector<8x32xf32>
    tpu.vector_store %arg8[%c40_98, %c0_99], %443 {strides = array<i32>} : memref<64x32xf32, #tpu.memory_space<vmem>>, vector<8x32xf32>,
    %445 = vector.extract_strided_slice %332 {offsets = [48, 0], sizes = [8, 128], strides = [1, 1]} : vector<64x128xf32> to vector<8x128xf32>
    %446 = arith.truncf %443 : vector<8x32xf32> to vector<8x32xbf16>
    %cst_100 = arith.constant dense<0.000000e+00> : vector<8x128xf32>
    %447 = tpu.matmul %446, %334, %cst_100 {dimension_numbers = #tpu.dot_dimension_numbers<[1], [0], [0], [1], [0, 0, 1, 1], [], []>} : vector<8x32xbf16>, vector<32x128xbf16>, vector<8x128xf32> -> vector<8x128xf32>
    %448 = arith.addf %445, %447 : vector<8x128xf32>
    %449 = arith.mulf %448, %8 : vector<8x128xf32>
    %450 = math.tanh %449 : vector<8x128xf32>
    %451 = arith.mulf %450, %8 : vector<8x128xf32>
    %452 = arith.addf %451, %11 : vector<8x128xf32>
    %453 = vector.extract_strided_slice %452 {offsets = [0, 0], sizes = [8, 32], strides = [1, 1]} : vector<8x128xf32> to vector<8x32xf32>
    %454 = vector.extract_strided_slice %452 {offsets = [0, 32], sizes = [8, 32], strides = [1, 1]} : vector<8x128xf32> to vector<8x32xf32>
    %455 = vector.extract_strided_slice %452 {offsets = [0, 64], sizes = [8, 32], strides = [1, 1]} : vector<8x128xf32> to vector<8x32xf32>
    %456 = vector.extract_strided_slice %452 {offsets = [0, 96], sizes = [8, 32], strides = [1, 1]} : vector<8x128xf32> to vector<8x32xf32>
    %457 = arith.mulf %454, %441 : vector<8x32xf32>
    %458 = arith.mulf %453, %455 : vector<8x32xf32>
    %459 = arith.addf %457, %458 : vector<8x32xf32>
    %460 = math.tanh %459 : vector<8x32xf32>
    %461 = arith.mulf %456, %460 : vector<8x32xf32>
    %c48_101 = arith.constant 48 : index
    %c0_102 = arith.constant 0 : index
    %462 = vector.load %arg8[%c48_101, %c0_102] : memref<64x32xf32, #tpu.memory_space<vmem>>, vector<8x32xf32>
    tpu.vector_store %arg8[%c48_101, %c0_102], %461 {strides = array<i32>} : memref<64x32xf32, #tpu.memory_space<vmem>>, vector<8x32xf32>,
    %463 = vector.extract_strided_slice %332 {offsets = [56, 0], sizes = [8, 128], strides = [1, 1]} : vector<64x128xf32> to vector<8x128xf32>
    %464 = arith.truncf %461 : vector<8x32xf32> to vector<8x32xbf16>
    %cst_103 = arith.constant dense<0.000000e+00> : vector<8x128xf32>
    %465 = tpu.matmul %464, %334, %cst_103 {dimension_numbers = #tpu.dot_dimension_numbers<[1], [0], [0], [1], [0, 0, 1, 1], [], []>} : vector<8x32xbf16>, vector<32x128xbf16>, vector<8x128xf32> -> vector<8x128xf32>
    %466 = arith.addf %463, %465 : vector<8x128xf32>
    %467 = arith.mulf %466, %8 : vector<8x128xf32>
    %468 = math.tanh %467 : vector<8x128xf32>
    %469 = arith.mulf %468, %8 : vector<8x128xf32>
    %470 = arith.addf %469, %11 : vector<8x128xf32>
    %471 = vector.extract_strided_slice %470 {offsets = [0, 0], sizes = [8, 32], strides = [1, 1]} : vector<8x128xf32> to vector<8x32xf32>
    %472 = vector.extract_strided_slice %470 {offsets = [0, 32], sizes = [8, 32], strides = [1, 1]} : vector<8x128xf32> to vector<8x32xf32>
    %473 = vector.extract_strided_slice %470 {offsets = [0, 64], sizes = [8, 32], strides = [1, 1]} : vector<8x128xf32> to vector<8x32xf32>
    %474 = vector.extract_strided_slice %470 {offsets = [0, 96], sizes = [8, 32], strides = [1, 1]} : vector<8x128xf32> to vector<8x32xf32>
    %475 = arith.mulf %472, %459 : vector<8x32xf32>
    %476 = arith.mulf %471, %473 : vector<8x32xf32>
    %477 = arith.addf %475, %476 : vector<8x32xf32>
    %478 = math.tanh %477 : vector<8x32xf32>
    %479 = arith.mulf %474, %478 : vector<8x32xf32>
    %c56_104 = arith.constant 56 : index
    %c0_105 = arith.constant 0 : index
    %480 = vector.load %arg8[%c56_104, %c0_105] : memref<64x32xf32, #tpu.memory_space<vmem>>, vector<8x32xf32>
    tpu.vector_store %arg8[%c56_104, %c0_105], %479 {strides = array<i32>} : memref<64x32xf32, #tpu.memory_space<vmem>>, vector<8x32xf32>,
    %c0_106 = arith.constant 0 : index
    %c0_107 = arith.constant 0 : index
    %481 = vector.load %arg8[%c0_106, %c0_107] : memref<64x32xf32, #tpu.memory_space<vmem>>, vector<64x32xf32>
    %482 = arith.truncf %481 : vector<64x32xf32> to vector<64x32xbf16>
    %c2_108 = arith.constant 2 : index
    %c0_109 = arith.constant 0 : index
    %c0_110 = arith.constant 0 : index
    %483 = vector.load %arg2[%c2_108, %c0_109, %c0_110] : memref<4x32x128xbf16, #tpu.memory_space<vmem>>, vector<1x32x128xbf16>
    %484 = vector.shape_cast %483 : vector<1x32x128xbf16> to vector<32x128xbf16>
    %cst_111 = arith.constant dense<0.000000e+00> : vector<64x128xf32>
    %485 = tpu.matmul %482, %484, %cst_111 {dimension_numbers = #tpu.dot_dimension_numbers<[1], [0], [0], [1], [0, 0, 1, 1], [], []>} : vector<64x32xbf16>, vector<32x128xbf16>, vector<64x128xf32> -> vector<64x128xf32>
    %c3 = arith.constant 3 : index
    %c0_112 = arith.constant 0 : index
    %c0_113 = arith.constant 0 : index
    %486 = vector.load %arg4[%c3, %c0_112, %c0_113] : memref<5x1x128xf32, #tpu.memory_space<vmem>>, vector<1x1x128xf32>
    %487 = vector.shape_cast %486 : vector<1x1x128xf32> to vector<1x128xf32>
    %488 = vector.broadcast %487 : vector<1x128xf32> to vector<64x128xf32>
    %489 = arith.addf %485, %488 : vector<64x128xf32>
    %c3_114 = arith.constant 3 : index
    %c0_115 = arith.constant 0 : index
    %c0_116 = arith.constant 0 : index
    %490 = vector.load %arg3[%c3_114, %c0_115, %c0_116] : memref<5x32x128xbf16, #tpu.memory_space<vmem>>, vector<1x32x128xbf16>
    %491 = vector.shape_cast %490 : vector<1x32x128xbf16> to vector<32x128xbf16>
    %cst_117 = arith.constant 0.000000e+00 : f32
    %492 = vector.broadcast %cst_117 : f32 to vector<8x32xf32>
    %cst_118 = arith.constant 0.000000e+00 : f32
    %493 = vector.broadcast %cst_118 : f32 to vector<8x32xf32>
    %494 = vector.extract_strided_slice %489 {offsets = [0, 0], sizes = [8, 128], strides = [1, 1]} : vector<64x128xf32> to vector<8x128xf32>
    %495 = arith.truncf %492 : vector<8x32xf32> to vector<8x32xbf16>
    %cst_119 = arith.constant dense<0.000000e+00> : vector<8x128xf32>
    %496 = tpu.matmul %495, %491, %cst_119 {dimension_numbers = #tpu.dot_dimension_numbers<[1], [0], [0], [1], [0, 0, 1, 1], [], []>} : vector<8x32xbf16>, vector<32x128xbf16>, vector<8x128xf32> -> vector<8x128xf32>
    %497 = arith.addf %494, %496 : vector<8x128xf32>
    %498 = arith.mulf %497, %8 : vector<8x128xf32>
    %499 = math.tanh %498 : vector<8x128xf32>
    %500 = arith.mulf %499, %8 : vector<8x128xf32>
    %501 = arith.addf %500, %11 : vector<8x128xf32>
    %502 = vector.extract_strided_slice %501 {offsets = [0, 0], sizes = [8, 32], strides = [1, 1]} : vector<8x128xf32> to vector<8x32xf32>
    %503 = vector.extract_strided_slice %501 {offsets = [0, 32], sizes = [8, 32], strides = [1, 1]} : vector<8x128xf32> to vector<8x32xf32>
    %504 = vector.extract_strided_slice %501 {offsets = [0, 64], sizes = [8, 32], strides = [1, 1]} : vector<8x128xf32> to vector<8x32xf32>
    %505 = vector.extract_strided_slice %501 {offsets = [0, 96], sizes = [8, 32], strides = [1, 1]} : vector<8x128xf32> to vector<8x32xf32>
    %506 = arith.mulf %503, %493 : vector<8x32xf32>
    %507 = arith.mulf %502, %504 : vector<8x32xf32>
    %508 = arith.addf %506, %507 : vector<8x32xf32>
    %509 = math.tanh %508 : vector<8x32xf32>
    %510 = arith.mulf %505, %509 : vector<8x32xf32>
    %c0_120 = arith.constant 0 : index
    %c0_121 = arith.constant 0 : index
    %511 = vector.load %arg8[%c0_120, %c0_121] : memref<64x32xf32, #tpu.memory_space<vmem>>, vector<8x32xf32>
    tpu.vector_store %arg8[%c0_120, %c0_121], %510 {strides = array<i32>} : memref<64x32xf32, #tpu.memory_space<vmem>>, vector<8x32xf32>,
    %512 = vector.extract_strided_slice %489 {offsets = [8, 0], sizes = [8, 128], strides = [1, 1]} : vector<64x128xf32> to vector<8x128xf32>
    %513 = arith.truncf %510 : vector<8x32xf32> to vector<8x32xbf16>
    %cst_122 = arith.constant dense<0.000000e+00> : vector<8x128xf32>
    %514 = tpu.matmul %513, %491, %cst_122 {dimension_numbers = #tpu.dot_dimension_numbers<[1], [0], [0], [1], [0, 0, 1, 1], [], []>} : vector<8x32xbf16>, vector<32x128xbf16>, vector<8x128xf32> -> vector<8x128xf32>
    %515 = arith.addf %512, %514 : vector<8x128xf32>
    %516 = arith.mulf %515, %8 : vector<8x128xf32>
    %517 = math.tanh %516 : vector<8x128xf32>
    %518 = arith.mulf %517, %8 : vector<8x128xf32>
    %519 = arith.addf %518, %11 : vector<8x128xf32>
    %520 = vector.extract_strided_slice %519 {offsets = [0, 0], sizes = [8, 32], strides = [1, 1]} : vector<8x128xf32> to vector<8x32xf32>
    %521 = vector.extract_strided_slice %519 {offsets = [0, 32], sizes = [8, 32], strides = [1, 1]} : vector<8x128xf32> to vector<8x32xf32>
    %522 = vector.extract_strided_slice %519 {offsets = [0, 64], sizes = [8, 32], strides = [1, 1]} : vector<8x128xf32> to vector<8x32xf32>
    %523 = vector.extract_strided_slice %519 {offsets = [0, 96], sizes = [8, 32], strides = [1, 1]} : vector<8x128xf32> to vector<8x32xf32>
    %524 = arith.mulf %521, %508 : vector<8x32xf32>
    %525 = arith.mulf %520, %522 : vector<8x32xf32>
    %526 = arith.addf %524, %525 : vector<8x32xf32>
    %527 = math.tanh %526 : vector<8x32xf32>
    %528 = arith.mulf %523, %527 : vector<8x32xf32>
    %c8_123 = arith.constant 8 : index
    %c0_124 = arith.constant 0 : index
    %529 = vector.load %arg8[%c8_123, %c0_124] : memref<64x32xf32, #tpu.memory_space<vmem>>, vector<8x32xf32>
    tpu.vector_store %arg8[%c8_123, %c0_124], %528 {strides = array<i32>} : memref<64x32xf32, #tpu.memory_space<vmem>>, vector<8x32xf32>,
    %530 = vector.extract_strided_slice %489 {offsets = [16, 0], sizes = [8, 128], strides = [1, 1]} : vector<64x128xf32> to vector<8x128xf32>
    %531 = arith.truncf %528 : vector<8x32xf32> to vector<8x32xbf16>
    %cst_125 = arith.constant dense<0.000000e+00> : vector<8x128xf32>
    %532 = tpu.matmul %531, %491, %cst_125 {dimension_numbers = #tpu.dot_dimension_numbers<[1], [0], [0], [1], [0, 0, 1, 1], [], []>} : vector<8x32xbf16>, vector<32x128xbf16>, vector<8x128xf32> -> vector<8x128xf32>
    %533 = arith.addf %530, %532 : vector<8x128xf32>
    %534 = arith.mulf %533, %8 : vector<8x128xf32>
    %535 = math.tanh %534 : vector<8x128xf32>
    %536 = arith.mulf %535, %8 : vector<8x128xf32>
    %537 = arith.addf %536, %11 : vector<8x128xf32>
    %538 = vector.extract_strided_slice %537 {offsets = [0, 0], sizes = [8, 32], strides = [1, 1]} : vector<8x128xf32> to vector<8x32xf32>
    %539 = vector.extract_strided_slice %537 {offsets = [0, 32], sizes = [8, 32], strides = [1, 1]} : vector<8x128xf32> to vector<8x32xf32>
    %540 = vector.extract_strided_slice %537 {offsets = [0, 64], sizes = [8, 32], strides = [1, 1]} : vector<8x128xf32> to vector<8x32xf32>
    %541 = vector.extract_strided_slice %537 {offsets = [0, 96], sizes = [8, 32], strides = [1, 1]} : vector<8x128xf32> to vector<8x32xf32>
    %542 = arith.mulf %539, %526 : vector<8x32xf32>
    %543 = arith.mulf %538, %540 : vector<8x32xf32>
    %544 = arith.addf %542, %543 : vector<8x32xf32>
    %545 = math.tanh %544 : vector<8x32xf32>
    %546 = arith.mulf %541, %545 : vector<8x32xf32>
    %c16_126 = arith.constant 16 : index
    %c0_127 = arith.constant 0 : index
    %547 = vector.load %arg8[%c16_126, %c0_127] : memref<64x32xf32, #tpu.memory_space<vmem>>, vector<8x32xf32>
    tpu.vector_store %arg8[%c16_126, %c0_127], %546 {strides = array<i32>} : memref<64x32xf32, #tpu.memory_space<vmem>>, vector<8x32xf32>,
    %548 = vector.extract_strided_slice %489 {offsets = [24, 0], sizes = [8, 128], strides = [1, 1]} : vector<64x128xf32> to vector<8x128xf32>
    %549 = arith.truncf %546 : vector<8x32xf32> to vector<8x32xbf16>
    %cst_128 = arith.constant dense<0.000000e+00> : vector<8x128xf32>
    %550 = tpu.matmul %549, %491, %cst_128 {dimension_numbers = #tpu.dot_dimension_numbers<[1], [0], [0], [1], [0, 0, 1, 1], [], []>} : vector<8x32xbf16>, vector<32x128xbf16>, vector<8x128xf32> -> vector<8x128xf32>
    %551 = arith.addf %548, %550 : vector<8x128xf32>
    %552 = arith.mulf %551, %8 : vector<8x128xf32>
    %553 = math.tanh %552 : vector<8x128xf32>
    %554 = arith.mulf %553, %8 : vector<8x128xf32>
    %555 = arith.addf %554, %11 : vector<8x128xf32>
    %556 = vector.extract_strided_slice %555 {offsets = [0, 0], sizes = [8, 32], strides = [1, 1]} : vector<8x128xf32> to vector<8x32xf32>
    %557 = vector.extract_strided_slice %555 {offsets = [0, 32], sizes = [8, 32], strides = [1, 1]} : vector<8x128xf32> to vector<8x32xf32>
    %558 = vector.extract_strided_slice %555 {offsets = [0, 64], sizes = [8, 32], strides = [1, 1]} : vector<8x128xf32> to vector<8x32xf32>
    %559 = vector.extract_strided_slice %555 {offsets = [0, 96], sizes = [8, 32], strides = [1, 1]} : vector<8x128xf32> to vector<8x32xf32>
    %560 = arith.mulf %557, %544 : vector<8x32xf32>
    %561 = arith.mulf %556, %558 : vector<8x32xf32>
    %562 = arith.addf %560, %561 : vector<8x32xf32>
    %563 = math.tanh %562 : vector<8x32xf32>
    %564 = arith.mulf %559, %563 : vector<8x32xf32>
    %c24_129 = arith.constant 24 : index
    %c0_130 = arith.constant 0 : index
    %565 = vector.load %arg8[%c24_129, %c0_130] : memref<64x32xf32, #tpu.memory_space<vmem>>, vector<8x32xf32>
    tpu.vector_store %arg8[%c24_129, %c0_130], %564 {strides = array<i32>} : memref<64x32xf32, #tpu.memory_space<vmem>>, vector<8x32xf32>,
    %566 = vector.extract_strided_slice %489 {offsets = [32, 0], sizes = [8, 128], strides = [1, 1]} : vector<64x128xf32> to vector<8x128xf32>
    %567 = arith.truncf %564 : vector<8x32xf32> to vector<8x32xbf16>
    %cst_131 = arith.constant dense<0.000000e+00> : vector<8x128xf32>
    %568 = tpu.matmul %567, %491, %cst_131 {dimension_numbers = #tpu.dot_dimension_numbers<[1], [0], [0], [1], [0, 0, 1, 1], [], []>} : vector<8x32xbf16>, vector<32x128xbf16>, vector<8x128xf32> -> vector<8x128xf32>
    %569 = arith.addf %566, %568 : vector<8x128xf32>
    %570 = arith.mulf %569, %8 : vector<8x128xf32>
    %571 = math.tanh %570 : vector<8x128xf32>
    %572 = arith.mulf %571, %8 : vector<8x128xf32>
    %573 = arith.addf %572, %11 : vector<8x128xf32>
    %574 = vector.extract_strided_slice %573 {offsets = [0, 0], sizes = [8, 32], strides = [1, 1]} : vector<8x128xf32> to vector<8x32xf32>
    %575 = vector.extract_strided_slice %573 {offsets = [0, 32], sizes = [8, 32], strides = [1, 1]} : vector<8x128xf32> to vector<8x32xf32>
    %576 = vector.extract_strided_slice %573 {offsets = [0, 64], sizes = [8, 32], strides = [1, 1]} : vector<8x128xf32> to vector<8x32xf32>
    %577 = vector.extract_strided_slice %573 {offsets = [0, 96], sizes = [8, 32], strides = [1, 1]} : vector<8x128xf32> to vector<8x32xf32>
    %578 = arith.mulf %575, %562 : vector<8x32xf32>
    %579 = arith.mulf %574, %576 : vector<8x32xf32>
    %580 = arith.addf %578, %579 : vector<8x32xf32>
    %581 = math.tanh %580 : vector<8x32xf32>
    %582 = arith.mulf %577, %581 : vector<8x32xf32>
    %c32_132 = arith.constant 32 : index
    %c0_133 = arith.constant 0 : index
    %583 = vector.load %arg8[%c32_132, %c0_133] : memref<64x32xf32, #tpu.memory_space<vmem>>, vector<8x32xf32>
    tpu.vector_store %arg8[%c32_132, %c0_133], %582 {strides = array<i32>} : memref<64x32xf32, #tpu.memory_space<vmem>>, vector<8x32xf32>,
    %584 = vector.extract_strided_slice %489 {offsets = [40, 0], sizes = [8, 128], strides = [1, 1]} : vector<64x128xf32> to vector<8x128xf32>
    %585 = arith.truncf %582 : vector<8x32xf32> to vector<8x32xbf16>
    %cst_134 = arith.constant dense<0.000000e+00> : vector<8x128xf32>
    %586 = tpu.matmul %585, %491, %cst_134 {dimension_numbers = #tpu.dot_dimension_numbers<[1], [0], [0], [1], [0, 0, 1, 1], [], []>} : vector<8x32xbf16>, vector<32x128xbf16>, vector<8x128xf32> -> vector<8x128xf32>
    %587 = arith.addf %584, %586 : vector<8x128xf32>
    %588 = arith.mulf %587, %8 : vector<8x128xf32>
    %589 = math.tanh %588 : vector<8x128xf32>
    %590 = arith.mulf %589, %8 : vector<8x128xf32>
    %591 = arith.addf %590, %11 : vector<8x128xf32>
    %592 = vector.extract_strided_slice %591 {offsets = [0, 0], sizes = [8, 32], strides = [1, 1]} : vector<8x128xf32> to vector<8x32xf32>
    %593 = vector.extract_strided_slice %591 {offsets = [0, 32], sizes = [8, 32], strides = [1, 1]} : vector<8x128xf32> to vector<8x32xf32>
    %594 = vector.extract_strided_slice %591 {offsets = [0, 64], sizes = [8, 32], strides = [1, 1]} : vector<8x128xf32> to vector<8x32xf32>
    %595 = vector.extract_strided_slice %591 {offsets = [0, 96], sizes = [8, 32], strides = [1, 1]} : vector<8x128xf32> to vector<8x32xf32>
    %596 = arith.mulf %593, %580 : vector<8x32xf32>
    %597 = arith.mulf %592, %594 : vector<8x32xf32>
    %598 = arith.addf %596, %597 : vector<8x32xf32>
    %599 = math.tanh %598 : vector<8x32xf32>
    %600 = arith.mulf %595, %599 : vector<8x32xf32>
    %c40_135 = arith.constant 40 : index
    %c0_136 = arith.constant 0 : index
    %601 = vector.load %arg8[%c40_135, %c0_136] : memref<64x32xf32, #tpu.memory_space<vmem>>, vector<8x32xf32>
    tpu.vector_store %arg8[%c40_135, %c0_136], %600 {strides = array<i32>} : memref<64x32xf32, #tpu.memory_space<vmem>>, vector<8x32xf32>,
    %602 = vector.extract_strided_slice %489 {offsets = [48, 0], sizes = [8, 128], strides = [1, 1]} : vector<64x128xf32> to vector<8x128xf32>
    %603 = arith.truncf %600 : vector<8x32xf32> to vector<8x32xbf16>
    %cst_137 = arith.constant dense<0.000000e+00> : vector<8x128xf32>
    %604 = tpu.matmul %603, %491, %cst_137 {dimension_numbers = #tpu.dot_dimension_numbers<[1], [0], [0], [1], [0, 0, 1, 1], [], []>} : vector<8x32xbf16>, vector<32x128xbf16>, vector<8x128xf32> -> vector<8x128xf32>
    %605 = arith.addf %602, %604 : vector<8x128xf32>
    %606 = arith.mulf %605, %8 : vector<8x128xf32>
    %607 = math.tanh %606 : vector<8x128xf32>
    %608 = arith.mulf %607, %8 : vector<8x128xf32>
    %609 = arith.addf %608, %11 : vector<8x128xf32>
    %610 = vector.extract_strided_slice %609 {offsets = [0, 0], sizes = [8, 32], strides = [1, 1]} : vector<8x128xf32> to vector<8x32xf32>
    %611 = vector.extract_strided_slice %609 {offsets = [0, 32], sizes = [8, 32], strides = [1, 1]} : vector<8x128xf32> to vector<8x32xf32>
    %612 = vector.extract_strided_slice %609 {offsets = [0, 64], sizes = [8, 32], strides = [1, 1]} : vector<8x128xf32> to vector<8x32xf32>
    %613 = vector.extract_strided_slice %609 {offsets = [0, 96], sizes = [8, 32], strides = [1, 1]} : vector<8x128xf32> to vector<8x32xf32>
    %614 = arith.mulf %611, %598 : vector<8x32xf32>
    %615 = arith.mulf %610, %612 : vector<8x32xf32>
    %616 = arith.addf %614, %615 : vector<8x32xf32>
    %617 = math.tanh %616 : vector<8x32xf32>
    %618 = arith.mulf %613, %617 : vector<8x32xf32>
    %c48_138 = arith.constant 48 : index
    %c0_139 = arith.constant 0 : index
    %619 = vector.load %arg8[%c48_138, %c0_139] : memref<64x32xf32, #tpu.memory_space<vmem>>, vector<8x32xf32>
    tpu.vector_store %arg8[%c48_138, %c0_139], %618 {strides = array<i32>} : memref<64x32xf32, #tpu.memory_space<vmem>>, vector<8x32xf32>,
    %620 = vector.extract_strided_slice %489 {offsets = [56, 0], sizes = [8, 128], strides = [1, 1]} : vector<64x128xf32> to vector<8x128xf32>
    %621 = arith.truncf %618 : vector<8x32xf32> to vector<8x32xbf16>
    %cst_140 = arith.constant dense<0.000000e+00> : vector<8x128xf32>
    %622 = tpu.matmul %621, %491, %cst_140 {dimension_numbers = #tpu.dot_dimension_numbers<[1], [0], [0], [1], [0, 0, 1, 1], [], []>} : vector<8x32xbf16>, vector<32x128xbf16>, vector<8x128xf32> -> vector<8x128xf32>
    %623 = arith.addf %620, %622 : vector<8x128xf32>
    %624 = arith.mulf %623, %8 : vector<8x128xf32>
    %625 = math.tanh %624 : vector<8x128xf32>
    %626 = arith.mulf %625, %8 : vector<8x128xf32>
    %627 = arith.addf %626, %11 : vector<8x128xf32>
    %628 = vector.extract_strided_slice %627 {offsets = [0, 0], sizes = [8, 32], strides = [1, 1]} : vector<8x128xf32> to vector<8x32xf32>
    %629 = vector.extract_strided_slice %627 {offsets = [0, 32], sizes = [8, 32], strides = [1, 1]} : vector<8x128xf32> to vector<8x32xf32>
    %630 = vector.extract_strided_slice %627 {offsets = [0, 64], sizes = [8, 32], strides = [1, 1]} : vector<8x128xf32> to vector<8x32xf32>
    %631 = vector.extract_strided_slice %627 {offsets = [0, 96], sizes = [8, 32], strides = [1, 1]} : vector<8x128xf32> to vector<8x32xf32>
    %632 = arith.mulf %629, %616 : vector<8x32xf32>
    %633 = arith.mulf %628, %630 : vector<8x32xf32>
    %634 = arith.addf %632, %633 : vector<8x32xf32>
    %635 = math.tanh %634 : vector<8x32xf32>
    %636 = arith.mulf %631, %635 : vector<8x32xf32>
    %c56_141 = arith.constant 56 : index
    %c0_142 = arith.constant 0 : index
    %637 = vector.load %arg8[%c56_141, %c0_142] : memref<64x32xf32, #tpu.memory_space<vmem>>, vector<8x32xf32>
    tpu.vector_store %arg8[%c56_141, %c0_142], %636 {strides = array<i32>} : memref<64x32xf32, #tpu.memory_space<vmem>>, vector<8x32xf32>,
    %c0_143 = arith.constant 0 : index
    %c0_144 = arith.constant 0 : index
    %638 = vector.load %arg8[%c0_143, %c0_144] : memref<64x32xf32, #tpu.memory_space<vmem>>, vector<64x32xf32>
    %639 = arith.truncf %638 : vector<64x32xf32> to vector<64x32xbf16>
    %c3_145 = arith.constant 3 : index
    %c0_146 = arith.constant 0 : index
    %c0_147 = arith.constant 0 : index
    %640 = vector.load %arg2[%c3_145, %c0_146, %c0_147] : memref<4x32x128xbf16, #tpu.memory_space<vmem>>, vector<1x32x128xbf16>
    %641 = vector.shape_cast %640 : vector<1x32x128xbf16> to vector<32x128xbf16>
    %cst_148 = arith.constant dense<0.000000e+00> : vector<64x128xf32>
    %642 = tpu.matmul %639, %641, %cst_148 {dimension_numbers = #tpu.dot_dimension_numbers<[1], [0], [0], [1], [0, 0, 1, 1], [], []>} : vector<64x32xbf16>, vector<32x128xbf16>, vector<64x128xf32> -> vector<64x128xf32>
    %c4 = arith.constant 4 : index
    %c0_149 = arith.constant 0 : index
    %c0_150 = arith.constant 0 : index
    %643 = vector.load %arg4[%c4, %c0_149, %c0_150] : memref<5x1x128xf32, #tpu.memory_space<vmem>>, vector<1x1x128xf32>
    %644 = vector.shape_cast %643 : vector<1x1x128xf32> to vector<1x128xf32>
    %645 = vector.broadcast %644 : vector<1x128xf32> to vector<64x128xf32>
    %646 = arith.addf %642, %645 : vector<64x128xf32>
    %c4_151 = arith.constant 4 : index
    %c0_152 = arith.constant 0 : index
    %c0_153 = arith.constant 0 : index
    %647 = vector.load %arg3[%c4_151, %c0_152, %c0_153] : memref<5x32x128xbf16, #tpu.memory_space<vmem>>, vector<1x32x128xbf16>
    %648 = vector.shape_cast %647 : vector<1x32x128xbf16> to vector<32x128xbf16>
    %cst_154 = arith.constant 0.000000e+00 : f32
    %649 = vector.broadcast %cst_154 : f32 to vector<8x32xf32>
    %cst_155 = arith.constant 0.000000e+00 : f32
    %650 = vector.broadcast %cst_155 : f32 to vector<8x32xf32>
    %651 = vector.extract_strided_slice %646 {offsets = [0, 0], sizes = [8, 128], strides = [1, 1]} : vector<64x128xf32> to vector<8x128xf32>
    %652 = arith.truncf %649 : vector<8x32xf32> to vector<8x32xbf16>
    %cst_156 = arith.constant dense<0.000000e+00> : vector<8x128xf32>
    %653 = tpu.matmul %652, %648, %cst_156 {dimension_numbers = #tpu.dot_dimension_numbers<[1], [0], [0], [1], [0, 0, 1, 1], [], []>} : vector<8x32xbf16>, vector<32x128xbf16>, vector<8x128xf32> -> vector<8x128xf32>
    %654 = arith.addf %651, %653 : vector<8x128xf32>
    %655 = arith.mulf %654, %8 : vector<8x128xf32>
    %656 = math.tanh %655 : vector<8x128xf32>
    %657 = arith.mulf %656, %8 : vector<8x128xf32>
    %658 = arith.addf %657, %11 : vector<8x128xf32>
    %659 = vector.extract_strided_slice %658 {offsets = [0, 0], sizes = [8, 32], strides = [1, 1]} : vector<8x128xf32> to vector<8x32xf32>
    %660 = vector.extract_strided_slice %658 {offsets = [0, 32], sizes = [8, 32], strides = [1, 1]} : vector<8x128xf32> to vector<8x32xf32>
    %661 = vector.extract_strided_slice %658 {offsets = [0, 64], sizes = [8, 32], strides = [1, 1]} : vector<8x128xf32> to vector<8x32xf32>
    %662 = vector.extract_strided_slice %658 {offsets = [0, 96], sizes = [8, 32], strides = [1, 1]} : vector<8x128xf32> to vector<8x32xf32>
    %663 = arith.mulf %660, %650 : vector<8x32xf32>
    %664 = arith.mulf %659, %661 : vector<8x32xf32>
    %665 = arith.addf %663, %664 : vector<8x32xf32>
    %666 = math.tanh %665 : vector<8x32xf32>
    %667 = arith.mulf %662, %666 : vector<8x32xf32>
    %668 = vector.extract_strided_slice %646 {offsets = [8, 0], sizes = [8, 128], strides = [1, 1]} : vector<64x128xf32> to vector<8x128xf32>
    %669 = arith.truncf %667 : vector<8x32xf32> to vector<8x32xbf16>
    %cst_157 = arith.constant dense<0.000000e+00> : vector<8x128xf32>
    %670 = tpu.matmul %669, %648, %cst_157 {dimension_numbers = #tpu.dot_dimension_numbers<[1], [0], [0], [1], [0, 0, 1, 1], [], []>} : vector<8x32xbf16>, vector<32x128xbf16>, vector<8x128xf32> -> vector<8x128xf32>
    %671 = arith.addf %668, %670 : vector<8x128xf32>
    %672 = arith.mulf %671, %8 : vector<8x128xf32>
    %673 = math.tanh %672 : vector<8x128xf32>
    %674 = arith.mulf %673, %8 : vector<8x128xf32>
    %675 = arith.addf %674, %11 : vector<8x128xf32>
    %676 = vector.extract_strided_slice %675 {offsets = [0, 0], sizes = [8, 32], strides = [1, 1]} : vector<8x128xf32> to vector<8x32xf32>
    %677 = vector.extract_strided_slice %675 {offsets = [0, 32], sizes = [8, 32], strides = [1, 1]} : vector<8x128xf32> to vector<8x32xf32>
    %678 = vector.extract_strided_slice %675 {offsets = [0, 64], sizes = [8, 32], strides = [1, 1]} : vector<8x128xf32> to vector<8x32xf32>
    %679 = vector.extract_strided_slice %675 {offsets = [0, 96], sizes = [8, 32], strides = [1, 1]} : vector<8x128xf32> to vector<8x32xf32>
    %680 = arith.mulf %677, %665 : vector<8x32xf32>
    %681 = arith.mulf %676, %678 : vector<8x32xf32>
    %682 = arith.addf %680, %681 : vector<8x32xf32>
    %683 = math.tanh %682 : vector<8x32xf32>
    %684 = arith.mulf %679, %683 : vector<8x32xf32>
    %685 = vector.extract_strided_slice %646 {offsets = [16, 0], sizes = [8, 128], strides = [1, 1]} : vector<64x128xf32> to vector<8x128xf32>
    %686 = arith.truncf %684 : vector<8x32xf32> to vector<8x32xbf16>
    %cst_158 = arith.constant dense<0.000000e+00> : vector<8x128xf32>
    %687 = tpu.matmul %686, %648, %cst_158 {dimension_numbers = #tpu.dot_dimension_numbers<[1], [0], [0], [1], [0, 0, 1, 1], [], []>} : vector<8x32xbf16>, vector<32x128xbf16>, vector<8x128xf32> -> vector<8x128xf32>
    %688 = arith.addf %685, %687 : vector<8x128xf32>
    %689 = arith.mulf %688, %8 : vector<8x128xf32>
    %690 = math.tanh %689 : vector<8x128xf32>
    %691 = arith.mulf %690, %8 : vector<8x128xf32>
    %692 = arith.addf %691, %11 : vector<8x128xf32>
    %693 = vector.extract_strided_slice %692 {offsets = [0, 0], sizes = [8, 32], strides = [1, 1]} : vector<8x128xf32> to vector<8x32xf32>
    %694 = vector.extract_strided_slice %692 {offsets = [0, 32], sizes = [8, 32], strides = [1, 1]} : vector<8x128xf32> to vector<8x32xf32>
    %695 = vector.extract_strided_slice %692 {offsets = [0, 64], sizes = [8, 32], strides = [1, 1]} : vector<8x128xf32> to vector<8x32xf32>
    %696 = vector.extract_strided_slice %692 {offsets = [0, 96], sizes = [8, 32], strides = [1, 1]} : vector<8x128xf32> to vector<8x32xf32>
    %697 = arith.mulf %694, %682 : vector<8x32xf32>
    %698 = arith.mulf %693, %695 : vector<8x32xf32>
    %699 = arith.addf %697, %698 : vector<8x32xf32>
    %700 = math.tanh %699 : vector<8x32xf32>
    %701 = arith.mulf %696, %700 : vector<8x32xf32>
    %702 = vector.extract_strided_slice %646 {offsets = [24, 0], sizes = [8, 128], strides = [1, 1]} : vector<64x128xf32> to vector<8x128xf32>
    %703 = arith.truncf %701 : vector<8x32xf32> to vector<8x32xbf16>
    %cst_159 = arith.constant dense<0.000000e+00> : vector<8x128xf32>
    %704 = tpu.matmul %703, %648, %cst_159 {dimension_numbers = #tpu.dot_dimension_numbers<[1], [0], [0], [1], [0, 0, 1, 1], [], []>} : vector<8x32xbf16>, vector<32x128xbf16>, vector<8x128xf32> -> vector<8x128xf32>
    %705 = arith.addf %702, %704 : vector<8x128xf32>
    %706 = arith.mulf %705, %8 : vector<8x128xf32>
    %707 = math.tanh %706 : vector<8x128xf32>
    %708 = arith.mulf %707, %8 : vector<8x128xf32>
    %709 = arith.addf %708, %11 : vector<8x128xf32>
    %710 = vector.extract_strided_slice %709 {offsets = [0, 0], sizes = [8, 32], strides = [1, 1]} : vector<8x128xf32> to vector<8x32xf32>
    %711 = vector.extract_strided_slice %709 {offsets = [0, 32], sizes = [8, 32], strides = [1, 1]} : vector<8x128xf32> to vector<8x32xf32>
    %712 = vector.extract_strided_slice %709 {offsets = [0, 64], sizes = [8, 32], strides = [1, 1]} : vector<8x128xf32> to vector<8x32xf32>
    %713 = vector.extract_strided_slice %709 {offsets = [0, 96], sizes = [8, 32], strides = [1, 1]} : vector<8x128xf32> to vector<8x32xf32>
    %714 = arith.mulf %711, %699 : vector<8x32xf32>
    %715 = arith.mulf %710, %712 : vector<8x32xf32>
    %716 = arith.addf %714, %715 : vector<8x32xf32>
    %717 = math.tanh %716 : vector<8x32xf32>
    %718 = arith.mulf %713, %717 : vector<8x32xf32>
    %719 = vector.extract_strided_slice %646 {offsets = [32, 0], sizes = [8, 128], strides = [1, 1]} : vector<64x128xf32> to vector<8x128xf32>
    %720 = arith.truncf %718 : vector<8x32xf32> to vector<8x32xbf16>
    %cst_160 = arith.constant dense<0.000000e+00> : vector<8x128xf32>
    %721 = tpu.matmul %720, %648, %cst_160 {dimension_numbers = #tpu.dot_dimension_numbers<[1], [0], [0], [1], [0, 0, 1, 1], [], []>} : vector<8x32xbf16>, vector<32x128xbf16>, vector<8x128xf32> -> vector<8x128xf32>
    %722 = arith.addf %719, %721 : vector<8x128xf32>
    %723 = arith.mulf %722, %8 : vector<8x128xf32>
    %724 = math.tanh %723 : vector<8x128xf32>
    %725 = arith.mulf %724, %8 : vector<8x128xf32>
    %726 = arith.addf %725, %11 : vector<8x128xf32>
    %727 = vector.extract_strided_slice %726 {offsets = [0, 0], sizes = [8, 32], strides = [1, 1]} : vector<8x128xf32> to vector<8x32xf32>
    %728 = vector.extract_strided_slice %726 {offsets = [0, 32], sizes = [8, 32], strides = [1, 1]} : vector<8x128xf32> to vector<8x32xf32>
    %729 = vector.extract_strided_slice %726 {offsets = [0, 64], sizes = [8, 32], strides = [1, 1]} : vector<8x128xf32> to vector<8x32xf32>
    %730 = vector.extract_strided_slice %726 {offsets = [0, 96], sizes = [8, 32], strides = [1, 1]} : vector<8x128xf32> to vector<8x32xf32>
    %731 = arith.mulf %728, %716 : vector<8x32xf32>
    %732 = arith.mulf %727, %729 : vector<8x32xf32>
    %733 = arith.addf %731, %732 : vector<8x32xf32>
    %734 = math.tanh %733 : vector<8x32xf32>
    %735 = arith.mulf %730, %734 : vector<8x32xf32>
    %736 = vector.extract_strided_slice %646 {offsets = [40, 0], sizes = [8, 128], strides = [1, 1]} : vector<64x128xf32> to vector<8x128xf32>
    %737 = arith.truncf %735 : vector<8x32xf32> to vector<8x32xbf16>
    %cst_161 = arith.constant dense<0.000000e+00> : vector<8x128xf32>
    %738 = tpu.matmul %737, %648, %cst_161 {dimension_numbers = #tpu.dot_dimension_numbers<[1], [0], [0], [1], [0, 0, 1, 1], [], []>} : vector<8x32xbf16>, vector<32x128xbf16>, vector<8x128xf32> -> vector<8x128xf32>
    %739 = arith.addf %736, %738 : vector<8x128xf32>
    %740 = arith.mulf %739, %8 : vector<8x128xf32>
    %741 = math.tanh %740 : vector<8x128xf32>
    %742 = arith.mulf %741, %8 : vector<8x128xf32>
    %743 = arith.addf %742, %11 : vector<8x128xf32>
    %744 = vector.extract_strided_slice %743 {offsets = [0, 0], sizes = [8, 32], strides = [1, 1]} : vector<8x128xf32> to vector<8x32xf32>
    %745 = vector.extract_strided_slice %743 {offsets = [0, 32], sizes = [8, 32], strides = [1, 1]} : vector<8x128xf32> to vector<8x32xf32>
    %746 = vector.extract_strided_slice %743 {offsets = [0, 64], sizes = [8, 32], strides = [1, 1]} : vector<8x128xf32> to vector<8x32xf32>
    %747 = vector.extract_strided_slice %743 {offsets = [0, 96], sizes = [8, 32], strides = [1, 1]} : vector<8x128xf32> to vector<8x32xf32>
    %748 = arith.mulf %745, %733 : vector<8x32xf32>
    %749 = arith.mulf %744, %746 : vector<8x32xf32>
    %750 = arith.addf %748, %749 : vector<8x32xf32>
    %751 = math.tanh %750 : vector<8x32xf32>
    %752 = arith.mulf %747, %751 : vector<8x32xf32>
    %753 = vector.extract_strided_slice %646 {offsets = [48, 0], sizes = [8, 128], strides = [1, 1]} : vector<64x128xf32> to vector<8x128xf32>
    %754 = arith.truncf %752 : vector<8x32xf32> to vector<8x32xbf16>
    %cst_162 = arith.constant dense<0.000000e+00> : vector<8x128xf32>
    %755 = tpu.matmul %754, %648, %cst_162 {dimension_numbers = #tpu.dot_dimension_numbers<[1], [0], [0], [1], [0, 0, 1, 1], [], []>} : vector<8x32xbf16>, vector<32x128xbf16>, vector<8x128xf32> -> vector<8x128xf32>
    %756 = arith.addf %753, %755 : vector<8x128xf32>
    %757 = arith.mulf %756, %8 : vector<8x128xf32>
    %758 = math.tanh %757 : vector<8x128xf32>
    %759 = arith.mulf %758, %8 : vector<8x128xf32>
    %760 = arith.addf %759, %11 : vector<8x128xf32>
    %761 = vector.extract_strided_slice %760 {offsets = [0, 0], sizes = [8, 32], strides = [1, 1]} : vector<8x128xf32> to vector<8x32xf32>
    %762 = vector.extract_strided_slice %760 {offsets = [0, 32], sizes = [8, 32], strides = [1, 1]} : vector<8x128xf32> to vector<8x32xf32>
    %763 = vector.extract_strided_slice %760 {offsets = [0, 64], sizes = [8, 32], strides = [1, 1]} : vector<8x128xf32> to vector<8x32xf32>
    %764 = vector.extract_strided_slice %760 {offsets = [0, 96], sizes = [8, 32], strides = [1, 1]} : vector<8x128xf32> to vector<8x32xf32>
    %765 = arith.mulf %762, %750 : vector<8x32xf32>
    %766 = arith.mulf %761, %763 : vector<8x32xf32>
    %767 = arith.addf %765, %766 : vector<8x32xf32>
    %768 = math.tanh %767 : vector<8x32xf32>
    %769 = arith.mulf %764, %768 : vector<8x32xf32>
    %770 = vector.extract_strided_slice %646 {offsets = [56, 0], sizes = [8, 128], strides = [1, 1]} : vector<64x128xf32> to vector<8x128xf32>
    %771 = arith.truncf %769 : vector<8x32xf32> to vector<8x32xbf16>
    %cst_163 = arith.constant dense<0.000000e+00> : vector<8x128xf32>
    %772 = tpu.matmul %771, %648, %cst_163 {dimension_numbers = #tpu.dot_dimension_numbers<[1], [0], [0], [1], [0, 0, 1, 1], [], []>} : vector<8x32xbf16>, vector<32x128xbf16>, vector<8x128xf32> -> vector<8x128xf32>
    %773 = arith.addf %770, %772 : vector<8x128xf32>
    %774 = arith.mulf %773, %8 : vector<8x128xf32>
    %775 = math.tanh %774 : vector<8x128xf32>
    %776 = arith.mulf %775, %8 : vector<8x128xf32>
    %777 = arith.addf %776, %11 : vector<8x128xf32>
    %778 = vector.extract_strided_slice %777 {offsets = [0, 0], sizes = [8, 32], strides = [1, 1]} : vector<8x128xf32> to vector<8x32xf32>
    %779 = vector.extract_strided_slice %777 {offsets = [0, 32], sizes = [8, 32], strides = [1, 1]} : vector<8x128xf32> to vector<8x32xf32>
    %780 = vector.extract_strided_slice %777 {offsets = [0, 64], sizes = [8, 32], strides = [1, 1]} : vector<8x128xf32> to vector<8x32xf32>
    %781 = vector.extract_strided_slice %777 {offsets = [0, 96], sizes = [8, 32], strides = [1, 1]} : vector<8x128xf32> to vector<8x32xf32>
    %782 = arith.mulf %779, %767 : vector<8x32xf32>
    %783 = arith.mulf %778, %780 : vector<8x32xf32>
    %784 = arith.addf %782, %783 : vector<8x32xf32>
    %785 = math.tanh %784 : vector<8x32xf32>
    %786 = arith.mulf %781, %785 : vector<8x32xf32>
    %787 = arith.truncf %786 : vector<8x32xf32> to vector<8x32xbf16>
    %c0_164 = arith.constant 0 : index
    %c0_165 = arith.constant 0 : index
    %788 = vector.load %arg5[%c0_164, %c0_165] : memref<32x128xbf16, #tpu.memory_space<vmem>>, vector<32x128xbf16>
    %cst_166 = arith.constant dense<0.000000e+00> : vector<8x128xf32>
    %789 = tpu.matmul %787, %788, %cst_166 {dimension_numbers = #tpu.dot_dimension_numbers<[1], [0], [0], [1], [0, 0, 1, 1], [], []>} : vector<8x32xbf16>, vector<32x128xbf16>, vector<8x128xf32> -> vector<8x128xf32>
    %c0_167 = arith.constant 0 : index
    %c0_168 = arith.constant 0 : index
    %790 = vector.load %arg6[%c0_167, %c0_168] : memref<1x128xf32, #tpu.memory_space<vmem>>, vector<1x128xf32>
    %791 = vector.broadcast %790 : vector<1x128xf32> to vector<8x128xf32>
    %792 = arith.addf %789, %791 : vector<8x128xf32>
    %c0_169 = arith.constant 0 : index
    %c0_170 = arith.constant 0 : index
    %793 = vector.load %arg7[%c0_169, %c0_170] : memref<8x128xf32, #tpu.memory_space<vmem>>, vector<8x128xf32>
    tpu.vector_store %arg7[%c0_169, %c0_170], %792 {strides = array<i32>} : memref<8x128xf32, #tpu.memory_space<vmem>>, vector<8x128xf32>,
    return
  }
}

</mosaic_0001>

<bundles_post_ra>
// kernel: lstm_classifier_forward.1
= control target key start
LH: loop header
LB: loop body
LE: loop exit
PB: predicated region body
PF: predicated region fallthrough
CT: control target
= control target key end

     0   :  { %v4506_v0 = vmov 0.0   ;;  %vm4507_vm0 = vmmov 0   ;;  %vm77_vm1 = vcmask 130048   ;;  %v4508_v6 = vmov 0   ;;  %s4510_s12 = smov 64   ;;  %s4511_s13 = smov 32   ;;  %s5613_s1 = inlined_call_operand.vmem [shape: bf16[16,128], index: 1, kind: input, shape index: {}]   ;;  %s5614_s3 = inlined_call_operand.vmem [shape: bf16[5,32,128], index: 3, kind: input, shape index: {}]   ;;  %s5615_s0 = inlined_call_operand.vmem [shape: bf16[64,16], index: 0, kind: input, shape index: {}]   ;;  %s5616_s4 = inlined_call_operand.vmem [shape: f32[5,1,128], index: 4, kind: input, shape index: {}]   ;;  %s5617_s2 = inlined_call_operand.vmem [shape: bf16[4,32,128], index: 2, kind: input, shape index: {}]   ;;  %s5618_s5 = inlined_call_operand.vmem [shape: bf16[32,128], index: 5, kind: input, shape index: {}]   ;;  %s5619_s6 = inlined_call_operand.vmem [shape: f32[1,128], index: 6, kind: input, shape index: {}]   ;;  %s5620_s7 = inlined_call_operand.vmem [shape: f32[8,128], index: 7, kind: output, shape index: {}]  }
   0x1   :  { %3939 = vmatprep.subr.bf16.mxu1 %v4506_v0  ;;  %v4321_v1 = vld [vmem:[%s5613_s1] sm:$0xff]   ;;  %3943 = vmatprep.mubr.msk.bf16.mxu1 %vm4507_vm0, %v4506_v0  ;;  %v4324_v4 = vld [vmem:[%s5615_s0 + $0x8] sm:$0xff]   ;;  %v27_v7 = vlaneseq  ;;  %v4509_v15 = vmov 0.5   ;;  %vm171_vm5 = vcmask 261120   ;;  %v4326_v52 = vld [vmem:[%s5615_s0 + $0x10] sm:$0xff]  }
   0x2   :  { %v4561_v2 = vld [vmem:[%s5614_s3] sm:$0xff]   ;;  %3929 = vmatprep.subr.bf16.mxu0 %v4321_v1  ;;  %v4575_v5 = vld [vmem:[%s5614_s3 + $0x8] sm:$0xff]   ;;  %v4327_v53 = vld [vmem:[%s5615_s0 + $0x18] sm:$0xff]  }
   0x3   :  { %v4323_v3 = vld [vmem:[%s5615_s0] sm:$0xff]   ;;  %3940 = vmatpush3.bf16.msra.mxu1 %v4561_v2  ;;  %3930 = vmatpush3.bf16.msra.mxu0 %v4321_v1  ;;  %v28_v8 = vand.u32 127, %v27_v7 }
   0x4   :  { %3931 = vmatprep.mubr.msk.bf16.mxu0 %vm77_vm1, %v4323_v3  ;;  %3941 = vmatprep.subr.bf16.mxu1 %v4506_v0  ;;  %v4595_v9 = vld [vmem:[%s5616_s4] ss:$0 sm:$0xff] }
   0x5   :  { %3955 = vmatprep.subr.bf16.mxu0 %v4506_v0  ;;  %vm29_vm2 = vcmp.ge.s32.totalorder %v28_v8, 64  ;;  %vm30_vm3 = vcmp.lt.s32.totalorder %v28_v8, 96 }
   0x6   :  { %3932 = vmatmul.mubr.msk.bf16.vlgmr.msra.gmra.mrb[0].mxu0 %vm77_vm1, %v4324_v4  ;;  %vm31_vm4 = vmand %vm29_vm2, %vm30_vm3 }
   0x7   :  { %3942 = vmatpush3.bf16.msra.mxu1 %v4575_v5  ;;  %3956 = vmatpush3.bf16.msra.mxu0 %v4561_v2  ;;  %v4602_v16 = vsel %vm31_vm4, 1.0, %v4509_v15  ;;  %v4605_v24 = vsel %vm31_vm4, 0.0, %v4509_v15 }
   0x8   :  { %3947 = vmatprep.subr.bf16.mxu1 %v4506_v0  ;;  %3957 = vmatprep.subr.bf16.mxu0 %v4506_v0 }
   0x9   :  { %3935 = vmatprep.mubr.msk.bf16.mxu0 %vm77_vm1, %v4326_v52 }
   0xa   :  { %3944 = vmatmul.mubr.bf16.vlgmr.msra.gmra.mrb[0].mxu1 %v4508_v6 }
   0xb   :  { %3948 = vmatpush3.bf16.msra.mxu1 %v4561_v2  ;;  %3951 = vmatprep.mubr.msk.bf16.mxu1 %vm4507_vm0, %v4506_v0 }
   0xc   :  { %3949 = vmatprep.subr.bf16.mxu1 %v4506_v0  ;;  %3958 = vmatpush3.bf16.msra.mxu0 %v4575_v5 }
   0xd   :  { %3971 = vmatprep.subr.bf16.mxu0 %v4506_v0 }
   0xe   :  { %3936 = vmatmul.mubr.msk.bf16.gmra.mrb[4].mxu0 %vm77_vm1, %v4327_v53 }
   0xf   :  { %3950 = vmatpush3.bf16.msra.mxu1 %v4575_v5  ;;  %3959 = vmatprep.mubr.msk.bf16.mxu0 %vm4507_vm0, %v4506_v0 }
  0x10   :  { %3963 = vmatprep.subr.bf16.mxu1 %v4506_v0 }
  0xd9   :  { %v4597_v10 = vpop.f32.mrb[0].mxu0 }
  0xda   :  { %v124_v11 = vpop.f32.mrb[1].mxu0  ;;  %v133_v63 = vadd.f32 %v4597_v10, %v4595_v9 }
  0xdb   :  { %v125_v12 = vadd.f32 %v4595_v9, %v124_v11  ;;  %v4600_v13 = vpop.f32.mrb[2].mxu0 }
  0xdc   :  { %v127_v14 = vpop.f32.mrb[3].mxu0 }
  0xdd   :  { %v209_v17 = vpop.f32.mrb[0].mxu1  ;;  %v128_v37 = vadd.f32 %v4595_v9, %v127_v14 }
  0xde   :  { %v215_v18 = vadd.f32 %v209_v17, %v125_v12  ;;  %v3945_v19 = vpop.f32.mrb[1].mxu1 }
  0xdf   :  { %v212_v20 = vpop.f32.mrb[2].mxu1 }
  0xe0   :  { %v216_v21 = vmul.f32 %v215_v18, %v4602_v16  ;;  %v3946_v22 = vpop.f32.mrb[3].mxu1 }
  0xe1   :  { %v4646_v58 = vpop.f32.mrb[4].mxu0 }
  0xe2   :  { %4346 = vtanh.f32 %v216_v21  ;;  %v4648_v59 = vpop.f32.mrb[5].mxu0 }
  0xe3   :  { %v4650_v60 = vpop.f32.mrb[6].mxu0 }
  0xe4   :  { %v4652_v61 = vpop.f32.mrb[7].mxu0 }
  0xec   :  { %v4347_v23 = vpop.eup %4346 }
  0xed   :  { %v218_v25 = vmul.f32 %v4347_v23, %v4602_v16 }
  0xef   :  { %v219_v26 = vadd.f32 %v218_v25, %v4605_v24 }
  0xf1   :  { %222 = vrot.lane.b32.xlu0 %v219_v26, %s4510_s12  ;;  %v220_v29 = vmul.f32 0.0, %v219_v26 }
 0x163   :  { %v223_v27 = vpop.permute.xlu0 %222 }
 0x164   :  { %v225_v28 = vmul.f32 %v223_v27, %v219_v26  ;;  %v136_v27 = vadd.f32 %v4600_v13, %v4595_v9 }
 0x166   :  { %227 = vrot.lane.b32.xlu0 %v225_v28, %s4511_s13 }
 0x1d8   :  { %v228_v30 = vpop.permute.xlu0 %227 }
 0x1d9   :  { %v230_v31 = vadd.f32 %v228_v30, %v220_v29 }
 0x1db   :  { %4348 = vtanh.f32 %v230_v31 }
 0x1e5   :  { %v4349_v32 = vpop.eup %4348 }
 0x1e6   :  { %233 = vrot.lane.b32.xlu1 %v4349_v32, %s4510_s12 }
 0x258   :  { %v234_v33 = vpop.permute.xlu1 %233 }
 0x259   :  { %v4612_v34 = vmul.f32 %v234_v33, %v219_v26 }
 0x25b   :  { %v242_v35 = vpack.c.bf16 %v4612_v34, %v4612_v34 }
 0x25d   :  { %244 = vrot.lane.b32.xlu1 %v242_v35, %s4511_s13 }
 0x2cf   :  { %v245_v36 = vpop.permute.xlu1 %244 }
 0x2d0   :  { %3952 = vmatmul.mubr.msk.bf16.vlgmr.msra.gmra.mrb[4].mxu1 %vm171_vm5, %v245_v36 }
 0x2d1   :  { %3964 = vmatpush3.bf16.msra.mxu1 %v4561_v2  ;;  %3967 = vmatprep.mubr.msk.bf16.mxu1 %vm4507_vm0, %v4506_v0 }
 0x2d2   :  { %3965 = vmatprep.subr.bf16.mxu1 %v4506_v0 }
 0x2d5   :  { %3966 = vmatpush3.bf16.msra.mxu1 %v4575_v5 }
 0x2d6   :  { %3979 = vmatprep.subr.bf16.mxu1 %v4506_v0 }
 0x3a3   :  { %v283_v38 = vpop.f32.mrb[4].mxu1 }
 0x3a4   :  { %v289_v39 = vadd.f32 %v283_v38, %v128_v37  ;;  %v3953_v40 = vpop.f32.mrb[5].mxu1 }
 0x3a5   :  { %v286_v41 = vpop.f32.mrb[6].mxu1 }
 0x3a6   :  { %v290_v42 = vmul.f32 %v289_v39, %v4602_v16  ;;  %v3954_v43 = vpop.f32.mrb[7].mxu1 }
 0x3a8   :  { %4350 = vtanh.f32 %v290_v42 }
 0x3b2   :  { %v4351_v44 = vpop.eup %4350 }
 0x3b3   :  { %v292_v45 = vmul.f32 %v4351_v44, %v4602_v16 }
 0x3b5   :  { %v293_v46 = vadd.f32 %v292_v45, %v4605_v24 }
 0x3b7   :  { %296 = vrot.lane.b32.xlu0 %v293_v46, %s4510_s12  ;;  %v294_v49 = vmul.f32 %v293_v46, %v230_v31 }
 0x429   :  { %v297_v47 = vpop.permute.xlu0 %296 }
 0x42a   :  { %v299_v48 = vmul.f32 %v297_v47, %v293_v46  ;;  %v141_v47 = vadd.f32 %v4595_v9, %v4648_v59 }
 0x42c   :  { %301 = vrot.lane.b32.xlu1 %v299_v48, %s4511_s13 }
 0x49e   :  { %v302_v50 = vpop.permute.xlu1 %301 }
 0x49f   :  { %v304_v51 = vadd.f32 %v302_v50, %v294_v49 }
 0x4a1   :  { %4352 = vtanh.f32 %v304_v51 }
 0x4ab   :  { %v4353_v54 = vpop.eup %4352 }
 0x4ac   :  { %307 = vrot.lane.b32.xlu0 %v4353_v54, %s4510_s12 }
 0x51e   :  { %v308_v55 = vpop.permute.xlu0 %307 }
 0x51f   :  { %v4641_v56 = vmul.f32 %v308_v55, %v293_v46 }
 0x521   :  { %v316_v57 = vpack.c.bf16 %v4641_v56, %v4641_v56 }
 0x523   :  { %318 = vrot.lane.b32.xlu1 %v316_v57, %s4511_s13 }
 0x595   :  { %v319_v62 = vpop.permute.xlu1 %318 }
 0x596   :  { %3960 = vmatmul.mubr.msk.bf16.vlgmr.msra.gmra.mrb[8].mxu0 %vm171_vm5, %v319_v62 }
 0x597   :  { %3972 = vmatpush3.bf16.msra.mxu0 %v4561_v2  ;;  %3975 = vmatprep.mubr.msk.bf16.mxu0 %vm4507_vm0, %v4506_v0 }
 0x598   :  { %3973 = vmatprep.subr.bf16.mxu0 %v4506_v0 }
 0x59b   :  { %3974 = vmatpush3.bf16.msra.mxu0 %v4575_v5 }
 0x59c   :  { %3987 = vmatprep.subr.bf16.mxu0 %v4506_v0 }
 0x669   :  { %v357_v1 = vpop.f32.mrb[8].mxu0 }
 0x66a   :  { %v363_v3 = vadd.f32 %v357_v1, %v133_v63  ;;  %v3961_v4 = vpop.f32.mrb[9].mxu0 }
 0x66b   :  { %v360_v7 = vpop.f32.mrb[10].mxu0 }
 0x66c   :  { %v364_v8 = vmul.f32 %v363_v3, %v4602_v16  ;;  %v3962_v11 = vpop.f32.mrb[11].mxu0 }
 0x66e   :  { %4354 = vtanh.f32 %v364_v8 }
 0x678   :  { %v4355_v12 = vpop.eup %4354 }
 0x679   :  { %v366_v14 = vmul.f32 %v4355_v12, %v4602_v16 }
 0x67b   :  { %v367_v15 = vadd.f32 %v366_v14, %v4605_v24  ;;  %v144_v14 = vadd.f32 %v4595_v9, %v4652_v61 }
 0x67d   :  { %370 = vrot.lane.b32.xlu0 %v367_v15, %s4510_s12  ;;  %v368_v10 = vmul.f32 %v367_v15, %v304_v51 }
 0x6ef   :  { %v371_v17 = vpop.permute.xlu0 %370 }
 0x6f0   :  { %v373_v18 = vmul.f32 %v371_v17, %v367_v15 }
 0x6f2   :  { %375 = vrot.lane.b32.xlu1 %v373_v18, %s4511_s13 }
 0x764   :  { %v376_v19 = vpop.permute.xlu1 %375 }
 0x765   :  { %v378_v20 = vadd.f32 %v376_v19, %v368_v10 }
 0x767   :  { %4356 = vtanh.f32 %v378_v20 }
 0x771   :  { %v4357_v21 = vpop.eup %4356 }
 0x772   :  { %381 = vrot.lane.b32.xlu0 %v4357_v21, %s4510_s12 }
 0x7e4   :  { %v382_v22 = vpop.permute.xlu0 %381 }
 0x7e5   :  { %v4669_v23 = vmul.f32 %v382_v22, %v367_v15 }
 0x7e7   :  { %v390_v25 = vpack.c.bf16 %v4669_v23, %v4669_v23 }
 0x7e9   :  { %392 = vrot.lane.b32.xlu1 %v390_v25, %s4511_s13 }
 0x85b   :  { %v393_v26 = vpop.permute.xlu1 %392 }
 0x85c   :  { %3968 = vmatmul.mubr.msk.bf16.vlgmr.msra.gmra.mrb[8].mxu1 %vm171_vm5, %v393_v26 }
 0x85d   :  { %3980 = vmatpush3.bf16.msra.mxu1 %v4561_v2  ;;  %3983 = vmatprep.mubr.msk.bf16.mxu1 %vm4507_vm0, %v4506_v0 }
 0x85e   :  { %3981 = vmatprep.subr.bf16.mxu1 %v4506_v0 }
 0x861   :  { %3982 = vmatpush3.bf16.msra.mxu1 %v4575_v5 }
 0x862   :  { %3995 = vmatprep.subr.bf16.mxu1 %v4506_v0 }
 0x92f   :  { %v431_v28 = vpop.f32.mrb[8].mxu1 }
 0x930   :  { %v437_v29 = vadd.f32 %v431_v28, %v136_v27  ;;  %v3969_v30 = vpop.f32.mrb[9].mxu1 }
 0x931   :  { %v434_v31 = vpop.f32.mrb[10].mxu1 }
 0x932   :  { %v438_v32 = vmul.f32 %v437_v29, %v4602_v16  ;;  %v3970_v33 = vpop.f32.mrb[11].mxu1 }
 0x933   :  { %v149_v33 = vadd.f32 %v4646_v58, %v4595_v9 }
 0x934   :  { %4358 = vtanh.f32 %v438_v32 }
 0x93e   :  { %v4359_v35 = vpop.eup %4358 }
 0x93f   :  { %v440_v36 = vmul.f32 %v4359_v35, %v4602_v16 }
 0x941   :  { %v441_v37 = vadd.f32 %v440_v36, %v4605_v24 }
 0x943   :  { %444 = vrot.lane.b32.xlu0 %v441_v37, %s4510_s12  ;;  %v442_v13 = vmul.f32 %v441_v37, %v378_v20 }
 0x9b5   :  { %v445_v38 = vpop.permute.xlu0 %444 }
 0x9b6   :  { %v447_v39 = vmul.f32 %v445_v38, %v441_v37 }
 0x9b8   :  { %449 = vrot.lane.b32.xlu1 %v447_v39, %s4511_s13 }
 0xa2a   :  { %v450_v40 = vpop.permute.xlu1 %449 }
 0xa2b   :  { %v452_v41 = vadd.f32 %v450_v40, %v442_v13 }
 0xa2d   :  { %4360 = vtanh.f32 %v452_v41 }
 0xa37   :  { %v4361_v42 = vpop.eup %4360 }
 0xa38   :  { %455 = vrot.lane.b32.xlu0 %v4361_v42, %s4510_s12 }
 0xaaa   :  { %v456_v43 = vpop.permute.xlu0 %455 }
 0xaab   :  { %v4689_v44 = vmul.f32 %v456_v43, %v441_v37 }
 0xaad   :  { %v464_v45 = vpack.c.bf16 %v4689_v44, %v4689_v44 }
 0xaaf   :  { %466 = vrot.lane.b32.xlu1 %v464_v45, %s4511_s13 }
 0xb21   :  { %v467_v46 = vpop.permute.xlu1 %466 }
 0xb22   :  { %3976 = vmatmul.mubr.msk.bf16.vlgmr.msra.gmra.mrb[12].mxu0 %vm171_vm5, %v467_v46 }
 0xb23   :  { %3988 = vmatpush3.bf16.msra.mxu0 %v4561_v2  ;;  %3991 = vmatprep.mubr.msk.bf16.mxu0 %vm4507_vm0, %v4506_v0 }
 0xb24   :  { %3989 = vmatprep.subr.bf16.mxu0 %v4506_v0 }
 0xb27   :  { %3990 = vmatpush3.bf16.msra.mxu0 %v4575_v5 }
 0xbf5   :  { %v505_v48 = vpop.f32.mrb[12].mxu0 }
 0xbf6   :  { %v511_v49 = vadd.f32 %v505_v48, %v141_v47  ;;  %v3977_v50 = vpop.f32.mrb[13].mxu0 }
 0xbf7   :  { %v508_v51 = vpop.f32.mrb[14].mxu0  ;;  %v4328_v50 = vld [vmem:[%s5617_s2] sm:$0xff]  }
 0xbf8   :  { %v512_v52 = vmul.f32 %v511_v49, %v4602_v16  ;;  %v3978_v53 = vpop.f32.mrb[15].mxu0  ;;  %4003 = vmatprep.subr.bf16.mxu0 %v4328_v50 }
 0xbfa   :  { %4362 = vtanh.f32 %v512_v52 }
 0xc04   :  { %v4363_v54 = vpop.eup %4362 }
 0xc05   :  { %v514_v55 = vmul.f32 %v4363_v54, %v4602_v16 }
 0xc07   :  { %v515_v57 = vadd.f32 %v514_v55, %v4605_v24 }
 0xc09   :  { %518 = vrot.lane.b32.xlu0 %v515_v57, %s4510_s12  ;;  %v516_v59 = vmul.f32 %v515_v57, %v452_v41 }
 0xc7b   :  { %v519_v62 = vpop.permute.xlu0 %518 }
 0xc7c   :  { %v521_v63 = vmul.f32 %v519_v62, %v515_v57 }
 0xc7e   :  { %523 = vrot.lane.b32.xlu1 %v521_v63, %s4511_s13 }
 0xcf0   :  { %v524_v1 = vpop.permute.xlu1 %523 }
 0xcf1   :  { %v526_v3 = vadd.f32 %v524_v1, %v516_v59  ;;  %v4773_v1 = vld [vmem:[%s5614_s3 + $0x10] sm:$0xff]  }
 0xcf3   :  { %4364 = vtanh.f32 %v526_v3 }
 0xcfd   :  { %v4365_v4 = vpop.eup %4364 }
 0xcfe   :  { %529 = vrot.lane.b32.xlu0 %v4365_v4, %s4510_s12 }
 0xd70   :  { %v530_v7 = vpop.permute.xlu0 %529 }
 0xd71   :  { %v4708_v8 = vmul.f32 %v530_v7, %v515_v57 }
 0xd73   :  { %v538_v11 = vpack.c.bf16 %v4708_v8, %v4708_v8 }
 0xd75   :  { %540 = vrot.lane.b32.xlu1 %v538_v11, %s4511_s13 }
 0xde7   :  { %v541_v12 = vpop.permute.xlu1 %540 }
 0xde8   :  { %3984 = vmatmul.mubr.msk.bf16.vlgmr.msra.gmra.mrb[12].mxu1 %vm171_vm5, %v541_v12 }
 0xde9   :  { %3996 = vmatpush3.bf16.msra.mxu1 %v4561_v2  ;;  %3999 = vmatprep.mubr.msk.bf16.mxu1 %vm4507_vm0, %v4506_v0 }
 0xdea   :  { %3997 = vmatprep.subr.bf16.mxu1 %v4506_v0 }
 0xded   :  { %3998 = vmatpush3.bf16.msra.mxu1 %v4575_v5 }
 0xdee   :  { %4015 = vmatprep.subr.bf16.mxu1 %v4506_v0 }
 0xebb   :  { %v579_v15 = vpop.f32.mrb[12].mxu1 }
 0xebc   :  { %v585_v17 = vadd.f32 %v579_v15, %v144_v14  ;;  %v3985_v18 = vpop.f32.mrb[13].mxu1  ;;  %v152_v15 = vadd.f32 %v4650_v60, %v4595_v9 }
 0xebd   :  { %v582_v10 = vpop.f32.mrb[14].mxu1 }
 0xebe   :  { %v586_v19 = vmul.f32 %v585_v17, %v4602_v16  ;;  %v3986_v20 = vpop.f32.mrb[15].mxu1 }
 0xec0   :  { %4366 = vtanh.f32 %v586_v19 }
 0xeca   :  { %v4367_v2 = vpop.eup %4366 }
 0xecb   :  { %v588_v21 = vmul.f32 %v4367_v2, %v4602_v16  ;;  %v4808_v2 = vld [vmem:[%s5616_s4 + $0x1] ss:$0 sm:$0xff] }
 0xecd   :  { %v589_v22 = vadd.f32 %v588_v21, %v4605_v24 }
 0xecf   :  { %592 = vrot.lane.b32.xlu0 %v589_v22, %s4510_s12  ;;  %v590_v61 = vmul.f32 %v589_v22, %v526_v3  ;;  %v4781_v3 = vld [vmem:[%s5614_s3 + $0x18] sm:$0xff]  }
 0xf41   :  { %v593_v5 = vpop.permute.xlu0 %592 }
 0xf42   :  { %v595_v25 = vmul.f32 %v593_v5, %v589_v22 }
 0xf44   :  { %597 = vrot.lane.b32.xlu1 %v595_v25, %s4511_s13 }
 0xfb6   :  { %v598_v26 = vpop.permute.xlu1 %597 }
 0xfb7   :  { %v600_v27 = vadd.f32 %v598_v26, %v590_v61 }
 0xfb9   :  { %4368 = vtanh.f32 %v600_v27 }
 0xfc3   :  { %v4369_v28 = vpop.eup %4368 }
 0xfc4   :  { %603 = vrot.lane.b32.xlu0 %v4369_v28, %s4510_s12 }
0x1036   :  { %v604_v29 = vpop.permute.xlu0 %603 }
0x1037   :  { %v4728_v30 = vmul.f32 %v604_v29, %v589_v22 }
0x1039   :  { %v612_v31 = vpack.c.bf16 %v4728_v30, %v4728_v30 }
0x103b   :  { %614 = vrot.lane.b32.xlu1 %v612_v31, %s4511_s13 }
0x10ad   :  { %v615_v32 = vpop.permute.xlu1 %614 }
0x10ae   :  { %3992 = vmatmul.mubr.msk.bf16.vlgmr.msra.gmra.mrb[16].mxu0 %vm171_vm5, %v615_v32 }
0x10af   :  { %4004 = vmatpush3.bf16.msra.mxu0 %v4328_v50 }
0x1181   :  { %v653_v35 = vpop.f32.mrb[16].mxu0 }
0x1182   :  { %v659_v36 = vadd.f32 %v653_v35, %v149_v33  ;;  %v3993_v37 = vpop.f32.mrb[17].mxu0 }
0x1183   :  { %v656_v38 = vpop.f32.mrb[18].mxu0 }
0x1184   :  { %v660_v39 = vmul.f32 %v659_v36, %v4602_v16  ;;  %v3994_v13 = vpop.f32.mrb[19].mxu0 }
0x1186   :  { %4370 = vtanh.f32 %v660_v39 }
0x1190   :  { %v4371_v40 = vpop.eup %4370 }
0x1191   :  { %v662_v41 = vmul.f32 %v4371_v40, %v4602_v16 }
0x1193   :  { %v663_v42 = vadd.f32 %v662_v41, %v4605_v24 }
0x1195   :  { %666 = vrot.lane.b32.xlu0 %v663_v42, %s4510_s12  ;;  %v664_v58 = vmul.f32 %v663_v42, %v600_v27 }
0x1207   :  { %v667_v43 = vpop.permute.xlu0 %666 }
0x1208   :  { %v669_v45 = vmul.f32 %v667_v43, %v663_v42 }
0x120a   :  { %671 = vrot.lane.b32.xlu1 %v669_v45, %s4511_s13 }
0x120e   :  { %238 = vrot.lane.b32.xlu1 %v4612_v34, %s4511_s13  ;;  %v4329_v34 = vld [vmem:[%s5617_s2 + $0x8] sm:$0xff]  }
0x120f   :  { %4005 = vmatprep.subr.bf16.mxu0 %v4329_v34 }
0x1210   :  { %4006 = vmatpush3.bf16.msra.mxu0 %v4329_v34 }
0x1211   :  { %4031 = vmatprep.subr.bf16.mxu0 %v4506_v0 }
0x1212   :  { %386 = vrot.lane.b32.xlu1 %v4669_v23, %s4511_s13 }
0x127c   :  { %v672_v46 = vpop.permute.xlu1 %671 }
0x127d   :  { %v4745_v47 = vadd.f32 %v672_v46, %v664_v58 }
0x127f   :  { %4372 = vtanh.f32 %v4745_v47 }
0x1280   :  { %v239_v48 = vpop.permute.xlu1 %238 }
0x1281   :  { %241 = vst.msk [vmem:[#allocation2] sm:$0xff] %vm171_vm5, %v239_v48 }
0x1284   :  { %v387_v49 = vpop.permute.xlu1 %386 }
0x1285   :  { %389 = vst.msk [vmem:[#allocation2 + $0x10] sm:$0xff] %vm171_vm5, %v387_v49 }
0x1288   :  { %v760_v57 = vld [vmem:[#allocation2] sm:$0xff] }
0x1289   :  { %v4373_v23 = vpop.eup %4372 }
0x128a   :  { %677 = vrot.lane.b32.xlu0 %v4373_v23, %s4510_s12 }
0x128e   :  { %312 = vrot.lane.b32.xlu0 %v4641_v56, %s4511_s13 }
0x1292   :  { %460 = vrot.lane.b32.xlu0 %v4689_v44, %s4511_s13  ;;  %v762_v44 = vld [vmem:[#allocation2 + $0x10] sm:$0xff] }
0x12fc   :  { %v678_v51 = vpop.permute.xlu0 %677 }
0x12fd   :  { %v4762_v52 = vmul.f32 %v678_v51, %v663_v42 }
0x12ff   :  { %v686_v53 = vpack.c.bf16 %v4762_v52, %v4762_v52 }
0x1300   :  { %v313_v54 = vpop.permute.xlu0 %312 }
0x1301   :  { %315 = vst.msk [vmem:[#allocation2 + $0x8] sm:$0xff] %vm171_vm5, %v313_v54  ;;  %688 = vrot.lane.b32.xlu1 %v686_v53, %s4511_s13 }
0x1304   :  { %v461_v55 = vpop.permute.xlu0 %460 }
0x1305   :  { %463 = vst.msk [vmem:[#allocation2 + $0x18] sm:$0xff] %vm171_vm5, %v461_v55 }
0x1308   :  { %v761_v62 = vld [vmem:[#allocation2 + $0x8] sm:$0xff] }
0x1309   :  { %v768_v56 = vpack.c.bf16 %v761_v62, %v760_v57 }
0x130b   :  { %4007 = vmatprep.mubr.msk.bf16.mxu0 %vm171_vm5, %v768_v56 }
0x130c   :  { %v763_v63 = vld [vmem:[#allocation2 + $0x18] sm:$0xff] }
0x130d   :  { %v769_v59 = vpack.c.bf16 %v763_v63, %v762_v44 }
0x130f   :  { %4008 = vmatmul.mubr.msk.bf16.vlgmr.msra.gmra.mrb[20].mxu0 %vm171_vm5, %v769_v59 }
0x1310   :  { %4032 = vmatpush3.bf16.msra.mxu0 %v4773_v1 }
0x1311   :  { %4033 = vmatprep.subr.bf16.mxu0 %v4506_v0 }
0x1314   :  { %4034 = vmatpush3.bf16.msra.mxu0 %v4781_v3 }
0x1315   :  { %4047 = vmatprep.subr.bf16.mxu0 %v4506_v0 }
0x1373   :  { %v689_v4 = vpop.permute.xlu1 %688 }
0x1374   :  { %4000 = vmatmul.mubr.msk.bf16.vlgmr.msra.gmra.mrb[16].mxu1 %vm171_vm5, %v689_v4 }
0x1375   :  { %4016 = vmatpush3.bf16.msra.mxu1 %v4773_v1  ;;  %4019 = vmatprep.mubr.msk.bf16.mxu1 %vm4507_vm0, %v4506_v0 }
0x1376   :  { %4017 = vmatprep.subr.bf16.mxu1 %v4506_v0 }
0x1379   :  { %4018 = vmatpush3.bf16.msra.mxu1 %v4781_v3 }
0x137a   :  { %4023 = vmatprep.subr.bf16.mxu1 %v4506_v0 }
0x137c   :  { %4020 = vmatmul.mubr.bf16.vlgmr.msra.gmra.mrb[20].mxu1 %v4508_v6 }
0x137d   :  { %4024 = vmatpush3.bf16.msra.mxu1 %v4773_v1  ;;  %4027 = vmatprep.mubr.msk.bf16.mxu1 %vm4507_vm0, %v4506_v0 }
0x137e   :  { %4025 = vmatprep.subr.bf16.mxu1 %v4506_v0 }
0x1381   :  { %4026 = vmatpush3.bf16.msra.mxu1 %v4781_v3 }
0x1382   :  { %4039 = vmatprep.subr.bf16.mxu1 %v4506_v0 }
0x13e2   :  { %v4799_v7 = vpop.f32.mrb[20].mxu0 }
0x13e3   :  { %v842_v11 = vpop.f32.mrb[21].mxu0 }
0x13e4   :  { %v4801_v12 = vpop.f32.mrb[22].mxu0  ;;  %v843_v21 = vadd.f32 %v4808_v2, %v842_v11 }
0x13e5   :  { %v845_v14 = vpop.f32.mrb[23].mxu0 }
0x13e6   :  { %v846_v51 = vadd.f32 %v4808_v2, %v845_v14 }
0x1447   :  { %v727_v17 = vpop.f32.mrb[16].mxu1 }
0x1448   :  { %v733_v18 = vadd.f32 %v727_v17, %v152_v15  ;;  %v4001_v10 = vpop.f32.mrb[17].mxu1 }
0x1449   :  { %v730_v19 = vpop.f32.mrb[18].mxu1 }
0x144a   :  { %v4002_v20 = vpop.f32.mrb[19].mxu1  ;;  %v734_v32 = vmul.f32 %v733_v18, %v4602_v16 }
0x144f   :  { %v924_v22 = vpop.f32.mrb[20].mxu1 }
0x1450   :  { %v930_v5 = vadd.f32 %v924_v22, %v843_v21  ;;  %v4021_v25 = vpop.f32.mrb[21].mxu1 }
0x1451   :  { %v927_v61 = vpop.f32.mrb[22].mxu1 }
0x1452   :  { %v931_v26 = vmul.f32 %v930_v5, %v4602_v16  ;;  %v4022_v27 = vpop.f32.mrb[23].mxu1 }
0x1454   :  { %4374 = vtanh.f32 %v931_v26 }
0x1455   :  { %4376 = vtanh.f32 %v734_v32 }
0x145e   :  { %v4375_v9 = vpop.eup %4374 }
0x145f   :  { %v933_v60 = vmul.f32 %v4375_v9, %v4602_v16  ;;  %v4377_v37 = vpop.eup %4376 }
0x1460   :  { %v736_v38 = vmul.f32 %v4377_v37, %v4602_v16 }
0x1461   :  { %v934_v28 = vadd.f32 %v933_v60, %v4605_v24 }
0x1462   :  { %v737_v13 = vadd.f32 %v736_v38, %v4605_v24 }
0x1463   :  { %937 = vrot.lane.b32.xlu0 %v934_v28, %s4510_s12  ;;  %v935_v33 = vmul.f32 0.0, %v934_v28 }
0x1464   :  { %v738_v46 = vmul.f32 %v737_v13, %v4745_v47 }
0x14d5   :  { %v938_v29 = vpop.permute.xlu0 %937 }
0x14d6   :  { %v940_v31 = vmul.f32 %v938_v29, %v934_v28 }
0x14d8   :  { %942 = vrot.lane.b32.xlu1 %v940_v31, %s4511_s13  ;;  %v851_v31 = vadd.f32 %v4799_v7, %v4808_v2 }
0x154a   :  { %v943_v35 = vpop.permute.xlu1 %942 }
0x154b   :  { %v945_v36 = vadd.f32 %v943_v35, %v935_v33 }
0x154d   :  { %4378 = vtanh.f32 %v945_v36 }
0x1557   :  { %v4379_v39 = vpop.eup %4378 }
0x1558   :  { %948 = vrot.lane.b32.xlu0 %v4379_v39, %s4510_s12 }
0x155c   :  { %740 = vrot.lane.b32.xlu0 %v737_v13, %s4510_s12 }
0x15ca   :  { %v949_v40 = vpop.permute.xlu0 %948 }
0x15cb   :  { %v4821_v41 = vmul.f32 %v949_v40, %v934_v28 }
0x15cd   :  { %v957_v42 = vpack.c.bf16 %v4821_v41, %v4821_v41 }
0x15ce   :  { %v741_v43 = vpop.permute.xlu0 %740 }
0x15cf   :  { %v743_v45 = vmul.f32 %v741_v43, %v737_v13  ;;  %959 = vrot.lane.b32.xlu1 %v957_v42, %s4511_s13 }
0x15d1   :  { %745 = vrot.lane.b32.xlu0 %v743_v45, %s4511_s13 }
0x1641   :  { %v960_v58 = vpop.permute.xlu1 %959 }
0x1642   :  { %4028 = vmatmul.mubr.msk.bf16.vlgmr.msra.gmra.mrb[24].mxu1 %vm171_vm5, %v960_v58 }
0x1643   :  { %v746_v48 = vpop.permute.xlu0 %745  ;;  %4040 = vmatpush3.bf16.msra.mxu1 %v4773_v1  ;;  %4043 = vmatprep.mubr.msk.bf16.mxu1 %vm4507_vm0, %v4506_v0 }
0x1644   :  { %v748_v49 = vadd.f32 %v746_v48, %v738_v46  ;;  %4041 = vmatprep.subr.bf16.mxu1 %v4506_v0 }
0x1646   :  { %4380 = vtanh.f32 %v748_v49 }
0x1647   :  { %4042 = vmatpush3.bf16.msra.mxu1 %v4781_v3 }
0x1648   :  { %4055 = vmatprep.subr.bf16.mxu1 %v4506_v0 }
0x1650   :  { %v4381_v50 = vpop.eup %4380 }
0x1651   :  { %751 = vrot.lane.b32.xlu0 %v4381_v50, %s4510_s12 }
0x1655   :  { %534 = vrot.lane.b32.xlu0 %v4708_v8, %s4511_s13 }
0x1659   :  { %682 = vrot.lane.b32.xlu0 %v4762_v52, %s4511_s13 }
0x16c3   :  { %v752_v47 = vpop.permute.xlu0 %751 }
0x16c4   :  { %v754_v17 = vmul.f32 %v752_v47, %v737_v13 }
0x16c7   :  { %v535_v34 = vpop.permute.xlu0 %534 }
0x16c8   :  { %537 = vst.msk [vmem:[#allocation2 + $0x20] sm:$0xff] %vm171_vm5, %v535_v34  ;;  %v854_v34 = vadd.f32 %v4801_v12, %v4808_v2 }
0x16cb   :  { %v683_v23 = vpop.permute.xlu0 %682 }
0x16cc   :  { %685 = vst.msk [vmem:[#allocation2 + $0x30] sm:$0xff] %vm171_vm5, %v683_v23 }
0x16cf   :  { %v764_v22 = vld [vmem:[#allocation2 + $0x20] sm:$0xff] }
0x16d3   :  { %v766_v25 = vld [vmem:[#allocation2 + $0x30] sm:$0xff] }
0x1715   :  { %v998_v53 = vpop.f32.mrb[24].mxu1 }
0x1716   :  { %v1004_v54 = vadd.f32 %v998_v53, %v846_v51  ;;  %v4029_v55 = vpop.f32.mrb[25].mxu1 }
0x1717   :  { %v1001_v57 = vpop.f32.mrb[26].mxu1 }
0x1718   :  { %v1005_v62 = vmul.f32 %v1004_v54, %v4602_v16  ;;  %v4030_v56 = vpop.f32.mrb[27].mxu1 }
0x171a   :  { %4382 = vtanh.f32 %v1005_v62 }
0x1724   :  { %v4383_v8 = vpop.eup %4382 }
0x1725   :  { %v1007_v52 = vmul.f32 %v4383_v8, %v4602_v16 }
0x1727   :  { %v1008_v44 = vadd.f32 %v1007_v52, %v4605_v24 }
0x1729   :  { %1011 = vrot.lane.b32.xlu1 %v1008_v44, %s4510_s12  ;;  %v1009_v4 = vmul.f32 %v1008_v44, %v945_v36 }
0x179b   :  { %v1012_v63 = vpop.permute.xlu1 %1011 }
0x179c   :  { %v1014_v59 = vmul.f32 %v1012_v63, %v1008_v44 }
0x179e   :  { %1016 = vrot.lane.b32.xlu1 %v1014_v59, %s4511_s13 }
0x1810   :  { %v1017_v11 = vpop.permute.xlu1 %1016 }
0x1811   :  { %v1019_v14 = vadd.f32 %v1017_v11, %v1009_v4 }
0x1813   :  { %4384 = vtanh.f32 %v1019_v14 }
0x181d   :  { %v4385_v15 = vpop.eup %4384 }
0x181e   :  { %1022 = vrot.lane.b32.xlu1 %v4385_v15, %s4510_s12 }
0x1822   :  { %608 = vrot.lane.b32.xlu1 %v4728_v30, %s4511_s13 }
0x1826   :  { %756 = vrot.lane.b32.xlu1 %v754_v17, %s4511_s13 }
0x1890   :  { %v1023_v18 = vpop.permute.xlu1 %1022 }
0x1891   :  { %v4852_v10 = vmul.f32 %v1023_v18, %v1008_v44 }
0x1893   :  { %v1031_v19 = vpack.c.bf16 %v4852_v10, %v4852_v10 }
0x1894   :  { %v609_v20 = vpop.permute.xlu1 %608 }
0x1895   :  { %611 = vst.msk [vmem:[#allocation2 + $0x28] sm:$0xff] %vm171_vm5, %v609_v20  ;;  %1033 = vrot.lane.b32.xlu0 %v1031_v19, %s4511_s13 }
0x1898   :  { %v757_v21 = vpop.permute.xlu1 %756 }
0x1899   :  { %759 = vst.msk [vmem:[#allocation2 + $0x38] sm:$0xff] %vm171_vm5, %v757_v21 }
0x189c   :  { %v765_v5 = vld [vmem:[#allocation2 + $0x28] sm:$0xff] }
0x189d   :  { %v770_v30 = vpack.c.bf16 %v765_v5, %v764_v22 }
0x189f   :  { %4011 = vmatprep.mubr.msk.bf16.mxu0 %vm171_vm5, %v770_v30 }
0x18a0   :  { %v767_v61 = vld [vmem:[#allocation2 + $0x38] sm:$0xff] }
0x18a1   :  { %v771_v26 = vpack.c.bf16 %v767_v61, %v766_v25 }
0x18a3   :  { %4012 = vmatmul.mubr.msk.bf16.gmra.mrb[24].mxu0 %vm171_vm5, %v771_v26 }
0x18a4   :  { %4035 = vmatprep.mubr.msk.bf16.mxu0 %vm4507_vm0, %v4506_v0 }
0x1907   :  { %v1034_v27 = vpop.permute.xlu0 %1033 }
0x1908   :  { %4036 = vmatmul.mubr.msk.bf16.vlgmr.msra.gmra.mrb[28].mxu0 %vm171_vm5, %v1034_v27 }
0x1909   :  { %4048 = vmatpush3.bf16.msra.mxu0 %v4773_v1  ;;  %4051 = vmatprep.mubr.msk.bf16.mxu0 %vm4507_vm0, %v4506_v0 }
0x190a   :  { %4049 = vmatprep.subr.bf16.mxu0 %v4506_v0 }
0x190d   :  { %4050 = vmatpush3.bf16.msra.mxu0 %v4781_v3 }
0x190e   :  { %4063 = vmatprep.subr.bf16.mxu0 %v4506_v0 }
0x1976   :  { %v4870_v9 = vpop.f32.mrb[24].mxu0 }
0x1977   :  { %v4872_v60 = vpop.f32.mrb[25].mxu0 }
0x1978   :  { %v4874_v28 = vpop.f32.mrb[26].mxu0  ;;  %v859_v18 = vadd.f32 %v4808_v2, %v4872_v60 }
0x1979   :  { %v4876_v29 = vpop.f32.mrb[27].mxu0 }
0x19db   :  { %v1072_v32 = vpop.f32.mrb[28].mxu0 }
0x19dc   :  { %v1078_v33 = vadd.f32 %v1072_v32, %v851_v31  ;;  %v4037_v35 = vpop.f32.mrb[29].mxu0 }
0x19dd   :  { %v1075_v36 = vpop.f32.mrb[30].mxu0 }
0x19de   :  { %v1079_v37 = vmul.f32 %v1078_v33, %v4602_v16  ;;  %v4038_v38 = vpop.f32.mrb[31].mxu0 }
0x19e0   :  { %4386 = vtanh.f32 %v1079_v37 }
0x19ea   :  { %v4387_v39 = vpop.eup %4386 }
0x19eb   :  { %v1081_v13 = vmul.f32 %v4387_v39, %v4602_v16 }
0x19ed   :  { %v1082_v40 = vadd.f32 %v1081_v13, %v4605_v24  ;;  %v862_v13 = vadd.f32 %v4808_v2, %v4876_v29 }
0x19ef   :  { %1085 = vrot.lane.b32.xlu1 %v1082_v40, %s4510_s12  ;;  %v1083_v7 = vmul.f32 %v1082_v40, %v1019_v14 }
0x1a61   :  { %v1086_v42 = vpop.permute.xlu1 %1085 }
0x1a62   :  { %v1088_v43 = vmul.f32 %v1086_v42, %v1082_v40 }
0x1a64   :  { %1090 = vrot.lane.b32.xlu0 %v1088_v43, %s4511_s13 }
0x1ad6   :  { %v1091_v45 = vpop.permute.xlu0 %1090 }
0x1ad7   :  { %v1093_v58 = vadd.f32 %v1091_v45, %v1083_v7 }
0x1ad9   :  { %4388 = vtanh.f32 %v1093_v58 }
0x1ae3   :  { %v4389_v46 = vpop.eup %4388 }
0x1ae4   :  { %1096 = vrot.lane.b32.xlu1 %v4389_v46, %s4510_s12 }
0x1b56   :  { %v1097_v48 = vpop.permute.xlu1 %1096 }
0x1b57   :  { %v4886_v49 = vmul.f32 %v1097_v48, %v1082_v40 }
0x1b59   :  { %v1105_v50 = vpack.c.bf16 %v4886_v49, %v4886_v49 }
0x1b5b   :  { %1107 = vrot.lane.b32.xlu0 %v1105_v50, %s4511_s13 }
0x1bcd   :  { %v1108_v47 = vpop.permute.xlu0 %1107 }
0x1bce   :  { %4044 = vmatmul.mubr.msk.bf16.vlgmr.msra.gmra.mrb[28].mxu1 %vm171_vm5, %v1108_v47 }
0x1bcf   :  { %4056 = vmatpush3.bf16.msra.mxu1 %v4773_v1  ;;  %4059 = vmatprep.mubr.msk.bf16.mxu1 %vm4507_vm0, %v4506_v0 }
0x1bd0   :  { %4057 = vmatprep.subr.bf16.mxu1 %v4506_v0 }
0x1bd3   :  { %4058 = vmatpush3.bf16.msra.mxu1 %v4781_v3 }
0x1bd4   :  { %4071 = vmatprep.subr.bf16.mxu1 %v4506_v0 }
0x1ca1   :  { %v1146_v23 = vpop.f32.mrb[28].mxu1 }
0x1ca2   :  { %v1152_v51 = vadd.f32 %v1146_v23, %v854_v34  ;;  %v4045_v53 = vpop.f32.mrb[29].mxu1 }
0x1ca3   :  { %v1149_v54 = vpop.f32.mrb[30].mxu1 }
0x1ca4   :  { %v1153_v55 = vmul.f32 %v1152_v51, %v4602_v16  ;;  %v4046_v57 = vpop.f32.mrb[31].mxu1 }
0x1ca5   :  { %v867_v57 = vadd.f32 %v4870_v9, %v4808_v2 }
0x1ca6   :  { %4390 = vtanh.f32 %v1153_v55 }
0x1cb0   :  { %v4391_v62 = vpop.eup %4390 }
0x1cb1   :  { %v1155_v56 = vmul.f32 %v4391_v62, %v4602_v16 }
0x1cb3   :  { %v1156_v8 = vadd.f32 %v1155_v56, %v4605_v24 }
0x1cb5   :  { %1159 = vrot.lane.b32.xlu1 %v1156_v8, %s4510_s12  ;;  %v1157_v12 = vmul.f32 %v1156_v8, %v1093_v58 }
0x1d27   :  { %v1160_v52 = vpop.permute.xlu1 %1159 }
0x1d28   :  { %v1162_v44 = vmul.f32 %v1160_v52, %v1156_v8 }
0x1d2a   :  { %1164 = vrot.lane.b32.xlu0 %v1162_v44, %s4511_s13 }
0x1d9c   :  { %v1165_v63 = vpop.permute.xlu0 %1164 }
0x1d9d   :  { %v1167_v59 = vadd.f32 %v1165_v63, %v1157_v12 }
0x1d9f   :  { %4392 = vtanh.f32 %v1167_v59 }
0x1da9   :  { %v4393_v4 = vpop.eup %4392 }
0x1daa   :  { %1170 = vrot.lane.b32.xlu1 %v4393_v4, %s4510_s12 }
0x1e1c   :  { %v1171_v11 = vpop.permute.xlu1 %1170 }
0x1e1d   :  { %v4906_v14 = vmul.f32 %v1171_v11, %v1156_v8 }
0x1e1f   :  { %v1179_v15 = vpack.c.bf16 %v4906_v14, %v4906_v14 }
0x1e21   :  { %1181 = vrot.lane.b32.xlu0 %v1179_v15, %s4511_s13 }
0x1e93   :  { %v1182_v17 = vpop.permute.xlu0 %1181 }
0x1e94   :  { %4052 = vmatmul.mubr.msk.bf16.vlgmr.msra.gmra.mrb[32].mxu0 %vm171_vm5, %v1182_v17 }
0x1e95   :  { %4064 = vmatpush3.bf16.msra.mxu0 %v4773_v1  ;;  %4067 = vmatprep.mubr.msk.bf16.mxu0 %vm4507_vm0, %v4506_v0 }
0x1e96   :  { %4065 = vmatprep.subr.bf16.mxu0 %v4506_v0 }
0x1e99   :  { %4066 = vmatpush3.bf16.msra.mxu0 %v4781_v3 }
0x1f67   :  { %v1220_v19 = vpop.f32.mrb[32].mxu0 }
0x1f68   :  { %v1226_v20 = vadd.f32 %v1220_v19, %v859_v18  ;;  %v4053_v21 = vpop.f32.mrb[33].mxu0 }
0x1f69   :  { %v1223_v22 = vpop.f32.mrb[34].mxu0  ;;  %v4332_v21 = vld [vmem:[%s5617_s2 + $0x10] sm:$0xff]  }
0x1f6a   :  { %v1227_v5 = vmul.f32 %v1226_v20, %v4602_v16  ;;  %v4054_v30 = vpop.f32.mrb[35].mxu0  ;;  %4079 = vmatprep.subr.bf16.mxu0 %v4332_v21 }
0x1f6c   :  { %4394 = vtanh.f32 %v1227_v5 }
0x1f76   :  { %v4395_v25 = vpop.eup %4394 }
0x1f77   :  { %v1229_v61 = vmul.f32 %v4395_v25, %v4602_v16 }
0x1f79   :  { %v1230_v26 = vadd.f32 %v1229_v61, %v4605_v24 }
0x1f7b   :  { %1233 = vrot.lane.b32.xlu1 %v1230_v26, %s4510_s12  ;;  %v1231_v60 = vmul.f32 %v1230_v26, %v1167_v59 }
0x1fed   :  { %v1234_v27 = vpop.permute.xlu1 %1233 }
0x1fee   :  { %v1236_v31 = vmul.f32 %v1234_v27, %v1230_v26 }
0x1ff0   :  { %1238 = vrot.lane.b32.xlu0 %v1236_v31, %s4511_s13 }
0x2062   :  { %v1239_v32 = vpop.permute.xlu0 %1238 }
0x2063   :  { %v1241_v33 = vadd.f32 %v1239_v32, %v1231_v60  ;;  %v4990_v32 = vld [vmem:[%s5614_s3 + $0x20] sm:$0xff]  }
0x2065   :  { %4396 = vtanh.f32 %v1241_v33 }
0x206f   :  { %v4397_v35 = vpop.eup %4396 }
0x2070   :  { %1244 = vrot.lane.b32.xlu1 %v4397_v35, %s4510_s12 }
0x20e2   :  { %v1245_v36 = vpop.permute.xlu1 %1244 }
0x20e3   :  { %v4925_v37 = vmul.f32 %v1245_v36, %v1230_v26 }
0x20e5   :  { %v1253_v38 = vpack.c.bf16 %v4925_v37, %v4925_v37 }
0x20e7   :  { %1255 = vrot.lane.b32.xlu0 %v1253_v38, %s4511_s13 }
0x2159   :  { %v1256_v39 = vpop.permute.xlu0 %1255 }
0x215a   :  { %4060 = vmatmul.mubr.msk.bf16.vlgmr.msra.gmra.mrb[32].mxu1 %vm171_vm5, %v1256_v39 }
0x215b   :  { %4072 = vmatpush3.bf16.msra.mxu1 %v4773_v1  ;;  %4075 = vmatprep.mubr.msk.bf16.mxu1 %vm4507_vm0, %v4506_v0 }
0x215c   :  { %4073 = vmatprep.subr.bf16.mxu1 %v4506_v0 }
0x215f   :  { %4074 = vmatpush3.bf16.msra.mxu1 %v4781_v3 }
0x2160   :  { %4091 = vmatprep.subr.bf16.mxu1 %v4506_v0 }
0x222d   :  { %v1294_v40 = vpop.f32.mrb[32].mxu1 }
0x222e   :  { %v1300_v42 = vadd.f32 %v1294_v40, %v862_v13  ;;  %v4061_v43 = vpop.f32.mrb[33].mxu1  ;;  %v870_v40 = vadd.f32 %v4874_v28, %v4808_v2 }
0x222f   :  { %v1297_v7 = vpop.f32.mrb[34].mxu1 }
0x2230   :  { %v1301_v45 = vmul.f32 %v1300_v42, %v4602_v16  ;;  %v4062_v58 = vpop.f32.mrb[35].mxu1 }
0x2232   :  { %4398 = vtanh.f32 %v1301_v45 }
0x223c   :  { %v4399_v1 = vpop.eup %4398 }
0x223d   :  { %v1303_v46 = vmul.f32 %v4399_v1, %v4602_v16  ;;  %v5025_v1 = vld [vmem:[%s5616_s4 + $0x2] ss:$0 sm:$0xff] }
0x223f   :  { %v1304_v48 = vadd.f32 %v1303_v46, %v4605_v24 }
0x2241   :  { %1307 = vrot.lane.b32.xlu1 %v1304_v48, %s4510_s12  ;;  %v1305_v29 = vmul.f32 %v1304_v48, %v1241_v33  ;;  %v4998_v33 = vld [vmem:[%s5614_s3 + $0x28] sm:$0xff]  }
0x22b3   :  { %v1308_v3 = vpop.permute.xlu1 %1307 }
0x22b4   :  { %v1310_v50 = vmul.f32 %v1308_v3, %v1304_v48 }
0x22b6   :  { %1312 = vrot.lane.b32.xlu0 %v1310_v50, %s4511_s13 }
0x2328   :  { %v1313_v47 = vpop.permute.xlu0 %1312 }
0x2329   :  { %v1315_v34 = vadd.f32 %v1313_v47, %v1305_v29 }
0x232b   :  { %4400 = vtanh.f32 %v1315_v34 }
0x2335   :  { %v4401_v23 = vpop.eup %4400 }
0x2336   :  { %1318 = vrot.lane.b32.xlu1 %v4401_v23, %s4510_s12 }
0x23a8   :  { %v1319_v51 = vpop.permute.xlu1 %1318 }
0x23a9   :  { %v4945_v53 = vmul.f32 %v1319_v51, %v1304_v48 }
0x23ab   :  { %v1327_v54 = vpack.c.bf16 %v4945_v53, %v4945_v53 }
0x23ad   :  { %1329 = vrot.lane.b32.xlu0 %v1327_v54, %s4511_s13 }
0x241f   :  { %v1330_v55 = vpop.permute.xlu0 %1329 }
0x2420   :  { %4068 = vmatmul.mubr.msk.bf16.vlgmr.msra.gmra.mrb[36].mxu0 %vm171_vm5, %v1330_v55 }
0x2421   :  { %4080 = vmatpush3.bf16.msra.mxu0 %v4332_v21 }
0x24f3   :  { %v1368_v62 = vpop.f32.mrb[36].mxu0 }
0x24f4   :  { %v1374_v56 = vadd.f32 %v1368_v62, %v867_v57  ;;  %v4069_v8 = vpop.f32.mrb[37].mxu0 }
0x24f5   :  { %v1371_v52 = vpop.f32.mrb[38].mxu0 }
0x24f6   :  { %v1375_v44 = vmul.f32 %v1374_v56, %v4602_v16  ;;  %v4070_v12 = vpop.f32.mrb[39].mxu0 }
0x24f8   :  { %4402 = vtanh.f32 %v1375_v44 }
0x2502   :  { %v4403_v63 = vpop.eup %4402 }
0x2503   :  { %v1377_v59 = vmul.f32 %v4403_v63, %v4602_v16 }
0x2505   :  { %v1378_v4 = vadd.f32 %v1377_v59, %v4605_v24 }
0x2507   :  { %1381 = vrot.lane.b32.xlu1 %v1378_v4, %s4510_s12  ;;  %v1379_v9 = vmul.f32 %v1378_v4, %v1315_v34 }
0x2579   :  { %v1382_v11 = vpop.permute.xlu1 %1381 }
0x257a   :  { %v1384_v15 = vmul.f32 %v1382_v11, %v1378_v4 }
0x257c   :  { %1386 = vrot.lane.b32.xlu0 %v1384_v15, %s4511_s13 }
0x2580   :  { %953 = vrot.lane.b32.xlu0 %v4821_v41, %s4511_s13  ;;  %v4333_v41 = vld [vmem:[%s5617_s2 + $0x18] sm:$0xff]  }
0x2581   :  { %4081 = vmatprep.subr.bf16.mxu0 %v4333_v41 }
0x2582   :  { %4082 = vmatpush3.bf16.msra.mxu0 %v4333_v41 }
0x2583   :  { %4107 = vmatprep.subr.bf16.mxu0 %v4506_v0 }
0x2584   :  { %1101 = vrot.lane.b32.xlu0 %v4886_v49, %s4511_s13 }
0x25ee   :  { %v1387_v17 = vpop.permute.xlu0 %1386 }
0x25ef   :  { %v4962_v18 = vadd.f32 %v1387_v17, %v1379_v9 }
0x25f1   :  { %4404 = vtanh.f32 %v4962_v18 }
0x25f2   :  { %v954_v19 = vpop.permute.xlu0 %953 }
0x25f3   :  { %956 = vst.msk [vmem:[#allocation2] sm:$0xff] %vm171_vm5, %v954_v19 }
0x25f6   :  { %v1102_v20 = vpop.permute.xlu0 %1101 }
0x25f7   :  { %1104 = vst.msk [vmem:[#allocation2 + $0x10] sm:$0xff] %vm171_vm5, %v1102_v20 }
0x25fa   :  { %v1475_v26 = vld [vmem:[#allocation2] sm:$0xff] }
0x25fb   :  { %v4405_v49 = vpop.eup %4404 }
0x25fc   :  { %1392 = vrot.lane.b32.xlu1 %v4405_v49, %s4510_s12 }
0x2600   :  { %1027 = vrot.lane.b32.xlu1 %v4852_v10, %s4511_s13 }
0x2604   :  { %1175 = vrot.lane.b32.xlu1 %v4906_v14, %s4511_s13  ;;  %v1477_v14 = vld [vmem:[#allocation2 + $0x10] sm:$0xff] }
0x266e   :  { %v1393_v22 = vpop.permute.xlu1 %1392 }
0x266f   :  { %v4979_v5 = vmul.f32 %v1393_v22, %v1378_v4 }
0x2671   :  { %v1401_v30 = vpack.c.bf16 %v4979_v5, %v4979_v5 }
0x2672   :  { %v1028_v25 = vpop.permute.xlu1 %1027 }
0x2673   :  { %1030 = vst.msk [vmem:[#allocation2 + $0x8] sm:$0xff] %vm171_vm5, %v1028_v25  ;;  %1403 = vrot.lane.b32.xlu0 %v1401_v30, %s4511_s13 }
0x2676   :  { %v1176_v61 = vpop.permute.xlu1 %1175 }
0x2677   :  { %1178 = vst.msk [vmem:[#allocation2 + $0x18] sm:$0xff] %vm171_vm5, %v1176_v61 }
0x267a   :  { %v1476_v27 = vld [vmem:[#allocation2 + $0x8] sm:$0xff] }
0x267b   :  { %v1483_v10 = vpack.c.bf16 %v1476_v27, %v1475_v26 }
0x267d   :  { %4083 = vmatprep.mubr.msk.bf16.mxu0 %vm171_vm5, %v1483_v10 }
0x267e   :  { %v1478_v31 = vld [vmem:[#allocation2 + $0x18] sm:$0xff] }
0x267f   :  { %v1484_v60 = vpack.c.bf16 %v1478_v31, %v1477_v14 }
0x2681   :  { %4084 = vmatmul.mubr.msk.bf16.vlgmr.msra.gmra.mrb[40].mxu0 %vm171_vm5, %v1484_v60 }
0x2682   :  { %4108 = vmatpush3.bf16.msra.mxu0 %v4990_v32 }
0x2683   :  { %4109 = vmatprep.subr.bf16.mxu0 %v4506_v0 }
0x2686   :  { %4110 = vmatpush3.bf16.msra.mxu0 %v4998_v33 }
0x2687   :  { %4123 = vmatprep.subr.bf16.mxu0 %v4506_v0 }
0x26e5   :  { %v1404_v35 = vpop.permute.xlu0 %1403 }
0x26e6   :  { %4076 = vmatmul.mubr.msk.bf16.vlgmr.msra.gmra.mrb[36].mxu1 %vm171_vm5, %v1404_v35 }
0x26e7   :  { %4092 = vmatpush3.bf16.msra.mxu1 %v4990_v32  ;;  %4095 = vmatprep.mubr.msk.bf16.mxu1 %vm4507_vm0, %v4506_v0 }
0x26e8   :  { %4093 = vmatprep.subr.bf16.mxu1 %v4506_v0 }
0x26eb   :  { %4094 = vmatpush3.bf16.msra.mxu1 %v4998_v33 }
0x26ec   :  { %4099 = vmatprep.subr.bf16.mxu1 %v4506_v0 }
0x26ee   :  { %4096 = vmatmul.mubr.bf16.vlgmr.msra.gmra.mrb[40].mxu1 %v4508_v6 }
0x26ef   :  { %4100 = vmatpush3.bf16.msra.mxu1 %v4990_v32  ;;  %4103 = vmatprep.mubr.msk.bf16.mxu1 %vm4507_vm0, %v4506_v0 }
0x26f0   :  { %4101 = vmatprep.subr.bf16.mxu1 %v4506_v0 }
0x26f3   :  { %4102 = vmatpush3.bf16.msra.mxu1 %v4998_v33 }
0x26f4   :  { %4115 = vmatprep.subr.bf16.mxu1 %v4506_v0 }
0x2754   :  { %v5016_v36 = vpop.f32.mrb[40].mxu0 }
0x2755   :  { %v1558_v38 = vpop.f32.mrb[41].mxu0 }
0x2756   :  { %v5018_v39 = vpop.f32.mrb[42].mxu0  ;;  %v1559_v46 = vadd.f32 %v5025_v1, %v1558_v38 }
0x2757   :  { %v1561_v13 = vpop.f32.mrb[43].mxu0 }
0x2758   :  { %v1562_v22 = vadd.f32 %v5025_v1, %v1561_v13 }
0x27b9   :  { %v1442_v42 = vpop.f32.mrb[36].mxu1 }
0x27ba   :  { %v1448_v43 = vadd.f32 %v1442_v42, %v870_v40  ;;  %v4077_v7 = vpop.f32.mrb[37].mxu1 }
0x27bb   :  { %v1445_v45 = vpop.f32.mrb[38].mxu1 }
0x27bc   :  { %v4078_v58 = vpop.f32.mrb[39].mxu1  ;;  %v1449_v55 = vmul.f32 %v1448_v43, %v4602_v16 }
0x27c1   :  { %v1640_v48 = vpop.f32.mrb[40].mxu1 }
0x27c2   :  { %v1646_v3 = vadd.f32 %v1640_v48, %v1559_v46  ;;  %v4097_v50 = vpop.f32.mrb[41].mxu1 }
0x27c3   :  { %v1643_v29 = vpop.f32.mrb[42].mxu1 }
0x27c4   :  { %v1647_v47 = vmul.f32 %v1646_v3, %v4602_v16  ;;  %v4098_v34 = vpop.f32.mrb[43].mxu1 }
0x27c6   :  { %4406 = vtanh.f32 %v1647_v47 }
0x27c7   :  { %4408 = vtanh.f32 %v1449_v55 }
0x27d0   :  { %v4407_v2 = vpop.eup %4406 }
0x27d1   :  { %v1649_v28 = vmul.f32 %v4407_v2, %v4602_v16  ;;  %v4409_v8 = vpop.eup %4408 }
0x27d2   :  { %v1451_v52 = vmul.f32 %v4409_v8, %v4602_v16 }
0x27d3   :  { %v1650_v23 = vadd.f32 %v1649_v28, %v4605_v24 }
0x27d4   :  { %v1452_v12 = vadd.f32 %v1451_v52, %v4605_v24 }
0x27d5   :  { %1653 = vrot.lane.b32.xlu1 %v1650_v23, %s4510_s12  ;;  %v1651_v57 = vmul.f32 0.0, %v1650_v23 }
0x27d6   :  { %v1453_v17 = vmul.f32 %v1452_v12, %v4962_v18 }
0x2847   :  { %v1654_v51 = vpop.permute.xlu1 %1653 }
0x2848   :  { %v1656_v54 = vmul.f32 %v1654_v51, %v1650_v23 }
0x284a   :  { %1658 = vrot.lane.b32.xlu0 %v1656_v54, %s4511_s13  ;;  %v1567_v54 = vadd.f32 %v5016_v36, %v5025_v1 }
0x28bc   :  { %v1659_v62 = vpop.permute.xlu0 %1658 }
0x28bd   :  { %v1661_v56 = vadd.f32 %v1659_v62, %v1651_v57 }
0x28bf   :  { %4410 = vtanh.f32 %v1661_v56 }
0x28c9   :  { %v4411_v44 = vpop.eup %4410 }
0x28ca   :  { %1664 = vrot.lane.b32.xlu1 %v4411_v44, %s4510_s12 }
0x28ce   :  { %1455 = vrot.lane.b32.xlu1 %v1452_v12, %s4510_s12 }
0x293c   :  { %v1665_v63 = vpop.permute.xlu1 %1664 }
0x293d   :  { %v5038_v59 = vmul.f32 %v1665_v63, %v1650_v23 }
0x293f   :  { %v1673_v4 = vpack.c.bf16 %v5038_v59, %v5038_v59 }
0x2940   :  { %v1456_v11 = vpop.permute.xlu1 %1455 }
0x2941   :  { %v1458_v15 = vmul.f32 %v1456_v11, %v1452_v12  ;;  %1675 = vrot.lane.b32.xlu0 %v1673_v4, %s4511_s13 }
0x2943   :  { %1460 = vrot.lane.b32.xlu1 %v1458_v15, %s4511_s13 }
0x29b3   :  { %v1676_v9 = vpop.permute.xlu0 %1675 }
0x29b4   :  { %4104 = vmatmul.mubr.msk.bf16.vlgmr.msra.gmra.mrb[44].mxu1 %vm171_vm5, %v1676_v9 }
0x29b5   :  { %v1461_v19 = vpop.permute.xlu1 %1460  ;;  %4116 = vmatpush3.bf16.msra.mxu1 %v4990_v32  ;;  %4119 = vmatprep.mubr.msk.bf16.mxu1 %vm4507_vm0, %v4506_v0 }
0x29b6   :  { %v1463_v20 = vadd.f32 %v1461_v19, %v1453_v17  ;;  %4117 = vmatprep.subr.bf16.mxu1 %v4506_v0 }
0x29b8   :  { %4412 = vtanh.f32 %v1463_v20 }
0x29b9   :  { %4118 = vmatpush3.bf16.msra.mxu1 %v4998_v33 }
0x29ba   :  { %4131 = vmatprep.subr.bf16.mxu1 %v4506_v0 }
0x29c2   :  { %v4413_v21 = vpop.eup %4412 }
0x29c3   :  { %1466 = vrot.lane.b32.xlu1 %v4413_v21, %s4510_s12 }
0x29c7   :  { %1249 = vrot.lane.b32.xlu1 %v4925_v37, %s4511_s13 }
0x29cb   :  { %1397 = vrot.lane.b32.xlu1 %v4979_v5, %s4511_s13 }
0x2a35   :  { %v1467_v18 = vpop.permute.xlu1 %1466 }
0x2a36   :  { %v1469_v42 = vmul.f32 %v1467_v18, %v1452_v12 }
0x2a39   :  { %v1250_v41 = vpop.permute.xlu1 %1249 }
0x2a3a   :  { %1252 = vst.msk [vmem:[#allocation2 + $0x20] sm:$0xff] %vm171_vm5, %v1250_v41  ;;  %v1570_v41 = vadd.f32 %v5018_v39, %v5025_v1 }
0x2a3d   :  { %v1398_v49 = vpop.permute.xlu1 %1397 }
0x2a3e   :  { %1400 = vst.msk [vmem:[#allocation2 + $0x30] sm:$0xff] %vm171_vm5, %v1398_v49 }
0x2a41   :  { %v1479_v48 = vld [vmem:[#allocation2 + $0x20] sm:$0xff] }
0x2a45   :  { %v1481_v50 = vld [vmem:[#allocation2 + $0x30] sm:$0xff] }
0x2a87   :  { %v1714_v30 = vpop.f32.mrb[44].mxu1 }
0x2a88   :  { %v1720_v25 = vadd.f32 %v1714_v30, %v1562_v22  ;;  %v4105_v61 = vpop.f32.mrb[45].mxu1 }
0x2a89   :  { %v1717_v26 = vpop.f32.mrb[46].mxu1 }
0x2a8a   :  { %v1721_v27 = vmul.f32 %v1720_v25, %v4602_v16  ;;  %v4106_v10 = vpop.f32.mrb[47].mxu1 }
0x2a8c   :  { %4414 = vtanh.f32 %v1721_v27 }
0x2a96   :  { %v4415_v37 = vpop.eup %4414 }
0x2a97   :  { %v1723_v5 = vmul.f32 %v4415_v37, %v4602_v16 }
0x2a99   :  { %v1724_v14 = vadd.f32 %v1723_v5, %v4605_v24 }
0x2a9b   :  { %1727 = vrot.lane.b32.xlu0 %v1724_v14, %s4510_s12  ;;  %v1725_v35 = vmul.f32 %v1724_v14, %v1661_v56 }
0x2b0d   :  { %v1728_v31 = vpop.permute.xlu0 %1727 }
0x2b0e   :  { %v1730_v60 = vmul.f32 %v1728_v31, %v1724_v14 }
0x2b10   :  { %1732 = vrot.lane.b32.xlu0 %v1730_v60, %s4511_s13 }
0x2b82   :  { %v1733_v38 = vpop.permute.xlu0 %1732 }
0x2b83   :  { %v1735_v13 = vadd.f32 %v1733_v38, %v1725_v35 }
0x2b85   :  { %4416 = vtanh.f32 %v1735_v13 }
0x2b8f   :  { %v4417_v40 = vpop.eup %4416 }
0x2b90   :  { %1738 = vrot.lane.b32.xlu0 %v4417_v40, %s4510_s12 }
0x2b94   :  { %1323 = vrot.lane.b32.xlu0 %v4945_v53, %s4511_s13 }
0x2b98   :  { %1471 = vrot.lane.b32.xlu0 %v1469_v42, %s4511_s13 }
0x2c02   :  { %v1739_v43 = vpop.permute.xlu0 %1738 }
0x2c03   :  { %v5069_v7 = vmul.f32 %v1739_v43, %v1724_v14 }
0x2c05   :  { %v1747_v45 = vpack.c.bf16 %v5069_v7, %v5069_v7 }
0x2c06   :  { %v1324_v58 = vpop.permute.xlu0 %1323 }
0x2c07   :  { %1326 = vst.msk [vmem:[#allocation2 + $0x28] sm:$0xff] %vm171_vm5, %v1324_v58  ;;  %1749 = vrot.lane.b32.xlu1 %v1747_v45, %s4511_s13 }
0x2c0a   :  { %v1472_v46 = vpop.permute.xlu0 %1471 }
0x2c0b   :  { %1474 = vst.msk [vmem:[#allocation2 + $0x38] sm:$0xff] %vm171_vm5, %v1472_v46 }
0x2c0e   :  { %v1480_v3 = vld [vmem:[#allocation2 + $0x28] sm:$0xff] }
0x2c0f   :  { %v1485_v53 = vpack.c.bf16 %v1480_v3, %v1479_v48 }
0x2c11   :  { %4087 = vmatprep.mubr.msk.bf16.mxu0 %vm171_vm5, %v1485_v53 }
0x2c12   :  { %v1482_v29 = vld [vmem:[#allocation2 + $0x38] sm:$0xff] }
0x2c13   :  { %v1486_v47 = vpack.c.bf16 %v1482_v29, %v1481_v50 }
0x2c15   :  { %4088 = vmatmul.mubr.msk.bf16.gmra.mrb[44].mxu0 %vm171_vm5, %v1486_v47 }
0x2c16   :  { %4111 = vmatprep.mubr.msk.bf16.mxu0 %vm4507_vm0, %v4506_v0 }
0x2c79   :  { %v1750_v34 = vpop.permute.xlu1 %1749 }
0x2c7a   :  { %4112 = vmatmul.mubr.msk.bf16.vlgmr.msra.gmra.mrb[48].mxu0 %vm171_vm5, %v1750_v34 }
0x2c7b   :  { %4124 = vmatpush3.bf16.msra.mxu0 %v4990_v32  ;;  %4127 = vmatprep.mubr.msk.bf16.mxu0 %vm4507_vm0, %v4506_v0 }
0x2c7c   :  { %4125 = vmatprep.subr.bf16.mxu0 %v4506_v0 }
0x2c7f   :  { %4126 = vmatpush3.bf16.msra.mxu0 %v4998_v33 }
0x2c80   :  { %4139 = vmatprep.subr.bf16.mxu0 %v4506_v0 }
0x2ce8   :  { %v5087_v2 = vpop.f32.mrb[44].mxu0 }
0x2ce9   :  { %v5089_v28 = vpop.f32.mrb[45].mxu0 }
0x2cea   :  { %v5091_v23 = vpop.f32.mrb[46].mxu0  ;;  %v1575_v43 = vadd.f32 %v5025_v1, %v5089_v28 }
0x2ceb   :  { %v5093_v51 = vpop.f32.mrb[47].mxu0 }
0x2d4d   :  { %v1788_v55 = vpop.f32.mrb[48].mxu0 }
0x2d4e   :  { %v1794_v57 = vadd.f32 %v1788_v55, %v1567_v54  ;;  %v4113_v62 = vpop.f32.mrb[49].mxu0 }
0x2d4f   :  { %v1791_v56 = vpop.f32.mrb[50].mxu0 }
0x2d50   :  { %v1795_v8 = vmul.f32 %v1794_v57, %v4602_v16  ;;  %v4114_v52 = vpop.f32.mrb[51].mxu0 }
0x2d52   :  { %4418 = vtanh.f32 %v1795_v8 }
0x2d5c   :  { %v4419_v44 = vpop.eup %4418 }
0x2d5d   :  { %v1797_v12 = vmul.f32 %v4419_v44, %v4602_v16 }
0x2d5f   :  { %v1798_v63 = vadd.f32 %v1797_v12, %v4605_v24  ;;  %v1578_v12 = vadd.f32 %v5025_v1, %v5093_v51 }
0x2d61   :  { %1801 = vrot.lane.b32.xlu0 %v1798_v63, %s4510_s12  ;;  %v1799_v36 = vmul.f32 %v1798_v63, %v1735_v13 }
0x2dd3   :  { %v1802_v4 = vpop.permute.xlu0 %1801 }
0x2dd4   :  { %v1804_v11 = vmul.f32 %v1802_v4, %v1798_v63 }
0x2dd6   :  { %1806 = vrot.lane.b32.xlu1 %v1804_v11, %s4511_s13 }
0x2e48   :  { %v1807_v15 = vpop.permute.xlu1 %1806 }
0x2e49   :  { %v1809_v9 = vadd.f32 %v1807_v15, %v1799_v36 }
0x2e4b   :  { %4420 = vtanh.f32 %v1809_v9 }
0x2e55   :  { %v4421_v17 = vpop.eup %4420 }
0x2e56   :  { %1812 = vrot.lane.b32.xlu0 %v4421_v17, %s4510_s12 }
0x2ec8   :  { %v1813_v19 = vpop.permute.xlu0 %1812 }
0x2ec9   :  { %v5103_v20 = vmul.f32 %v1813_v19, %v1798_v63 }
0x2ecb   :  { %v1821_v21 = vpack.c.bf16 %v5103_v20, %v5103_v20 }
0x2ecd   :  { %1823 = vrot.lane.b32.xlu1 %v1821_v21, %s4511_s13 }
0x2f3f   :  { %v1824_v18 = vpop.permute.xlu1 %1823 }
0x2f40   :  { %4120 = vmatmul.mubr.msk.bf16.vlgmr.msra.gmra.mrb[48].mxu1 %vm171_vm5, %v1824_v18 }
0x2f41   :  { %4132 = vmatpush3.bf16.msra.mxu1 %v4990_v32  ;;  %4135 = vmatprep.mubr.msk.bf16.mxu1 %vm4507_vm0, %v4506_v0 }
0x2f42   :  { %4133 = vmatprep.subr.bf16.mxu1 %v4506_v0 }
0x2f45   :  { %4134 = vmatpush3.bf16.msra.mxu1 %v4998_v33 }
0x2f46   :  { %4147 = vmatprep.subr.bf16.mxu1 %v4506_v0 }
0x3013   :  { %v1862_v49 = vpop.f32.mrb[48].mxu1 }
0x3014   :  { %v1868_v22 = vadd.f32 %v1862_v49, %v1570_v41  ;;  %v4121_v30 = vpop.f32.mrb[49].mxu1 }
0x3015   :  { %v1865_v25 = vpop.f32.mrb[50].mxu1 }
0x3016   :  { %v1869_v61 = vmul.f32 %v1868_v22, %v4602_v16  ;;  %v4122_v26 = vpop.f32.mrb[51].mxu1 }
0x3017   :  { %v1583_v26 = vadd.f32 %v5087_v2, %v5025_v1 }
0x3018   :  { %4422 = vtanh.f32 %v1869_v61 }
0x3022   :  { %v4423_v27 = vpop.eup %4422 }
0x3023   :  { %v1871_v10 = vmul.f32 %v4423_v27, %v4602_v16 }
0x3025   :  { %v1872_v37 = vadd.f32 %v1871_v10, %v4605_v24 }
0x3027   :  { %1875 = vrot.lane.b32.xlu0 %v1872_v37, %s4510_s12  ;;  %v1873_v39 = vmul.f32 %v1872_v37, %v1809_v9 }
0x3099   :  { %v1876_v5 = vpop.permute.xlu0 %1875 }
0x309a   :  { %v1878_v14 = vmul.f32 %v1876_v5, %v1872_v37 }
0x309c   :  { %1880 = vrot.lane.b32.xlu1 %v1878_v14, %s4511_s13 }
0x310e   :  { %v1881_v31 = vpop.permute.xlu1 %1880 }
0x310f   :  { %v1883_v60 = vadd.f32 %v1881_v31, %v1873_v39 }
0x3111   :  { %4424 = vtanh.f32 %v1883_v60 }
0x311b   :  { %v4425_v35 = vpop.eup %4424 }
0x311c   :  { %1886 = vrot.lane.b32.xlu0 %v4425_v35, %s4510_s12 }
0x318e   :  { %v1887_v38 = vpop.permute.xlu0 %1886 }
0x318f   :  { %v5123_v13 = vmul.f32 %v1887_v38, %v1872_v37 }
0x3191   :  { %v1895_v40 = vpack.c.bf16 %v5123_v13, %v5123_v13 }
0x3193   :  { %1897 = vrot.lane.b32.xlu1 %v1895_v40, %s4511_s13 }
0x3205   :  { %v1898_v42 = vpop.permute.xlu1 %1897 }
0x3206   :  { %4128 = vmatmul.mubr.msk.bf16.vlgmr.msra.gmra.mrb[52].mxu0 %vm171_vm5, %v1898_v42 }
0x3207   :  { %4140 = vmatpush3.bf16.msra.mxu0 %v4990_v32  ;;  %4143 = vmatprep.mubr.msk.bf16.mxu0 %vm4507_vm0, %v4506_v0 }
0x3208   :  { %4141 = vmatprep.subr.bf16.mxu0 %v4506_v0 }
0x320b   :  { %4142 = vmatpush3.bf16.msra.mxu0 %v4998_v33 }
0x32d9   :  { %v1936_v45 = vpop.f32.mrb[52].mxu0 }
0x32da   :  { %v1942_v58 = vadd.f32 %v1936_v45, %v1575_v43  ;;  %v4129_v46 = vpop.f32.mrb[53].mxu0 }
0x32db   :  { %v1939_v48 = vpop.f32.mrb[54].mxu0  ;;  %v4336_v46 = vld [vmem:[%s5617_s2 + $0x20] sm:$0xff]  }
0x32dc   :  { %v1943_v3 = vmul.f32 %v1942_v58, %v4602_v16  ;;  %v4130_v53 = vpop.f32.mrb[55].mxu0  ;;  %4155 = vmatprep.subr.bf16.mxu0 %v4336_v46 }
0x32de   :  { %4426 = vtanh.f32 %v1943_v3 }
0x32e8   :  { %v4427_v50 = vpop.eup %4426 }
0x32e9   :  { %v1945_v29 = vmul.f32 %v4427_v50, %v4602_v16 }
0x32eb   :  { %v1946_v47 = vadd.f32 %v1945_v29, %v4605_v24 }
0x32ed   :  { %1949 = vrot.lane.b32.xlu0 %v1946_v47, %s4510_s12  ;;  %v1947_v28 = vmul.f32 %v1946_v47, %v1883_v60 }
0x335f   :  { %v1950_v34 = vpop.permute.xlu0 %1949 }
0x3360   :  { %v1952_v54 = vmul.f32 %v1950_v34, %v1946_v47 }
0x3362   :  { %1954 = vrot.lane.b32.xlu1 %v1952_v54, %s4511_s13 }
0x33d4   :  { %v1955_v55 = vpop.permute.xlu1 %1954 }
0x33d5   :  { %v1957_v57 = vadd.f32 %v1955_v55, %v1947_v28  ;;  %v5207_v55 = vld [vmem:[%s5614_s3 + $0x30] sm:$0xff]  }
0x33d7   :  { %4428 = vtanh.f32 %v1957_v57 }
0x33e1   :  { %v4429_v62 = vpop.eup %4428 }
0x33e2   :  { %1960 = vrot.lane.b32.xlu0 %v4429_v62, %s4510_s12 }
0x3454   :  { %v1961_v56 = vpop.permute.xlu0 %1960 }
0x3455   :  { %v5142_v8 = vmul.f32 %v1961_v56, %v1946_v47 }
0x3457   :  { %v1969_v52 = vpack.c.bf16 %v5142_v8, %v5142_v8 }
0x3459   :  { %1971 = vrot.lane.b32.xlu1 %v1969_v52, %s4511_s13 }
0x34cb   :  { %v1972_v44 = vpop.permute.xlu1 %1971 }
0x34cc   :  { %4136 = vmatmul.mubr.msk.bf16.vlgmr.msra.gmra.mrb[52].mxu1 %vm171_vm5, %v1972_v44 }
0x34cd   :  { %4148 = vmatpush3.bf16.msra.mxu1 %v4990_v32  ;;  %4151 = vmatprep.mubr.msk.bf16.mxu1 %vm4507_vm0, %v4506_v0 }
0x34ce   :  { %4149 = vmatprep.subr.bf16.mxu1 %v4506_v0 }
0x34d1   :  { %4150 = vmatpush3.bf16.msra.mxu1 %v4998_v33 }
0x34d2   :  { %4167 = vmatprep.subr.bf16.mxu1 %v4506_v0 }
0x359f   :  { %v2010_v63 = vpop.f32.mrb[52].mxu1 }
0x35a0   :  { %v2016_v4 = vadd.f32 %v2010_v63, %v1578_v12  ;;  %v4137_v11 = vpop.f32.mrb[53].mxu1  ;;  %v1586_v63 = vadd.f32 %v5091_v23, %v5025_v1 }
0x35a1   :  { %v2013_v36 = vpop.f32.mrb[54].mxu1 }
0x35a2   :  { %v2017_v15 = vmul.f32 %v2016_v4, %v4602_v16  ;;  %v4138_v9 = vpop.f32.mrb[55].mxu1 }
0x35a4   :  { %4430 = vtanh.f32 %v2017_v15 }
0x35ae   :  { %v4431_v32 = vpop.eup %4430 }
0x35af   :  { %v2019_v17 = vmul.f32 %v4431_v32, %v4602_v16  ;;  %v5242_v32 = vld [vmem:[%s5616_s4 + $0x3] ss:$0 sm:$0xff] }
0x35b1   :  { %v2020_v19 = vadd.f32 %v2019_v17, %v4605_v24 }
0x35b3   :  { %2023 = vrot.lane.b32.xlu0 %v2020_v19, %s4510_s12  ;;  %v2021_v51 = vmul.f32 %v2020_v19, %v1957_v57  ;;  %v5215_v57 = vld [vmem:[%s5614_s3 + $0x38] sm:$0xff]  }
0x3625   :  { %v2024_v33 = vpop.permute.xlu0 %2023 }
0x3626   :  { %v2026_v21 = vmul.f32 %v2024_v33, %v2020_v19 }
0x3628   :  { %2028 = vrot.lane.b32.xlu1 %v2026_v21, %s4511_s13 }
0x369a   :  { %v2029_v18 = vpop.permute.xlu1 %2028 }
0x369b   :  { %v2031_v41 = vadd.f32 %v2029_v18, %v2021_v51 }
0x369d   :  { %4432 = vtanh.f32 %v2031_v41 }
0x36a7   :  { %v4433_v49 = vpop.eup %4432 }
0x36a8   :  { %2034 = vrot.lane.b32.xlu0 %v4433_v49, %s4510_s12 }
0x371a   :  { %v2035_v22 = vpop.permute.xlu0 %2034 }
0x371b   :  { %v5162_v30 = vmul.f32 %v2035_v22, %v2020_v19 }
0x371d   :  { %v2043_v25 = vpack.c.bf16 %v5162_v30, %v5162_v30 }
0x371f   :  { %2045 = vrot.lane.b32.xlu1 %v2043_v25, %s4511_s13 }
0x3791   :  { %v2046_v61 = vpop.permute.xlu1 %2045 }
0x3792   :  { %4144 = vmatmul.mubr.msk.bf16.vlgmr.msra.gmra.mrb[56].mxu0 %vm171_vm5, %v2046_v61 }
0x3793   :  { %4156 = vmatpush3.bf16.msra.mxu0 %v4336_v46 }
0x3865   :  { %v2084_v27 = vpop.f32.mrb[56].mxu0 }
0x3866   :  { %v2090_v10 = vadd.f32 %v2084_v27, %v1583_v26  ;;  %v4145_v37 = vpop.f32.mrb[57].mxu0 }
0x3867   :  { %v2087_v5 = vpop.f32.mrb[58].mxu0 }
0x3868   :  { %v2091_v14 = vmul.f32 %v2090_v10, %v4602_v16  ;;  %v4146_v39 = vpop.f32.mrb[59].mxu0 }
0x386a   :  { %4434 = vtanh.f32 %v2091_v14 }
0x3874   :  { %v4435_v31 = vpop.eup %4434 }
0x3875   :  { %v2093_v60 = vmul.f32 %v4435_v31, %v4602_v16 }
0x3877   :  { %v2094_v35 = vadd.f32 %v2093_v60, %v4605_v24 }
0x3879   :  { %2097 = vrot.lane.b32.xlu0 %v2094_v35, %s4510_s12  ;;  %v2095_v2 = vmul.f32 %v2094_v35, %v2031_v41 }
0x38eb   :  { %v2098_v38 = vpop.permute.xlu0 %2097 }
0x38ec   :  { %v2100_v40 = vmul.f32 %v2098_v38, %v2094_v35 }
0x38ee   :  { %2102 = vrot.lane.b32.xlu1 %v2100_v40, %s4511_s13 }
0x38f2   :  { %1669 = vrot.lane.b32.xlu1 %v5038_v59, %s4511_s13  ;;  %v4337_v59 = vld [vmem:[%s5617_s2 + $0x28] sm:$0xff]  }
0x38f3   :  { %4157 = vmatprep.subr.bf16.mxu0 %v4337_v59 }
0x38f4   :  { %4158 = vmatpush3.bf16.msra.mxu0 %v4337_v59 }
0x38f5   :  { %4183 = vmatprep.subr.bf16.mxu0 %v4506_v0 }
0x38f6   :  { %1817 = vrot.lane.b32.xlu1 %v5103_v20, %s4511_s13 }
0x3960   :  { %v2103_v42 = vpop.permute.xlu1 %2102 }
0x3961   :  { %v5179_v43 = vadd.f32 %v2103_v42, %v2095_v2 }
0x3963   :  { %4436 = vtanh.f32 %v5179_v43 }
0x3964   :  { %v1670_v45 = vpop.permute.xlu1 %1669 }
0x3965   :  { %1672 = vst.msk [vmem:[#allocation2] sm:$0xff] %vm171_vm5, %v1670_v45 }
0x3968   :  { %v1818_v58 = vpop.permute.xlu1 %1817 }
0x3969   :  { %1820 = vst.msk [vmem:[#allocation2 + $0x10] sm:$0xff] %vm171_vm5, %v1818_v58 }
0x396c   :  { %v2191_v47 = vld [vmem:[#allocation2] sm:$0xff] }
0x396d   :  { %v4437_v20 = vpop.eup %4436 }
0x396e   :  { %2108 = vrot.lane.b32.xlu0 %v4437_v20, %s4510_s12 }
0x3972   :  { %1743 = vrot.lane.b32.xlu0 %v5069_v7, %s4511_s13 }
0x3976   :  { %1891 = vrot.lane.b32.xlu0 %v5123_v13, %s4511_s13  ;;  %v2193_v13 = vld [vmem:[#allocation2 + $0x10] sm:$0xff] }
0x39e0   :  { %v2109_v48 = vpop.permute.xlu0 %2108 }
0x39e1   :  { %v5196_v3 = vmul.f32 %v2109_v48, %v2094_v35 }
0x39e3   :  { %v2117_v53 = vpack.c.bf16 %v5196_v3, %v5196_v3 }
0x39e4   :  { %v1744_v50 = vpop.permute.xlu0 %1743 }
0x39e5   :  { %1746 = vst.msk [vmem:[#allocation2 + $0x8] sm:$0xff] %vm171_vm5, %v1744_v50  ;;  %2119 = vrot.lane.b32.xlu1 %v2117_v53, %s4511_s13 }
0x39e8   :  { %v1892_v29 = vpop.permute.xlu0 %1891 }
0x39e9   :  { %1894 = vst.msk [vmem:[#allocation2 + $0x18] sm:$0xff] %vm171_vm5, %v1892_v29 }
0x39ec   :  { %v2192_v34 = vld [vmem:[#allocation2 + $0x8] sm:$0xff] }
0x39ed   :  { %v2199_v7 = vpack.c.bf16 %v2192_v34, %v2191_v47 }
0x39ef   :  { %4159 = vmatprep.mubr.msk.bf16.mxu0 %vm171_vm5, %v2199_v7 }
0x39f0   :  { %v2194_v54 = vld [vmem:[#allocation2 + $0x18] sm:$0xff] }
0x39f1   :  { %v2200_v28 = vpack.c.bf16 %v2194_v54, %v2193_v13 }
0x39f3   :  { %4160 = vmatmul.mubr.msk.bf16.vlgmr.msra.gmra.mrb[60].mxu0 %vm171_vm5, %v2200_v28 }
0x39f4   :  { %4184 = vmatpush3.bf16.msra.mxu0 %v5207_v55 }
0x39f5   :  { %4185 = vmatprep.subr.bf16.mxu0 %v4506_v0 }
0x39f8   :  { %4186 = vmatpush3.bf16.msra.mxu0 %v5215_v57 }
0x39f9   :  { %4199 = vmatprep.subr.bf16.mxu0 %v4506_v0 }
0x3a57   :  { %v2120_v62 = vpop.permute.xlu1 %2119 }
0x3a58   :  { %4152 = vmatmul.mubr.msk.bf16.vlgmr.msra.gmra.mrb[56].mxu1 %vm171_vm5, %v2120_v62 }
0x3a59   :  { %4168 = vmatpush3.bf16.msra.mxu1 %v5207_v55  ;;  %4171 = vmatprep.mubr.msk.bf16.mxu1 %vm4507_vm0, %v4506_v0 }
0x3a5a   :  { %4169 = vmatprep.subr.bf16.mxu1 %v4506_v0 }
0x3a5d   :  { %4170 = vmatpush3.bf16.msra.mxu1 %v5215_v57 }
0x3a5e   :  { %4175 = vmatprep.subr.bf16.mxu1 %v4506_v0 }
0x3a60   :  { %4172 = vmatmul.mubr.bf16.vlgmr.msra.gmra.mrb[60].mxu1 %v4508_v6 }
0x3a61   :  { %4176 = vmatpush3.bf16.msra.mxu1 %v5207_v55  ;;  %4179 = vmatprep.mubr.msk.bf16.mxu1 %vm4507_vm0, %v4506_v0 }
0x3a62   :  { %4177 = vmatprep.subr.bf16.mxu1 %v4506_v0 }
0x3a65   :  { %4178 = vmatpush3.bf16.msra.mxu1 %v5215_v57 }
0x3a66   :  { %4191 = vmatprep.subr.bf16.mxu1 %v4506_v0 }
0x3ac6   :  { %v5233_v56 = vpop.f32.mrb[60].mxu0 }
0x3ac7   :  { %v2274_v52 = vpop.f32.mrb[61].mxu0 }
0x3ac8   :  { %v5235_v44 = vpop.f32.mrb[62].mxu0  ;;  %v2275_v17 = vadd.f32 %v5242_v32, %v2274_v52 }
0x3ac9   :  { %v2277_v12 = vpop.f32.mrb[63].mxu0 }
0x3aca   :  { %v2278_v48 = vadd.f32 %v5242_v32, %v2277_v12 }
0x3b2b   :  { %v2158_v4 = vpop.f32.mrb[56].mxu1 }
0x3b2c   :  { %v2164_v11 = vadd.f32 %v2158_v4, %v1586_v63  ;;  %v4153_v36 = vpop.f32.mrb[57].mxu1 }
0x3b2d   :  { %v2161_v15 = vpop.f32.mrb[58].mxu1 }
0x3b2e   :  { %v4154_v9 = vpop.f32.mrb[59].mxu1  ;;  %v2165_v61 = vmul.f32 %v2164_v11, %v4602_v16 }
0x3b33   :  { %v2356_v19 = vpop.f32.mrb[60].mxu1 }
0x3b34   :  { %v2362_v33 = vadd.f32 %v2356_v19, %v2275_v17  ;;  %v4173_v21 = vpop.f32.mrb[61].mxu1 }
0x3b35   :  { %v2359_v51 = vpop.f32.mrb[62].mxu1 }
0x3b36   :  { %v2363_v18 = vmul.f32 %v2362_v33, %v4602_v16  ;;  %v4174_v41 = vpop.f32.mrb[63].mxu1 }
0x3b38   :  { %4438 = vtanh.f32 %v2363_v18 }
0x3b39   :  { %4440 = vtanh.f32 %v2165_v61 }
0x3b42   :  { %v4439_v1 = vpop.eup %4438 }
0x3b43   :  { %v2365_v23 = vmul.f32 %v4439_v1, %v4602_v16  ;;  %v4441_v37 = vpop.eup %4440 }
0x3b44   :  { %v2167_v5 = vmul.f32 %v4441_v37, %v4602_v16 }
0x3b45   :  { %v2366_v49 = vadd.f32 %v2365_v23, %v4605_v24 }
0x3b46   :  { %v2168_v39 = vadd.f32 %v2167_v5, %v4605_v24 }
0x3b47   :  { %2369 = vrot.lane.b32.xlu0 %v2366_v49, %s4510_s12  ;;  %v2367_v26 = vmul.f32 0.0, %v2366_v49 }
0x3b48   :  { %v2169_v42 = vmul.f32 %v2168_v39, %v5179_v43 }
0x3bb9   :  { %v2370_v22 = vpop.permute.xlu0 %2369 }
0x3bba   :  { %v2372_v25 = vmul.f32 %v2370_v22, %v2366_v49 }
0x3bbc   :  { %2374 = vrot.lane.b32.xlu1 %v2372_v25, %s4511_s13  ;;  %v2283_v25 = vadd.f32 %v5233_v56, %v5242_v32 }
0x3c2e   :  { %v2375_v27 = vpop.permute.xlu1 %2374 }
0x3c2f   :  { %v2377_v10 = vadd.f32 %v2375_v27, %v2367_v26 }
0x3c31   :  { %4442 = vtanh.f32 %v2377_v10 }
0x3c3b   :  { %v4443_v14 = vpop.eup %4442 }
0x3c3c   :  { %2380 = vrot.lane.b32.xlu0 %v4443_v14, %s4510_s12 }
0x3c40   :  { %2171 = vrot.lane.b32.xlu0 %v2168_v39, %s4510_s12 }
0x3cae   :  { %v2381_v31 = vpop.permute.xlu0 %2380 }
0x3caf   :  { %v5255_v60 = vmul.f32 %v2381_v31, %v2366_v49 }
0x3cb1   :  { %v2389_v35 = vpack.c.bf16 %v5255_v60, %v5255_v60 }
0x3cb2   :  { %v2172_v38 = vpop.permute.xlu0 %2171 }
0x3cb3   :  { %v2174_v40 = vmul.f32 %v2172_v38, %v2168_v39  ;;  %2391 = vrot.lane.b32.xlu1 %v2389_v35, %s4511_s13 }
0x3cb5   :  { %2176 = vrot.lane.b32.xlu0 %v2174_v40, %s4511_s13 }
0x3d25   :  { %v2392_v2 = vpop.permute.xlu1 %2391 }
0x3d26   :  { %4180 = vmatmul.mubr.msk.bf16.vlgmr.msra.gmra.mrb[64].mxu1 %vm171_vm5, %v2392_v2 }
0x3d27   :  { %v2177_v45 = vpop.permute.xlu0 %2176  ;;  %4192 = vmatpush3.bf16.msra.mxu1 %v5207_v55  ;;  %4195 = vmatprep.mubr.msk.bf16.mxu1 %vm4507_vm0, %v4506_v0 }
0x3d28   :  { %v2179_v58 = vadd.f32 %v2177_v45, %v2169_v42  ;;  %4193 = vmatprep.subr.bf16.mxu1 %v4506_v0 }
0x3d2a   :  { %4444 = vtanh.f32 %v2179_v58 }
0x3d2b   :  { %4194 = vmatpush3.bf16.msra.mxu1 %v5215_v57 }
0x3d2c   :  { %4207 = vmatprep.subr.bf16.mxu1 %v4506_v0 }
0x3d34   :  { %v4445_v46 = vpop.eup %4444 }
0x3d35   :  { %2182 = vrot.lane.b32.xlu0 %v4445_v46, %s4510_s12 }
0x3d39   :  { %1965 = vrot.lane.b32.xlu0 %v5142_v8, %s4511_s13 }
0x3d3d   :  { %2113 = vrot.lane.b32.xlu0 %v5196_v3, %s4511_s13 }
0x3da7   :  { %v2183_v43 = vpop.permute.xlu0 %2182 }
0x3da8   :  { %v2185_v4 = vmul.f32 %v2183_v43, %v2168_v39 }
0x3dab   :  { %v1966_v59 = vpop.permute.xlu0 %1965 }
0x3dac   :  { %1968 = vst.msk [vmem:[#allocation2 + $0x20] sm:$0xff] %vm171_vm5, %v1966_v59  ;;  %v2286_v59 = vadd.f32 %v5235_v44, %v5242_v32 }
0x3daf   :  { %v2114_v20 = vpop.permute.xlu0 %2113 }
0x3db0   :  { %2116 = vst.msk [vmem:[#allocation2 + $0x30] sm:$0xff] %vm171_vm5, %v2114_v20 }
0x3db3   :  { %v2195_v19 = vld [vmem:[#allocation2 + $0x20] sm:$0xff] }
0x3db7   :  { %v2197_v21 = vld [vmem:[#allocation2 + $0x30] sm:$0xff] }
0x3df9   :  { %v2430_v53 = vpop.f32.mrb[64].mxu1 }
0x3dfa   :  { %v2436_v50 = vadd.f32 %v2430_v53, %v2278_v48  ;;  %v4181_v29 = vpop.f32.mrb[65].mxu1 }
0x3dfb   :  { %v2433_v47 = vpop.f32.mrb[66].mxu1 }
0x3dfc   :  { %v2437_v34 = vmul.f32 %v2436_v50, %v4602_v16  ;;  %v4182_v7 = vpop.f32.mrb[67].mxu1 }
0x3dfe   :  { %4446 = vtanh.f32 %v2437_v34 }
0x3e08   :  { %v4447_v8 = vpop.eup %4446 }
0x3e09   :  { %v2439_v3 = vmul.f32 %v4447_v8, %v4602_v16 }
0x3e0b   :  { %v2440_v13 = vadd.f32 %v2439_v3, %v4605_v24 }
0x3e0d   :  { %2443 = vrot.lane.b32.xlu1 %v2440_v13, %s4510_s12  ;;  %v2441_v62 = vmul.f32 %v2440_v13, %v2377_v10 }
0x3e7f   :  { %v2444_v54 = vpop.permute.xlu1 %2443 }
0x3e80   :  { %v2446_v28 = vmul.f32 %v2444_v54, %v2440_v13 }
0x3e82   :  { %2448 = vrot.lane.b32.xlu1 %v2446_v28, %s4511_s13 }
0x3ef4   :  { %v2449_v52 = vpop.permute.xlu1 %2448 }
0x3ef5   :  { %v2451_v12 = vadd.f32 %v2449_v52, %v2441_v62 }
0x3ef7   :  { %4448 = vtanh.f32 %v2451_v12 }
0x3f01   :  { %v4449_v63 = vpop.eup %4448 }
0x3f02   :  { %2454 = vrot.lane.b32.xlu1 %v4449_v63, %s4510_s12 }
0x3f06   :  { %2039 = vrot.lane.b32.xlu1 %v5162_v30, %s4511_s13 }
0x3f0a   :  { %2187 = vrot.lane.b32.xlu1 %v2185_v4, %s4511_s13 }
0x3f74   :  { %v2455_v11 = vpop.permute.xlu1 %2454 }
0x3f75   :  { %v5286_v36 = vmul.f32 %v2455_v11, %v2440_v13 }
0x3f77   :  { %v2463_v15 = vpack.c.bf16 %v5286_v36, %v5286_v36 }
0x3f78   :  { %v2040_v9 = vpop.permute.xlu1 %2039 }
0x3f79   :  { %2042 = vst.msk [vmem:[#allocation2 + $0x28] sm:$0xff] %vm171_vm5, %v2040_v9  ;;  %2465 = vrot.lane.b32.xlu0 %v2463_v15, %s4511_s13 }
0x3f7c   :  { %v2188_v17 = vpop.permute.xlu1 %2187 }
0x3f7d   :  { %2190 = vst.msk [vmem:[#allocation2 + $0x38] sm:$0xff] %vm171_vm5, %v2188_v17 }
0x3f80   :  { %v2196_v33 = vld [vmem:[#allocation2 + $0x28] sm:$0xff] }
0x3f81   :  { %v2201_v30 = vpack.c.bf16 %v2196_v33, %v2195_v19 }
0x3f83   :  { %4163 = vmatprep.mubr.msk.bf16.mxu0 %vm171_vm5, %v2201_v30 }
0x3f84   :  { %v2198_v51 = vld [vmem:[#allocation2 + $0x38] sm:$0xff] }
0x3f85   :  { %v2202_v18 = vpack.c.bf16 %v2198_v51, %v2197_v21 }
0x3f87   :  { %4164 = vmatmul.mubr.msk.bf16.gmra.mrb[64].mxu0 %vm171_vm5, %v2202_v18 }
0x3f88   :  { %4187 = vmatprep.mubr.msk.bf16.mxu0 %vm4507_vm0, %v4506_v0 }
0x3feb   :  { %v2466_v41 = vpop.permute.xlu0 %2465 }
0x3fec   :  { %4188 = vmatmul.mubr.msk.bf16.vlgmr.msra.gmra.mrb[68].mxu0 %vm171_vm5, %v2466_v41 }
0x3fed   :  { %4200 = vmatpush3.bf16.msra.mxu0 %v5207_v55  ;;  %4203 = vmatprep.mubr.msk.bf16.mxu0 %vm4507_vm0, %v4506_v0 }
0x3fee   :  { %4201 = vmatprep.subr.bf16.mxu0 %v4506_v0 }
0x3ff1   :  { %4202 = vmatpush3.bf16.msra.mxu0 %v5215_v57 }
0x3ff2   :  { %4215 = vmatprep.subr.bf16.mxu0 %v4506_v0 }
0x405a   :  { %v5304_v1 = vpop.f32.mrb[64].mxu0 }
0x405b   :  { %v5306_v23 = vpop.f32.mrb[65].mxu0 }
0x405c   :  { %v5308_v49 = vpop.f32.mrb[66].mxu0  ;;  %v2291_v11 = vadd.f32 %v5242_v32, %v5306_v23 }
0x405d   :  { %v5310_v22 = vpop.f32.mrb[67].mxu0 }
0x40bf   :  { %v2504_v61 = vpop.f32.mrb[68].mxu0 }
0x40c0   :  { %v2510_v26 = vadd.f32 %v2504_v61, %v2283_v25  ;;  %v4189_v27 = vpop.f32.mrb[69].mxu0 }
0x40c1   :  { %v2507_v10 = vpop.f32.mrb[70].mxu0 }
0x40c2   :  { %v2511_v37 = vmul.f32 %v2510_v26, %v4602_v16  ;;  %v4190_v5 = vpop.f32.mrb[71].mxu0 }
0x40c4   :  { %4450 = vtanh.f32 %v2511_v37 }
0x40ce   :  { %v4451_v14 = vpop.eup %4450 }
0x40cf   :  { %v2513_v39 = vmul.f32 %v4451_v14, %v4602_v16 }
0x40d1   :  { %v2514_v31 = vadd.f32 %v2513_v39, %v4605_v24  ;;  %v2294_v39 = vadd.f32 %v5242_v32, %v5310_v22 }
0x40d3   :  { %2517 = vrot.lane.b32.xlu1 %v2514_v31, %s4510_s12  ;;  %v2515_v56 = vmul.f32 %v2514_v31, %v2451_v12 }
0x4145   :  { %v2518_v35 = vpop.permute.xlu1 %2517 }
0x4146   :  { %v2520_v38 = vmul.f32 %v2518_v35, %v2514_v31 }
0x4148   :  { %2522 = vrot.lane.b32.xlu0 %v2520_v38, %s4511_s13 }
0x41ba   :  { %v2523_v40 = vpop.permute.xlu0 %2522 }
0x41bb   :  { %v2525_v2 = vadd.f32 %v2523_v40, %v2515_v56 }
0x41bd   :  { %4452 = vtanh.f32 %v2525_v2 }
0x41c7   :  { %v4453_v42 = vpop.eup %4452 }
0x41c8   :  { %2528 = vrot.lane.b32.xlu1 %v4453_v42, %s4510_s12 }
0x423a   :  { %v2529_v45 = vpop.permute.xlu1 %2528 }
0x423b   :  { %v5320_v58 = vmul.f32 %v2529_v45, %v2514_v31 }
0x423d   :  { %v2537_v46 = vpack.c.bf16 %v5320_v58, %v5320_v58 }
0x423f   :  { %2539 = vrot.lane.b32.xlu0 %v2537_v46, %s4511_s13 }
0x42b1   :  { %v2540_v43 = vpop.permute.xlu0 %2539 }
0x42b2   :  { %4196 = vmatmul.mubr.msk.bf16.vlgmr.msra.gmra.mrb[68].mxu1 %vm171_vm5, %v2540_v43 }
0x42b3   :  { %4208 = vmatpush3.bf16.msra.mxu1 %v5207_v55  ;;  %4211 = vmatprep.mubr.msk.bf16.mxu1 %vm4507_vm0, %v4506_v0 }
0x42b4   :  { %4209 = vmatprep.subr.bf16.mxu1 %v4506_v0 }
0x42b7   :  { %4210 = vmatpush3.bf16.msra.mxu1 %v5215_v57 }
0x42b8   :  { %4223 = vmatprep.subr.bf16.mxu1 %v4506_v0 }
0x4385   :  { %v2578_v20 = vpop.f32.mrb[68].mxu1 }
0x4386   :  { %v2584_v48 = vadd.f32 %v2578_v20, %v2286_v59  ;;  %v4197_v53 = vpop.f32.mrb[69].mxu1 }
0x4387   :  { %v2581_v50 = vpop.f32.mrb[70].mxu1 }
0x4388   :  { %v2585_v29 = vmul.f32 %v2584_v48, %v4602_v16  ;;  %v4198_v47 = vpop.f32.mrb[71].mxu1 }
0x4389   :  { %v2299_v47 = vadd.f32 %v5304_v1, %v5242_v32 }
0x438a   :  { %4454 = vtanh.f32 %v2585_v29 }
0x4394   :  { %v4455_v34 = vpop.eup %4454 }
0x4395   :  { %v2587_v7 = vmul.f32 %v4455_v34, %v4602_v16 }
0x4397   :  { %v2588_v8 = vadd.f32 %v2587_v7, %v4605_v24 }
0x4399   :  { %2591 = vrot.lane.b32.xlu1 %v2588_v8, %s4510_s12  ;;  %v2589_v44 = vmul.f32 %v2588_v8, %v2525_v2 }
0x440b   :  { %v2592_v3 = vpop.permute.xlu1 %2591 }
0x440c   :  { %v2594_v13 = vmul.f32 %v2592_v3, %v2588_v8 }
0x440e   :  { %2596 = vrot.lane.b32.xlu0 %v2594_v13, %s4511_s13 }
0x4480   :  { %v2597_v54 = vpop.permute.xlu0 %2596 }
0x4481   :  { %v2599_v28 = vadd.f32 %v2597_v54, %v2589_v44 }
0x4483   :  { %4456 = vtanh.f32 %v2599_v28 }
0x448d   :  { %v4457_v62 = vpop.eup %4456 }
0x448e   :  { %2602 = vrot.lane.b32.xlu1 %v4457_v62, %s4510_s12 }
0x4500   :  { %v2603_v52 = vpop.permute.xlu1 %2602 }
0x4501   :  { %v5340_v12 = vmul.f32 %v2603_v52, %v2588_v8 }
0x4503   :  { %v2611_v63 = vpack.c.bf16 %v5340_v12, %v5340_v12 }
0x4505   :  { %2613 = vrot.lane.b32.xlu0 %v2611_v63, %s4511_s13 }
0x4577   :  { %v2614_v4 = vpop.permute.xlu0 %2613 }
0x4578   :  { %4204 = vmatmul.mubr.msk.bf16.vlgmr.msra.gmra.mrb[72].mxu0 %vm171_vm5, %v2614_v4 }
0x4579   :  { %4216 = vmatpush3.bf16.msra.mxu0 %v5207_v55  ;;  %4219 = vmatprep.mubr.msk.bf16.mxu0 %vm4507_vm0, %v4506_v0 }
0x457a   :  { %4217 = vmatprep.subr.bf16.mxu0 %v4506_v0 }
0x457d   :  { %4218 = vmatpush3.bf16.msra.mxu0 %v5215_v57 }
0x464b   :  { %v2652_v15 = vpop.f32.mrb[72].mxu0 }
0x464c   :  { %v2658_v9 = vadd.f32 %v2652_v15, %v2291_v11  ;;  %v4205_v17 = vpop.f32.mrb[73].mxu0 }
0x464d   :  { %v2655_v19 = vpop.f32.mrb[74].mxu0  ;;  %v4340_v17 = vld [vmem:[%s5617_s2 + $0x30] sm:$0xff]  }
0x464e   :  { %v2659_v33 = vmul.f32 %v2658_v9, %v4602_v16  ;;  %v4206_v30 = vpop.f32.mrb[75].mxu0  ;;  %4231 = vmatprep.subr.bf16.mxu0 %v4340_v17 }
0x4650   :  { %4458 = vtanh.f32 %v2659_v33 }
0x465a   :  { %v4459_v21 = vpop.eup %4458 }
0x465b   :  { %v2661_v51 = vmul.f32 %v4459_v21, %v4602_v16 }
0x465d   :  { %v2662_v18 = vadd.f32 %v2661_v51, %v4605_v24 }
0x465f   :  { %2665 = vrot.lane.b32.xlu1 %v2662_v18, %s4510_s12  ;;  %v2663_v23 = vmul.f32 %v2662_v18, %v2599_v28 }
0x46d1   :  { %v2666_v41 = vpop.permute.xlu1 %2665 }
0x46d2   :  { %v2668_v25 = vmul.f32 %v2666_v41, %v2662_v18 }
0x46d4   :  { %2670 = vrot.lane.b32.xlu0 %v2668_v25, %s4511_s13 }
0x4746   :  { %v2671_v61 = vpop.permute.xlu0 %2670 }
0x4747   :  { %v2673_v26 = vadd.f32 %v2671_v61, %v2663_v23  ;;  %v5424_v61 = vld [vmem:[%s5614_s3 + $0x40] sm:$0xff]  }
0x4749   :  { %4460 = vtanh.f32 %v2673_v26 }
0x4753   :  { %v4461_v27 = vpop.eup %4460 }
0x4754   :  { %2676 = vrot.lane.b32.xlu1 %v4461_v27, %s4510_s12 }
0x47c6   :  { %v2677_v10 = vpop.permute.xlu1 %2676 }
0x47c7   :  { %v5359_v37 = vmul.f32 %v2677_v10, %v2662_v18 }
0x47c9   :  { %v2685_v5 = vpack.c.bf16 %v5359_v37, %v5359_v37 }
0x47cb   :  { %2687 = vrot.lane.b32.xlu0 %v2685_v5, %s4511_s13 }
0x483d   :  { %v2688_v14 = vpop.permute.xlu0 %2687 }
0x483e   :  { %4212 = vmatmul.mubr.msk.bf16.vlgmr.msra.gmra.mrb[72].mxu1 %vm171_vm5, %v2688_v14 }
0x483f   :  { %4224 = vmatpush3.bf16.msra.mxu1 %v5207_v55  ;;  %4227 = vmatprep.mubr.msk.bf16.mxu1 %vm4507_vm0, %v4506_v0 }
0x4840   :  { %4225 = vmatprep.subr.bf16.mxu1 %v4506_v0 }
0x4843   :  { %4226 = vmatpush3.bf16.msra.mxu1 %v5215_v57 }
0x4844   :  { %4243 = vmatprep.subr.bf16.mxu1 %v4506_v0 }
0x4911   :  { %v2726_v31 = vpop.f32.mrb[72].mxu1 }
0x4912   :  { %v2732_v35 = vadd.f32 %v2726_v31, %v2294_v39  ;;  %v4213_v38 = vpop.f32.mrb[73].mxu1 }
0x4913   :  { %v2729_v56 = vpop.f32.mrb[74].mxu1 }
0x4914   :  { %v2733_v40 = vmul.f32 %v2732_v35, %v4602_v16  ;;  %v4214_v2 = vpop.f32.mrb[75].mxu1 }
0x4915   :  { %v5459_v2 = vld [vmem:[%s5616_s4 + $0x4] ss:$0 sm:$0xff] }
0x4916   :  { %4462 = vtanh.f32 %v2733_v40 }
0x4920   :  { %v4463_v55 = vpop.eup %4462 }
0x4921   :  { %v2735_v42 = vmul.f32 %v4463_v55, %v4602_v16 }
0x4923   :  { %v2736_v45 = vadd.f32 %v2735_v42, %v4605_v24 }
0x4925   :  { %2739 = vrot.lane.b32.xlu1 %v2736_v45, %s4510_s12  ;;  %v2737_v22 = vmul.f32 %v2736_v45, %v2673_v26  ;;  %v5432_v26 = vld [vmem:[%s5614_s3 + $0x48] sm:$0xff]  }
0x4997   :  { %v2740_v57 = vpop.permute.xlu1 %2739 }
0x4998   :  { %v2742_v46 = vmul.f32 %v2740_v57, %v2736_v45 }
0x499a   :  { %2744 = vrot.lane.b32.xlu0 %v2742_v46, %s4511_s13 }
0x4a0c   :  { %v2745_v43 = vpop.permute.xlu0 %2744 }
0x4a0d   :  { %v2747_v59 = vadd.f32 %v2745_v43, %v2737_v22 }
0x4a0f   :  { %4464 = vtanh.f32 %v2747_v59 }
0x4a19   :  { %v4465_v20 = vpop.eup %4464 }
0x4a1a   :  { %2750 = vrot.lane.b32.xlu1 %v4465_v20, %s4510_s12 }
0x4a8c   :  { %v2751_v48 = vpop.permute.xlu1 %2750 }
0x4a8d   :  { %v5379_v53 = vmul.f32 %v2751_v48, %v2736_v45 }
0x4a8f   :  { %v2759_v50 = vpack.c.bf16 %v5379_v53, %v5379_v53 }
0x4a91   :  { %2761 = vrot.lane.b32.xlu0 %v2759_v50, %s4511_s13 }
0x4b03   :  { %v2762_v29 = vpop.permute.xlu0 %2761 }
0x4b04   :  { %4220 = vmatmul.mubr.msk.bf16.vlgmr.msra.gmra.mrb[76].mxu0 %vm171_vm5, %v2762_v29 }
0x4b05   :  { %4232 = vmatpush3.bf16.msra.mxu0 %v4340_v17 }
0x4bd7   :  { %v2800_v34 = vpop.f32.mrb[76].mxu0 }
0x4bd8   :  { %v2806_v7 = vadd.f32 %v2800_v34, %v2299_v47  ;;  %v4221_v8 = vpop.f32.mrb[77].mxu0 }
0x4bd9   :  { %v2803_v3 = vpop.f32.mrb[78].mxu0 }
0x4bda   :  { %v2807_v13 = vmul.f32 %v2806_v7, %v4602_v16  ;;  %v4222_v44 = vpop.f32.mrb[79].mxu0 }
0x4bdc   :  { %4466 = vtanh.f32 %v2807_v13 }
0x4be6   :  { %v4467_v54 = vpop.eup %4466 }
0x4be7   :  { %v2809_v28 = vmul.f32 %v4467_v54, %v4602_v16 }
0x4be9   :  { %v2810_v62 = vadd.f32 %v2809_v28, %v4605_v24 }
0x4beb   :  { %2813 = vrot.lane.b32.xlu1 %v2810_v62, %s4510_s12  ;;  %v2811_v1 = vmul.f32 %v2810_v62, %v2747_v59 }
0x4c5d   :  { %v2814_v52 = vpop.permute.xlu1 %2813 }
0x4c5e   :  { %v2816_v63 = vmul.f32 %v2814_v52, %v2810_v62 }
0x4c60   :  { %2818 = vrot.lane.b32.xlu0 %v2816_v63, %s4511_s13 }
0x4c64   :  { %2385 = vrot.lane.b32.xlu0 %v5255_v60, %s4511_s13  ;;  %v4341_v60 = vld [vmem:[%s5617_s2 + $0x38] sm:$0xff]  }
0x4c65   :  { %4233 = vmatprep.subr.bf16.mxu0 %v4341_v60 }
0x4c66   :  { %4234 = vmatpush3.bf16.msra.mxu0 %v4341_v60 }
0x4c67   :  { %4259 = vmatprep.subr.bf16.mxu0 %v4506_v0 }
0x4c68   :  { %2533 = vrot.lane.b32.xlu0 %v5320_v58, %s4511_s13 }
0x4cd2   :  { %v2819_v4 = vpop.permute.xlu0 %2818 }
0x4cd3   :  { %v5396_v11 = vadd.f32 %v2819_v4, %v2811_v1 }
0x4cd5   :  { %4468 = vtanh.f32 %v5396_v11 }
0x4cd6   :  { %v2386_v15 = vpop.permute.xlu0 %2385 }
0x4cd7   :  { %2388 = vst.msk [vmem:[#allocation2] sm:$0xff] %vm171_vm5, %v2386_v15 }
0x4cda   :  { %v2534_v9 = vpop.permute.xlu0 %2533 }
0x4cdb   :  { %2536 = vst.msk [vmem:[#allocation2 + $0x10] sm:$0xff] %vm171_vm5, %v2534_v9 }
0x4cde   :  { %v2907_v18 = vld [vmem:[#allocation2] sm:$0xff] }
0x4cdf   :  { %v4469_v58 = vpop.eup %4468 }
0x4ce0   :  { %2824 = vrot.lane.b32.xlu1 %v4469_v58, %s4510_s12 }
0x4ce4   :  { %2459 = vrot.lane.b32.xlu1 %v5286_v36, %s4511_s13 }
0x4ce8   :  { %2607 = vrot.lane.b32.xlu1 %v5340_v12, %s4511_s13  ;;  %v2909_v12 = vld [vmem:[#allocation2 + $0x10] sm:$0xff] }
0x4d52   :  { %v2825_v19 = vpop.permute.xlu1 %2824 }
0x4d53   :  { %v5413_v33 = vmul.f32 %v2825_v19, %v2810_v62 }
0x4d55   :  { %v2833_v30 = vpack.c.bf16 %v5413_v33, %v5413_v33 }
0x4d56   :  { %v2460_v21 = vpop.permute.xlu1 %2459 }
0x4d57   :  { %2462 = vst.msk [vmem:[#allocation2 + $0x8] sm:$0xff] %vm171_vm5, %v2460_v21  ;;  %2835 = vrot.lane.b32.xlu0 %v2833_v30, %s4511_s13 }
0x4d5a   :  { %v2608_v51 = vpop.permute.xlu1 %2607 }
0x4d5b   :  { %2610 = vst.msk [vmem:[#allocation2 + $0x18] sm:$0xff] %vm171_vm5, %v2608_v51 }
0x4d5e   :  { %v2908_v41 = vld [vmem:[#allocation2 + $0x8] sm:$0xff] }
0x4d5f   :  { %v2915_v36 = vpack.c.bf16 %v2908_v41, %v2907_v18 }
0x4d61   :  { %4235 = vmatprep.mubr.msk.bf16.mxu0 %vm171_vm5, %v2915_v36 }
0x4d62   :  { %v2910_v25 = vld [vmem:[#allocation2 + $0x18] sm:$0xff] }
0x4d63   :  { %v2916_v23 = vpack.c.bf16 %v2910_v25, %v2909_v12 }
0x4d65   :  { %4236 = vmatmul.mubr.msk.bf16.vlgmr.msra.gmra.mrb[80].mxu0 %vm171_vm5, %v2916_v23 }
0x4d66   :  { %4260 = vmatpush3.bf16.msra.mxu0 %v5424_v61 }
0x4d67   :  { %4261 = vmatprep.subr.bf16.mxu0 %v4506_v0 }
0x4d6a   :  { %4262 = vmatpush3.bf16.msra.mxu0 %v5432_v26 }
0x4d6b   :  { %4275 = vmatprep.subr.bf16.mxu0 %v4506_v0 }
0x4dc9   :  { %v2836_v27 = vpop.permute.xlu0 %2835 }
0x4dca   :  { %4228 = vmatmul.mubr.msk.bf16.vlgmr.msra.gmra.mrb[76].mxu1 %vm171_vm5, %v2836_v27 }
0x4dcb   :  { %4244 = vmatpush3.bf16.msra.mxu1 %v5424_v61  ;;  %4247 = vmatprep.mubr.msk.bf16.mxu1 %vm4507_vm0, %v4506_v0 }
0x4dcc   :  { %4245 = vmatprep.subr.bf16.mxu1 %v4506_v0 }
0x4dcf   :  { %4246 = vmatpush3.bf16.msra.mxu1 %v5432_v26 }
0x4dd0   :  { %4251 = vmatprep.subr.bf16.mxu1 %v4506_v0 }
0x4dd2   :  { %4248 = vmatmul.mubr.bf16.vlgmr.msra.gmra.mrb[80].mxu1 %v4508_v6  ;;  %v2302_v6 = vadd.f32 %v5308_v49, %v5242_v32 }
0x4dd3   :  { %4252 = vmatpush3.bf16.msra.mxu1 %v5424_v61  ;;  %4255 = vmatprep.mubr.msk.bf16.mxu1 %vm4507_vm0, %v4506_v0 }
0x4dd4   :  { %4253 = vmatprep.subr.bf16.mxu1 %v4506_v0 }
0x4dd7   :  { %4254 = vmatpush3.bf16.msra.mxu1 %v5432_v26 }
0x4dd8   :  { %4267 = vmatprep.subr.bf16.mxu1 %v4506_v0 }
0x4e38   :  { %v5450_v10 = vpop.f32.mrb[80].mxu0 }
0x4e39   :  { %v2990_v5 = vpop.f32.mrb[81].mxu0 }
0x4e3a   :  { %v5452_v14 = vpop.f32.mrb[82].mxu0  ;;  %v2991_v55 = vadd.f32 %v5459_v2, %v2990_v5 }
0x4e3b   :  { %v2993_v39 = vpop.f32.mrb[83].mxu0 }
0x4e3c   :  { %v2994_v58 = vadd.f32 %v5459_v2, %v2993_v39 }
0x4e9d   :  { %v2874_v31 = vpop.f32.mrb[76].mxu1 }
0x4e9e   :  { %v2880_v35 = vadd.f32 %v2874_v31, %v2302_v6  ;;  %v4229_v38 = vpop.f32.mrb[77].mxu1 }
0x4e9f   :  { %v2877_v56 = vpop.f32.mrb[78].mxu1 }
0x4ea0   :  { %v4230_v40 = vpop.f32.mrb[79].mxu1  ;;  %v2881_v50 = vmul.f32 %v2880_v35, %v4602_v16 }
0x4ea5   :  { %v3072_v42 = vpop.f32.mrb[80].mxu1 }
0x4ea6   :  { %v3078_v45 = vadd.f32 %v3072_v42, %v2991_v55  ;;  %v4249_v57 = vpop.f32.mrb[81].mxu1 }
0x4ea7   :  { %v3075_v46 = vpop.f32.mrb[82].mxu1 }
0x4ea8   :  { %v3079_v22 = vmul.f32 %v3078_v45, %v4602_v16  ;;  %v4250_v43 = vpop.f32.mrb[83].mxu1 }
0x4eaa   :  { %4470 = vtanh.f32 %v3079_v22 }
0x4eab   :  { %4472 = vtanh.f32 %v2881_v50 }
0x4eb4   :  { %v4471_v32 = vpop.eup %4470 }
0x4eb5   :  { %v3081_v49 = vmul.f32 %v4471_v32, %v4602_v16  ;;  %v4473_v7 = vpop.eup %4472 }
0x4eb6   :  { %v2883_v8 = vmul.f32 %v4473_v7, %v4602_v16 }
0x4eb7   :  { %v3082_v59 = vadd.f32 %v3081_v49, %v4605_v24 }
0x4eb8   :  { %v2884_v13 = vadd.f32 %v2883_v8, %v4605_v24 }
0x4eb9   :  { %3085 = vrot.lane.b32.xlu1 %v3082_v59, %s4510_s12  ;;  %v3083_v29 = vmul.f32 0.0, %v3082_v59 }
0x4eba   :  { %v2885_v1 = vmul.f32 %v2884_v13, %v5396_v11 }
0x4f2b   :  { %v3086_v20 = vpop.permute.xlu1 %3085 }
0x4f2c   :  { %v3088_v48 = vmul.f32 %v3086_v20, %v3082_v59  ;;  %v2999_v20 = vadd.f32 %v5450_v10, %v5459_v2 }
0x4f2e   :  { %3090 = vrot.lane.b32.xlu0 %v3088_v48, %s4511_s13 }
0x4fa0   :  { %v3091_v47 = vpop.permute.xlu0 %3090 }
0x4fa1   :  { %v3093_v34 = vadd.f32 %v3091_v47, %v3083_v29 }
0x4fa3   :  { %4474 = vtanh.f32 %v3093_v34 }
0x4fad   :  { %v4475_v3 = vpop.eup %4474 }
0x4fae   :  { %3096 = vrot.lane.b32.xlu1 %v4475_v3, %s4510_s12 }
0x4fb2   :  { %2887 = vrot.lane.b32.xlu1 %v2884_v13, %s4510_s12 }
0x5020   :  { %v3097_v44 = vpop.permute.xlu1 %3096 }
0x5021   :  { %v3099_v54 = vmul.f32 %v3097_v44, %v3082_v59 }
0x5023   :  { %v3100_v28 = vpack.c.bf16 %v3099_v54, %v3099_v54 }
0x5024   :  { %v2888_v62 = vpop.permute.xlu1 %2887 }
0x5025   :  { %v2890_v52 = vmul.f32 %v2888_v62, %v2884_v13  ;;  %3102 = vrot.lane.b32.xlu0 %v3100_v28, %s4511_s13 }
0x5027   :  { %2892 = vrot.lane.b32.xlu1 %v2890_v52, %s4511_s13 }
0x5097   :  { %v3103_v63 = vpop.permute.xlu0 %3102 }
0x5098   :  { %4256 = vmatmul.mubr.msk.bf16.vlgmr.msra.gmra.mrb[84].mxu1 %vm171_vm5, %v3103_v63 }
0x5099   :  { %v2893_v4 = vpop.permute.xlu1 %2892  ;;  %4268 = vmatpush3.bf16.msra.mxu1 %v5424_v61  ;;  %4271 = vmatprep.mubr.msk.bf16.mxu1 %vm4507_vm0, %v4506_v0 }
0x509a   :  { %v2895_v15 = vadd.f32 %v2893_v4, %v2885_v1  ;;  %4269 = vmatprep.subr.bf16.mxu1 %v4506_v0 }
0x509c   :  { %4476 = vtanh.f32 %v2895_v15 }
0x509d   :  { %4270 = vmatpush3.bf16.msra.mxu1 %v5432_v26 }
0x509e   :  { %4283 = vmatprep.subr.bf16.mxu1 %v4506_v0 }
0x50a6   :  { %v4477_v9 = vpop.eup %4476 }
0x50a7   :  { %2898 = vrot.lane.b32.xlu1 %v4477_v9, %s4510_s12  ;;  %v3002_v9 = vadd.f32 %v5452_v14, %v5459_v2 }
0x50ab   :  { %2681 = vrot.lane.b32.xlu1 %v5359_v37, %s4511_s13 }
0x50af   :  { %2829 = vrot.lane.b32.xlu1 %v5413_v33, %s4511_s13 }
0x5119   :  { %v2899_v11 = vpop.permute.xlu1 %2898 }
0x511a   :  { %v2901_v6 = vmul.f32 %v2899_v11, %v2884_v13 }
0x511d   :  { %v2682_v17 = vpop.permute.xlu1 %2681 }
0x511e   :  { %2684 = vst.msk [vmem:[#allocation2 + $0x20] sm:$0xff] %vm171_vm5, %v2682_v17 }
0x5121   :  { %v2830_v60 = vpop.permute.xlu1 %2829 }
0x5122   :  { %2832 = vst.msk [vmem:[#allocation2 + $0x30] sm:$0xff] %vm171_vm5, %v2830_v60 }
0x5125   :  { %v2911_v55 = vld [vmem:[#allocation2 + $0x20] sm:$0xff] }
0x516b   :  { %v3141_v19 = vpop.f32.mrb[84].mxu1 }
0x516c   :  { %v3147_v30 = vadd.f32 %v3141_v19, %v2994_v58  ;;  %v4257_v21 = vpop.f32.mrb[85].mxu1 }
0x516d   :  { %v3144_v51 = vpop.f32.mrb[86].mxu1 }
0x516e   :  { %v3148_v18 = vmul.f32 %v3147_v30, %v4602_v16  ;;  %v4258_v41 = vpop.f32.mrb[87].mxu1 }
0x5170   :  { %4478 = vtanh.f32 %v3148_v18 }
0x517a   :  { %v4479_v37 = vpop.eup %4478 }
0x517b   :  { %v3150_v33 = vmul.f32 %v4479_v37, %v4602_v16 }
0x517d   :  { %v3151_v36 = vadd.f32 %v3150_v33, %v4605_v24 }
0x517f   :  { %3154 = vrot.lane.b32.xlu0 %v3151_v36, %s4510_s12  ;;  %v3152_v23 = vmul.f32 %v3151_v36, %v3093_v34 }
0x51f1   :  { %v3155_v12 = vpop.permute.xlu0 %3154 }
0x51f2   :  { %v3157_v25 = vmul.f32 %v3155_v12, %v3151_v36 }
0x51f4   :  { %3159 = vrot.lane.b32.xlu0 %v3157_v25, %s4511_s13 }
0x5266   :  { %v3160_v27 = vpop.permute.xlu0 %3159 }
0x5267   :  { %v3162_v5 = vadd.f32 %v3160_v27, %v3152_v23 }
0x5269   :  { %4480 = vtanh.f32 %v3162_v5 }
0x5273   :  { %v4481_v39 = vpop.eup %4480 }
0x5274   :  { %3165 = vrot.lane.b32.xlu0 %v4481_v39, %s4510_s12 }
0x5278   :  { %2755 = vrot.lane.b32.xlu0 %v5379_v53, %s4511_s13  ;;  %v2913_v53 = vld [vmem:[#allocation2 + $0x30] sm:$0xff] }
0x527c   :  { %2903 = vrot.lane.b32.xlu0 %v2901_v6, %s4511_s13 }
0x52e6   :  { %v3166_v31 = vpop.permute.xlu0 %3165 }
0x52e7   :  { %v3168_v35 = vmul.f32 %v3166_v31, %v3151_v36 }
0x52e9   :  { %v3169_v38 = vpack.c.bf16 %v3168_v35, %v3168_v35 }
0x52ea   :  { %v2756_v56 = vpop.permute.xlu0 %2755 }
0x52eb   :  { %2758 = vst.msk [vmem:[#allocation2 + $0x28] sm:$0xff] %vm171_vm5, %v2756_v56  ;;  %3171 = vrot.lane.b32.xlu1 %v3169_v38, %s4511_s13 }
0x52ee   :  { %v2904_v40 = vpop.permute.xlu0 %2903 }
0x52ef   :  { %2906 = vst.msk [vmem:[#allocation2 + $0x38] sm:$0xff] %vm171_vm5, %v2904_v40 }
0x52f2   :  { %v2912_v42 = vld [vmem:[#allocation2 + $0x28] sm:$0xff] }
0x52f3   :  { %v2917_v45 = vpack.c.bf16 %v2912_v42, %v2911_v55 }
0x52f5   :  { %4239 = vmatprep.mubr.msk.bf16.mxu0 %vm171_vm5, %v2917_v45 }
0x52f6   :  { %v2914_v57 = vld [vmem:[#allocation2 + $0x38] sm:$0xff] }
0x52f7   :  { %v2918_v46 = vpack.c.bf16 %v2914_v57, %v2913_v53 }
0x52f9   :  { %4240 = vmatmul.mubr.msk.bf16.gmra.mrb[84].mxu0 %vm171_vm5, %v2918_v46 }
0x52fa   :  { %4263 = vmatprep.mubr.msk.bf16.mxu0 %vm4507_vm0, %v4506_v0 }
0x535d   :  { %v3172_v22 = vpop.permute.xlu1 %3171 }
0x535e   :  { %4264 = vmatmul.mubr.msk.bf16.vlgmr.msra.gmra.mrb[88].mxu0 %vm171_vm5, %v3172_v22 }
0x535f   :  { %4276 = vmatpush3.bf16.msra.mxu0 %v5424_v61  ;;  %4279 = vmatprep.mubr.msk.bf16.mxu0 %vm4507_vm0, %v4506_v0 }
0x5360   :  { %4277 = vmatprep.subr.bf16.mxu0 %v4506_v0 }
0x5363   :  { %4278 = vmatpush3.bf16.msra.mxu0 %v5432_v26 }
0x5364   :  { %4291 = vmatprep.subr.bf16.mxu0 %v4506_v0 }
0x53cc   :  { %v5513_v43 = vpop.f32.mrb[84].mxu0 }
0x53cd   :  { %v5515_v32 = vpop.f32.mrb[85].mxu0 }
0x53ce   :  { %v5517_v49 = vpop.f32.mrb[86].mxu0  ;;  %v3007_v39 = vadd.f32 %v5459_v2, %v5515_v32 }
0x53cf   :  { %v5519_v59 = vpop.f32.mrb[87].mxu0 }
0x5431   :  { %v3210_v48 = vpop.f32.mrb[88].mxu0 }
0x5432   :  { %v3216_v50 = vadd.f32 %v3210_v48, %v2999_v20  ;;  %v4265_v29 = vpop.f32.mrb[89].mxu0 }
0x5433   :  { %v3213_v47 = vpop.f32.mrb[90].mxu0 }
0x5434   :  { %v3217_v34 = vmul.f32 %v3216_v50, %v4602_v16  ;;  %v4266_v7 = vpop.f32.mrb[91].mxu0 }
0x5436   :  { %4482 = vtanh.f32 %v3217_v34  ;;  %v3010_v34 = vadd.f32 %v5459_v2, %v5519_v59 }
0x5440   :  { %v4483_v8 = vpop.eup %4482 }
0x5441   :  { %v3219_v3 = vmul.f32 %v4483_v8, %v4602_v16 }
0x5443   :  { %v3220_v13 = vadd.f32 %v3219_v3, %v4605_v24 }
0x5445   :  { %3223 = vrot.lane.b32.xlu0 %v3220_v13, %s4510_s12  ;;  %v3221_v10 = vmul.f32 %v3220_v13, %v3162_v5 }
0x54b7   :  { %v3224_v44 = vpop.permute.xlu0 %3223 }
0x54b8   :  { %v3226_v54 = vmul.f32 %v3224_v44, %v3220_v13 }
0x54ba   :  { %3228 = vrot.lane.b32.xlu1 %v3226_v54, %s4511_s13 }
0x552c   :  { %v3229_v28 = vpop.permute.xlu1 %3228 }
0x552d   :  { %v3231_v62 = vadd.f32 %v3229_v28, %v3221_v10 }
0x552f   :  { %4484 = vtanh.f32 %v3231_v62 }
0x5539   :  { %v4485_v52 = vpop.eup %4484 }
0x553a   :  { %3234 = vrot.lane.b32.xlu0 %v4485_v52, %s4510_s12 }
0x55ac   :  { %v3235_v63 = vpop.permute.xlu0 %3234 }
0x55ad   :  { %v3237_v1 = vmul.f32 %v3235_v63, %v3220_v13 }
0x55af   :  { %v3238_v4 = vpack.c.bf16 %v3237_v1, %v3237_v1 }
0x55b1   :  { %3240 = vrot.lane.b32.xlu1 %v3238_v4, %s4511_s13 }
0x5623   :  { %v3241_v15 = vpop.permute.xlu1 %3240 }
0x5624   :  { %4272 = vmatmul.mubr.msk.bf16.vlgmr.msra.gmra.mrb[88].mxu1 %vm171_vm5, %v3241_v15 }
0x5625   :  { %4284 = vmatpush3.bf16.msra.mxu1 %v5424_v61  ;;  %4287 = vmatprep.mubr.msk.bf16.mxu1 %vm4507_vm0, %v4506_v0 }
0x5626   :  { %4285 = vmatprep.subr.bf16.mxu1 %v4506_v0 }
0x5629   :  { %4286 = vmatpush3.bf16.msra.mxu1 %v5432_v26 }
0x562a   :  { %4299 = vmatprep.subr.bf16.mxu1 %v4506_v0 }
0x56f7   :  { %v3279_v11 = vpop.f32.mrb[88].mxu1 }
0x56f8   :  { %v3285_v17 = vadd.f32 %v3279_v11, %v3002_v9  ;;  %v4273_v60 = vpop.f32.mrb[89].mxu1 }
0x56f9   :  { %v3282_v58 = vpop.f32.mrb[90].mxu1 }
0x56fa   :  { %v3286_v19 = vmul.f32 %v3285_v17, %v4602_v16  ;;  %v4274_v30 = vpop.f32.mrb[91].mxu1  ;;  %v3015_v17 = vadd.f32 %v5513_v43, %v5459_v2 }
0x56fc   :  { %4486 = vtanh.f32 %v3286_v19 }
0x5706   :  { %v4487_v21 = vpop.eup %4486 }
0x5707   :  { %v3288_v51 = vmul.f32 %v4487_v21, %v4602_v16 }
0x5709   :  { %v3289_v18 = vadd.f32 %v3288_v51, %v4605_v24 }
0x570b   :  { %3292 = vrot.lane.b32.xlu0 %v3289_v18, %s4510_s12  ;;  %v3290_v14 = vmul.f32 %v3289_v18, %v3231_v62 }
0x577d   :  { %v3293_v41 = vpop.permute.xlu0 %3292 }
0x577e   :  { %v3295_v37 = vmul.f32 %v3293_v41, %v3289_v18 }
0x5780   :  { %3297 = vrot.lane.b32.xlu1 %v3295_v37, %s4511_s13 }
0x57f2   :  { %v3298_v33 = vpop.permute.xlu1 %3297 }
0x57f3   :  { %v3300_v36 = vadd.f32 %v3298_v33, %v3290_v14 }
0x57f5   :  { %4488 = vtanh.f32 %v3300_v36 }
0x57ff   :  { %v4489_v12 = vpop.eup %4488 }
0x5800   :  { %3303 = vrot.lane.b32.xlu0 %v4489_v12, %s4510_s12 }
0x5872   :  { %v3304_v25 = vpop.permute.xlu0 %3303 }
0x5873   :  { %v3306_v23 = vmul.f32 %v3304_v25, %v3289_v18 }
0x5875   :  { %v3307_v27 = vpack.c.bf16 %v3306_v23, %v3306_v23 }
0x5877   :  { %3309 = vrot.lane.b32.xlu1 %v3307_v27, %s4511_s13 }
0x58e9   :  { %v3310_v5 = vpop.permute.xlu1 %3309 }
0x58ea   :  { %4280 = vmatmul.mubr.msk.bf16.vlgmr.msra.gmra.mrb[92].mxu0 %vm171_vm5, %v3310_v5 }
0x58eb   :  { %4292 = vmatpush3.bf16.msra.mxu0 %v5424_v61  ;;  %4295 = vmatprep.mubr.msk.bf16.mxu0 %vm4507_vm0, %v4506_v0 }
0x58ec   :  { %4293 = vmatprep.subr.bf16.mxu0 %v4506_v0 }
0x58ef   :  { %4294 = vmatpush3.bf16.msra.mxu0 %v5432_v26 }
0x58f0   :  { %4307 = vmatprep.subr.bf16.mxu0 %v4506_v0 }
0x59bd   :  { %v3348_v6 = vpop.f32.mrb[92].mxu0 }
0x59be   :  { %v3354_v31 = vadd.f32 %v3348_v6, %v3007_v39  ;;  %v4281_v35 = vpop.f32.mrb[93].mxu0  ;;  %v3018_v6 = vadd.f32 %v5517_v49, %v5459_v2 }
0x59bf   :  { %v3351_v38 = vpop.f32.mrb[94].mxu0 }
0x59c0   :  { %v3355_v56 = vmul.f32 %v3354_v31, %v4602_v16  ;;  %v4282_v40 = vpop.f32.mrb[95].mxu0 }
0x59c2   :  { %4490 = vtanh.f32 %v3355_v56 }
0x59cc   :  { %v4491_v55 = vpop.eup %4490 }
0x59cd   :  { %v3357_v42 = vmul.f32 %v4491_v55, %v4602_v16 }
0x59cf   :  { %v3358_v45 = vadd.f32 %v3357_v42, %v4605_v24 }
0x59d1   :  { %3361 = vrot.lane.b32.xlu0 %v3358_v45, %s4510_s12  ;;  %v3359_v46 = vmul.f32 %v3358_v45, %v3300_v36 }
0x5a43   :  { %v3362_v53 = vpop.permute.xlu0 %3361 }
0x5a44   :  { %v3364_v57 = vmul.f32 %v3362_v53, %v3358_v45 }
0x5a46   :  { %3366 = vrot.lane.b32.xlu1 %v3364_v57, %s4511_s13 }
0x5ab8   :  { %v3367_v22 = vpop.permute.xlu1 %3366 }
0x5ab9   :  { %v3369_v32 = vadd.f32 %v3367_v22, %v3359_v46 }
0x5abb   :  { %4492 = vtanh.f32 %v3369_v32 }
0x5ac5   :  { %v4493_v20 = vpop.eup %4492 }
0x5ac6   :  { %3372 = vrot.lane.b32.xlu0 %v4493_v20, %s4510_s12 }
0x5b38   :  { %v3373_v48 = vpop.permute.xlu0 %3372 }
0x5b39   :  { %v3375_v50 = vmul.f32 %v3373_v48, %v3358_v45 }
0x5b3b   :  { %v3376_v29 = vpack.c.bf16 %v3375_v50, %v3375_v50 }
0x5b3d   :  { %3378 = vrot.lane.b32.xlu1 %v3376_v29, %s4511_s13 }
0x5baf   :  { %v3379_v47 = vpop.permute.xlu1 %3378 }
0x5bb0   :  { %4288 = vmatmul.mubr.msk.bf16.vlgmr.msra.gmra.mrb[92].mxu1 %vm171_vm5, %v3379_v47  ;;  %v3773_v47 = vld [vmem:[%s5619_s6] ss:$0 sm:$0xff] }
0x5bb1   :  { %4300 = vmatpush3.bf16.msra.mxu1 %v5424_v61  ;;  %4303 = vmatprep.mubr.msk.bf16.mxu1 %vm4507_vm0, %v4506_v0 }
0x5bb2   :  { %4301 = vmatprep.subr.bf16.mxu1 %v4506_v0 }
0x5bb5   :  { %4302 = vmatpush3.bf16.msra.mxu1 %v5432_v26 }
0x5c83   :  { %v3417_v7 = vpop.f32.mrb[92].mxu1 }
0x5c84   :  { %v3423_v8 = vadd.f32 %v3417_v7, %v3010_v34  ;;  %v4289_v3 = vpop.f32.mrb[93].mxu1 }
0x5c85   :  { %v3420_v13 = vpop.f32.mrb[94].mxu1 }
0x5c86   :  { %v3424_v44 = vmul.f32 %v3423_v8, %v4602_v16  ;;  %v4290_v54 = vpop.f32.mrb[95].mxu1 }
0x5c88   :  { %4494 = vtanh.f32 %v3424_v44 }
0x5c92   :  { %v4495_v10 = vpop.eup %4494 }
0x5c93   :  { %v3426_v61 = vmul.f32 %v4495_v10, %v4602_v16 }
0x5c95   :  { %v3427_v28 = vadd.f32 %v3426_v61, %v4605_v24 }
0x5c97   :  { %3430 = vrot.lane.b32.xlu0 %v3427_v28, %s4510_s12  ;;  %v3428_v59 = vmul.f32 %v3427_v28, %v3369_v32  ;;  %v4344_v32 = vld [vmem:[%s5618_s5] sm:$0xff]  }
0x5d09   :  { %v3431_v62 = vpop.permute.xlu0 %3430 }
0x5d0a   :  { %v3433_v26 = vmul.f32 %v3431_v62, %v3427_v28 }
0x5d0c   :  { %3435 = vrot.lane.b32.xlu1 %v3433_v26, %s4511_s13 }
0x5d7e   :  { %v3436_v52 = vpop.permute.xlu1 %3435 }
0x5d7f   :  { %v3438_v63 = vadd.f32 %v3436_v52, %v3428_v59 }
0x5d81   :  { %4496 = vtanh.f32 %v3438_v63 }
0x5d8b   :  { %v4497_v1 = vpop.eup %4496 }
0x5d8c   :  { %3441 = vrot.lane.b32.xlu0 %v4497_v1, %s4510_s12 }
0x5dfe   :  { %v3442_v4 = vpop.permute.xlu0 %3441 }
0x5dff   :  { %v3444_v15 = vmul.f32 %v3442_v4, %v3427_v28 }
0x5e01   :  { %v3445_v9 = vpack.c.bf16 %v3444_v15, %v3444_v15 }
0x5e03   :  { %3447 = vrot.lane.b32.xlu1 %v3445_v9, %s4511_s13 }
0x5e75   :  { %v3448_v11 = vpop.permute.xlu1 %3447 }
0x5e76   :  { %4296 = vmatmul.mubr.msk.bf16.vlgmr.msra.gmra.mrb[96].mxu0 %vm171_vm5, %v3448_v11 }
0x5e77   :  { %4311 = vmatprep.mubr.msk.bf16.mxu0 %vm4507_vm0, %v4506_v0  ;;  %4308 = vmatpush3.bf16.msra.mxu0 %v4344_v32 }
0x5e78   :  { %4309 = vmatprep.subr.bf16.mxu0 %v4506_v0 }
0x5f49   :  { %v3486_v60 = vpop.f32.mrb[96].mxu0 }
0x5f4a   :  { %v3492_v58 = vadd.f32 %v3486_v60, %v3015_v17  ;;  %v4297_v19 = vpop.f32.mrb[97].mxu0 }
0x5f4b   :  { %v3489_v30 = vpop.f32.mrb[98].mxu0 }
0x5f4c   :  { %v3493_v21 = vmul.f32 %v3492_v58, %v4602_v16  ;;  %v4298_v51 = vpop.f32.mrb[99].mxu0 }
0x5f4e   :  { %4498 = vtanh.f32 %v3493_v21 }
0x5f58   :  { %v4499_v18 = vpop.eup %4498 }
0x5f59   :  { %v3495_v41 = vmul.f32 %v4499_v18, %v4602_v16 }
0x5f5b   :  { %v3496_v37 = vadd.f32 %v3495_v41, %v4605_v24 }
0x5f5d   :  { %3499 = vrot.lane.b32.xlu0 %v3496_v37, %s4510_s12  ;;  %v3497_v43 = vmul.f32 %v3496_v37, %v3438_v63 }
0x5fcf   :  { %v3500_v14 = vpop.permute.xlu0 %3499 }
0x5fd0   :  { %v3502_v33 = vmul.f32 %v3500_v14, %v3496_v37 }
0x5fd2   :  { %3504 = vrot.lane.b32.xlu1 %v3502_v33, %s4511_s13 }
0x6044   :  { %v3505_v36 = vpop.permute.xlu1 %3504 }
0x6045   :  { %v3507_v12 = vadd.f32 %v3505_v36, %v3497_v43 }
0x6047   :  { %4500 = vtanh.f32 %v3507_v12 }
0x6051   :  { %v4501_v25 = vpop.eup %4500 }
0x6052   :  { %3510 = vrot.lane.b32.xlu0 %v4501_v25, %s4510_s12 }
0x60c4   :  { %v3511_v23 = vpop.permute.xlu0 %3510 }
0x60c5   :  { %v3513_v27 = vmul.f32 %v3511_v23, %v3496_v37 }
0x60c7   :  { %v3514_v5 = vpack.c.bf16 %v3513_v27, %v3513_v27 }
0x60c9   :  { %3516 = vrot.lane.b32.xlu1 %v3514_v5, %s4511_s13 }
0x613b   :  { %v3517_v39 = vpop.permute.xlu1 %3516 }
0x613c   :  { %4304 = vmatmul.mubr.msk.bf16.vlgmr.msra.gmra.mrb[96].mxu1 %vm171_vm5, %v3517_v39 }
0x620f   :  { %v3555_v31 = vpop.f32.mrb[96].mxu1 }
0x6210   :  { %v3561_v35 = vadd.f32 %v3555_v31, %v3018_v6  ;;  %v4305_v38 = vpop.f32.mrb[97].mxu1 }
0x6211   :  { %v3558_v56 = vpop.f32.mrb[98].mxu1 }
0x6212   :  { %v3562_v40 = vmul.f32 %v3561_v35, %v4602_v16  ;;  %v4306_v55 = vpop.f32.mrb[99].mxu1 }
0x6214   :  { %4502 = vtanh.f32 %v3562_v40 }
0x621e   :  { %v4503_v42 = vpop.eup %4502 }
0x621f   :  { %v3564_v45 = vmul.f32 %v4503_v42, %v4602_v16  ;;  %v4345_v16 = vld [vmem:[%s5618_s5 + $0x8] sm:$0xff]  }
0x6220   :  { %4310 = vmatpush3.bf16.msra.mxu0 %v4345_v16 }
0x6221   :  { %v3565_v53 = vadd.f32 %v3564_v45, %v4605_v24 }
0x6223   :  { %3568 = vrot.lane.b32.xlu0 %v3565_v53, %s4510_s12  ;;  %v3566_v2 = vmul.f32 %v3565_v53, %v3507_v12 }
0x6295   :  { %v3569_v57 = vpop.permute.xlu0 %3568 }
0x6296   :  { %v3571_v46 = vmul.f32 %v3569_v57, %v3565_v53 }
0x6298   :  { %3573 = vrot.lane.b32.xlu1 %v3571_v46, %s4511_s13 }
0x630a   :  { %v3574_v49 = vpop.permute.xlu1 %3573 }
0x630b   :  { %v3576_v22 = vadd.f32 %v3574_v49, %v3566_v2 }
0x630d   :  { %4504 = vtanh.f32 %v3576_v22 }
0x6317   :  { %v4505_v24 = vpop.eup %4504 }
0x6318   :  { %3579 = vrot.lane.b32.xlu0 %v4505_v24, %s4510_s12 }
0x638a   :  { %v3580_v20 = vpop.permute.xlu0 %3579 }
0x638b   :  { %v3582_v48 = vmul.f32 %v3580_v20, %v3565_v53 }
0x638d   :  { %v3583_v50 = vpack.c.bf16 %v3582_v48, %v3582_v48 }
0x638f   :  { %3596 = vrot.lane.b32.xlu1 %v3583_v50, %s4511_s13 }
0x6401   :  { %v3597_v29 = vpop.permute.xlu1 %3596 }
0x6402   :  { %4312 = vmatmul.mubr.msk.bf16.vlgmr.msra.gmra.mrb[100].mxu0 %vm171_vm5, %v3597_v29 }
0x64d5   :  { %v3647_v34 = vpop.f32.mrb[100].mxu0 }
0x64d6   :  { %v3648_v7 = vadd.f32 %v3773_v47, %v3647_v34  ;;  %v4313_v8 = vpop.f32.mrb[101].mxu0 }
0x64d7   :  { %v3650_v0 = vpop.f32.mrb[102].mxu0 }
0x64d8   :  { %3653 = vst [vmem:[%s5620_s7] sm:$0xff] %v3648_v7  ;;  %v4314_v3 = vpop.f32.mrb[103].mxu0 }

</bundles_post_ra>
